<compile_context>
chip_gen: v5e
topology: v5e:2x2
jax: 0.10.0
libtpu: 0.0.40
codegen_flags: <defaults>
</compile_context>

<pallas_src>
import jax
import jax.numpy as jnp
from jax.experimental import pallas as pl
from jax.experimental.pallas import tpu as pltpu

IN_FEATURES = 900        # 30 * 30
HID1 = 900
HID2 = 100
NUM_CLASSES = 9

K1 = 1024                # 900 padded up to 8 * 128
K2 = 128                 # 100 padded up to 128


def _round_up(n, m):
    return (n + m - 1) // m * m


def _mlp_softmax_kernel(x_ref, w1_ref, b1_ref, w2_ref, b2_ref, w3_ref, b3_ref,
                        o_ref):
    """One batch tile: 3 matmuls (bf16 in / f32 acc) + ReLU + stable softmax."""
    x = x_ref[...]                                               # (TB, K1) bf16

    # Linear(900 -> 900) + ReLU    (zero-padded to 1024 -> 1024)
    h1 = jnp.dot(x, w1_ref[...], preferred_element_type=jnp.float32)
    h1 = jnp.maximum(h1 + b1_ref[...], 0.0)                      # f32 (TB, K1)

    # Linear(900 -> 100) + ReLU    (zero-padded to 1024 -> 128)
    h2 = jnp.dot(h1.astype(jnp.bfloat16), w2_ref[...],
                 preferred_element_type=jnp.float32)
    h2 = jnp.maximum(h2 + b2_ref[...], 0.0)                      # f32 (TB, K2)

    # Linear(100 -> 9)             (zero-padded to 128 -> 9)
    logits = jnp.dot(h2.astype(jnp.bfloat16), w3_ref[...],
                     preferred_element_type=jnp.float32)
    logits = logits + b3_ref[...]                                # f32 (TB, 9)

    # Numerically-stable softmax over the class axis (axis=1).
    m = jnp.max(logits, axis=1, keepdims=True)
    e = jnp.exp(logits - m)
    denom = jnp.sum(e, axis=1, keepdims=True)
    o_ref[...] = (e * pl.reciprocal(denom, approx=True)).astype(o_ref.dtype)


def prepare_params(params):
    """Pad weights to lane-friendly shapes + cast to bf16 (host-side, once)."""
    w1, b1, w2, b2, w3, b3 = params
    w1p = jnp.pad(w1, ((0, K1 - IN_FEATURES), (0, K1 - HID1))).astype(jnp.bfloat16)
    b1p = jnp.pad(b1, ((0, 0), (0, K1 - HID1))).astype(jnp.float32)
    w2p = jnp.pad(w2, ((0, K1 - HID1), (0, K2 - HID2))).astype(jnp.bfloat16)
    b2p = jnp.pad(b2, ((0, 0), (0, K2 - HID2))).astype(jnp.float32)
    w3p = jnp.pad(w3, ((0, K2 - HID2), (0, 0))).astype(jnp.bfloat16)
    b3p = b3.astype(jnp.float32)
    return (w1p, b1p, w2p, b2p, w3p, b3p)


def cnn_forward(x, padded_params, *, max_batch_tile=256):
    """x: (B, 1, 30, 30) float32 NCHW. Returns (B, 9) f32 softmax probabilities."""
    w1, b1, w2, b2, w3, b3 = padded_params
    B = x.shape[0]
    x_flat = x.reshape(B, IN_FEATURES)                           # Flatten (glue)

    # Batch tile: multiple of 8 sublanes, up to 256 rows (fills MXU M dim).
    TB = min(max_batch_tile, _round_up(B, 8))
    B_pad = _round_up(B, TB)
    # Pad batch to a multiple of TB and features 900 -> 1024 (zeros are inert).
    x_pad = jnp.pad(x_flat, ((0, B_pad - B), (0, K1 - IN_FEATURES)))
    x_bf16 = x_pad.astype(jnp.bfloat16)

    out = pl.pallas_call(
        _mlp_softmax_kernel,
        out_shape=jax.ShapeDtypeStruct((B_pad, NUM_CLASSES), jnp.float32),
        grid=(B_pad // TB,),
        in_specs=[
            pl.BlockSpec((TB, K1), lambda i: (i, 0)),            # x tile (pipelined)
            pl.BlockSpec((K1, K1), lambda i: (0, 0)),            # w1 (resident)
            pl.BlockSpec((1, K1), lambda i: (0, 0)),             # b1
            pl.BlockSpec((K1, K2), lambda i: (0, 0)),            # w2 (resident)
            pl.BlockSpec((1, K2), lambda i: (0, 0)),             # b2
            pl.BlockSpec((K2, NUM_CLASSES), lambda i: (0, 0)),   # w3 (resident)
            pl.BlockSpec((1, NUM_CLASSES), lambda i: (0, 0)),    # b3
        ],
        out_specs=pl.BlockSpec((TB, NUM_CLASSES), lambda i: (i, 0)),
        compiler_params=pltpu.CompilerParams(
            dimension_semantics=("parallel",)),
    )(x_bf16, w1, b1, w2, b2, w3, b3)
    return out[:B]


def init_params(key):
    """Deterministic init mirroring nn.Linear's U(-1/sqrt(fan_in), +1/sqrt(fan_in)).

    Weights stored already transposed to (in_features, out_features) so the
    kernel computes x @ W + b directly. Returned unpadded / float32 (reference
    layout); pass through prepare_params() before cnn_forward.
    """
    def linear(key, fan_in, fan_out):
        kw, kb = jax.random.split(key)
        bound = 1.0 / jnp.sqrt(fan_in)
        w = jax.random.uniform(kw, (fan_in, fan_out), jnp.float32,
                               minval=-bound, maxval=bound)
        b = jax.random.uniform(kb, (1, fan_out), jnp.float32,
                               minval=-bound, maxval=bound)
        return w, b

    k1, k2, k3 = jax.random.split(key, 3)
    w1, b1 = linear(k1, IN_FEATURES, HID1)
    w2, b2 = linear(k2, HID1, HID2)
    w3, b3 = linear(k3, HID2, NUM_CLASSES)
    return (w1, b1, w2, b2, w3, b3)


def _reference_forward(x, params):
    """Pure-JAX f32 reference for correctness checking."""
    w1, b1, w2, b2, w3, b3 = params
    h = x.reshape(x.shape[0], -1)
    h = jnp.maximum(h @ w1 + b1, 0.0)
    h = jnp.maximum(h @ w2 + b2, 0.0)
    logits = h @ w3 + b3
    return jax.nn.softmax(logits, axis=1)


if __name__ == "__main__":
    key = jax.random.PRNGKey(0)
    k_params, k_x1, k_x2 = jax.random.split(key, 3)

    params = init_params(k_params)
    padded = prepare_params(params)

    # Small batch; spatial must be 30x30 because of Linear(30*30, ...).
    x = jax.random.normal(k_x1, (2, 1, 30, 30), dtype=jnp.float32)
    out = jax.block_until_ready(cnn_forward(x, padded))
    ref = _reference_forward(x, params)
    assert out.shape == (2, NUM_CLASSES)
    # bf16 matmul inputs + approx reciprocal -> ~1e-3 level error vs f32 ref.
    assert jnp.max(jnp.abs(out - ref)) < 2e-2
    assert jnp.allclose(jnp.sum(out, axis=1), 1.0, atol=5e-3)

    # Larger batch exercises the batch grid (multiple tiles + batch padding).
    xb = jax.random.normal(k_x2, (300, 1, 30, 30), dtype=jnp.float32)
    outb = jax.block_until_ready(cnn_forward(xb, padded))
    refb = _reference_forward(xb, params)
    assert outb.shape == (300, NUM_CLASSES)
    assert jnp.max(jnp.abs(outb - refb)) < 2e-2
    assert jnp.allclose(jnp.sum(outb, axis=1), 1.0, atol=5e-3)

    print("KERNEL_OK")
</pallas_src>

<mosaic_0001>
module attributes {stable_mosaic.version = 11 : i64} {
  func.func @_mlp_softmax_kernel(%arg0: i32, %arg1: memref<8x1024xbf16, #tpu.memory_space<vmem>>, %arg2: memref<1024x1024xbf16, #tpu.memory_space<vmem>>, %arg3: memref<1x1024xf32, #tpu.memory_space<vmem>>, %arg4: memref<1024x128xbf16, #tpu.memory_space<vmem>>, %arg5: memref<1x128xf32, #tpu.memory_space<vmem>>, %arg6: memref<128x9xbf16, #tpu.memory_space<vmem>>, %arg7: memref<1x9xf32, #tpu.memory_space<vmem>>, %arg8: memref<8x9xf32, #tpu.memory_space<vmem>>) attributes {dimension_semantics = [#tpu.dimension_semantics<parallel>], iteration_bounds = array<i64: 1>, scalar_prefetch = 0 : i64, scratch_operands = 0 : i64, tpu.core_type = #tpu.core_type<tc>, window_params = [{transform_indices = @transform_0, window_bounds = array<i64: 8, 1024>}, {pipeline_mode = #tpu.pipeline_mode<synchronous>, transform_indices = @transform_1, window_bounds = array<i64: 1024, 1024>}, {pipeline_mode = #tpu.pipeline_mode<synchronous>, transform_indices = @transform_2, window_bounds = array<i64: 1, 1024>}, {pipeline_mode = #tpu.pipeline_mode<synchronous>, transform_indices = @transform_3, window_bounds = array<i64: 1024, 128>}, {pipeline_mode = #tpu.pipeline_mode<synchronous>, transform_indices = @transform_4, window_bounds = array<i64: 1, 128>}, {pipeline_mode = #tpu.pipeline_mode<synchronous>, transform_indices = @transform_5, window_bounds = array<i64: 128, 9>}, {pipeline_mode = #tpu.pipeline_mode<synchronous>, transform_indices = @transform_6, window_bounds = array<i64: 1, 9>}, {transform_indices = @transform_7, window_bounds = array<i64: 8, 9>}]} {
    %c0 = arith.constant 0 : index
    %c0_0 = arith.constant 0 : index
    %0 = vector.load %arg1[%c0, %c0_0] : memref<8x1024xbf16, #tpu.memory_space<vmem>>, vector<8x1024xbf16>
    %c0_1 = arith.constant 0 : index
    %c0_2 = arith.constant 0 : index
    %1 = vector.load %arg2[%c0_1, %c0_2] : memref<1024x1024xbf16, #tpu.memory_space<vmem>>, vector<1024x1024xbf16>
    %cst = arith.constant dense<0.000000e+00> : vector<8x1024xf32>
    %2 = tpu.matmul %0, %1, %cst {dimension_numbers = #tpu.dot_dimension_numbers<[1], [0], [0], [1], [0, 0, 1, 1], [], []>} : vector<8x1024xbf16>, vector<1024x1024xbf16>, vector<8x1024xf32> -> vector<8x1024xf32>
    %c0_3 = arith.constant 0 : index
    %c0_4 = arith.constant 0 : index
    %3 = vector.load %arg3[%c0_3, %c0_4] : memref<1x1024xf32, #tpu.memory_space<vmem>>, vector<1x1024xf32>
    %4 = vector.broadcast %3 : vector<1x1024xf32> to vector<8x1024xf32>
    %5 = arith.addf %2, %4 : vector<8x1024xf32>
    %cst_5 = arith.constant 0.000000e+00 : f32
    %6 = vector.broadcast %cst_5 : f32 to vector<8x1024xf32>
    %7 = arith.maximumf %5, %6 : vector<8x1024xf32>
    %8 = arith.truncf %7 : vector<8x1024xf32> to vector<8x1024xbf16>
    %c0_6 = arith.constant 0 : index
    %c0_7 = arith.constant 0 : index
    %9 = vector.load %arg4[%c0_6, %c0_7] : memref<1024x128xbf16, #tpu.memory_space<vmem>>, vector<1024x128xbf16>
    %cst_8 = arith.constant dense<0.000000e+00> : vector<8x128xf32>
    %10 = tpu.matmul %8, %9, %cst_8 {dimension_numbers = #tpu.dot_dimension_numbers<[1], [0], [0], [1], [0, 0, 1, 1], [], []>} : vector<8x1024xbf16>, vector<1024x128xbf16>, vector<8x128xf32> -> vector<8x128xf32>
    %c0_9 = arith.constant 0 : index
    %c0_10 = arith.constant 0 : index
    %11 = vector.load %arg5[%c0_9, %c0_10] : memref<1x128xf32, #tpu.memory_space<vmem>>, vector<1x128xf32>
    %12 = vector.broadcast %11 : vector<1x128xf32> to vector<8x128xf32>
    %13 = arith.addf %10, %12 : vector<8x128xf32>
    %cst_11 = arith.constant 0.000000e+00 : f32
    %14 = vector.broadcast %cst_11 : f32 to vector<8x128xf32>
    %15 = arith.maximumf %13, %14 : vector<8x128xf32>
    %16 = arith.truncf %15 : vector<8x128xf32> to vector<8x128xbf16>
    %c0_12 = arith.constant 0 : index
    %c0_13 = arith.constant 0 : index
    %17 = vector.load %arg6[%c0_12, %c0_13] : memref<128x9xbf16, #tpu.memory_space<vmem>>, vector<128x9xbf16>
    %cst_14 = arith.constant dense<0.000000e+00> : vector<8x9xf32>
    %18 = tpu.matmul %16, %17, %cst_14 {dimension_numbers = #tpu.dot_dimension_numbers<[1], [0], [0], [1], [0, 0, 1, 1], [], []>} : vector<8x128xbf16>, vector<128x9xbf16>, vector<8x9xf32> -> vector<8x9xf32>
    %c0_15 = arith.constant 0 : index
    %c0_16 = arith.constant 0 : index
    %19 = vector.load %arg7[%c0_15, %c0_16] : memref<1x9xf32, #tpu.memory_space<vmem>>, vector<1x9xf32>
    %20 = vector.broadcast %19 : vector<1x9xf32> to vector<8x9xf32>
    %21 = arith.addf %18, %20 : vector<8x9xf32>
    %cst_17 = arith.constant dense<0xFF800000> : vector<8xf32>
    %22 = vector.multi_reduction <maximumf>, %21, %cst_17 [1] : vector<8x9xf32> to vector<8xf32>
    %23 = vector.shape_cast %22 : vector<8xf32> to vector<8x1xf32>
    %24 = vector.broadcast %23 : vector<8x1xf32> to vector<8x9xf32>
    %25 = arith.subf %21, %24 : vector<8x9xf32>
    %26 = math.exp %25 : vector<8x9xf32>
    %cst_18 = arith.constant dense<0.000000e+00> : vector<8xf32>
    %27 = vector.multi_reduction <add>, %26, %cst_18 [1] : vector<8x9xf32> to vector<8xf32>
    %28 = vector.shape_cast %27 : vector<8xf32> to vector<8x1xf32>
    %29 = tpu.reciprocal %28 {approx = true} : vector<8x1xf32> -> vector<8x1xf32>
    %30 = vector.broadcast %29 : vector<8x1xf32> to vector<8x9xf32>
    %31 = arith.mulf %26, %30 : vector<8x9xf32>
    %c0_19 = arith.constant 0 : index
    %c0_20 = arith.constant 0 : index
    %32 = vector.load %arg8[%c0_19, %c0_20] : memref<8x9xf32, #tpu.memory_space<vmem>>, vector<8x9xf32>
    tpu.vector_store %arg8[%c0_19, %c0_20], %31 {strides = array<i32>} : memref<8x9xf32, #tpu.memory_space<vmem>>, vector<8x9xf32>,
    return
  }
  func.func @transform_0(%arg0: i32) -> (i32, i32) {
    %c0_i32 = arith.constant 0 : i32
    %c0_i32_0 = arith.constant 0 : i32
    return %arg0, %c0_i32 : i32, i32
  }
  func.func @transform_1(%arg0: i32) -> (i32, i32) {
    %c0_i32 = arith.constant 0 : i32
    %c0_i32_0 = arith.constant 0 : i32
    %c0_i32_1 = arith.constant 0 : i32
    return %c0_i32, %c0_i32_0 : i32, i32
  }
  func.func @transform_2(%arg0: i32) -> (i32, i32) {
    %c0_i32 = arith.constant 0 : i32
    %c0_i32_0 = arith.constant 0 : i32
    %c0_i32_1 = arith.constant 0 : i32
    return %c0_i32, %c0_i32_0 : i32, i32
  }
  func.func @transform_3(%arg0: i32) -> (i32, i32) {
    %c0_i32 = arith.constant 0 : i32
    %c0_i32_0 = arith.constant 0 : i32
    %c0_i32_1 = arith.constant 0 : i32
    return %c0_i32, %c0_i32_0 : i32, i32
  }
  func.func @transform_4(%arg0: i32) -> (i32, i32) {
    %c0_i32 = arith.constant 0 : i32
    %c0_i32_0 = arith.constant 0 : i32
    %c0_i32_1 = arith.constant 0 : i32
    return %c0_i32, %c0_i32_0 : i32, i32
  }
  func.func @transform_5(%arg0: i32) -> (i32, i32) {
    %c0_i32 = arith.constant 0 : i32
    %c0_i32_0 = arith.constant 0 : i32
    %c0_i32_1 = arith.constant 0 : i32
    return %c0_i32, %c0_i32_0 : i32, i32
  }
  func.func @transform_6(%arg0: i32) -> (i32, i32) {
    %c0_i32 = arith.constant 0 : i32
    %c0_i32_0 = arith.constant 0 : i32
    %c0_i32_1 = arith.constant 0 : i32
    return %c0_i32, %c0_i32_0 : i32, i32
  }
  func.func @transform_7(%arg0: i32) -> (i32, i32) {
    %c0_i32 = arith.constant 0 : i32
    %c0_i32_0 = arith.constant 0 : i32
    return %arg0, %c0_i32 : i32, i32
  }
}

</mosaic_0001>

<bundles_post_ra>
// kernel: tpu_custom_call.1
= control target key start
LH: loop header
LB: loop body
LE: loop exit
PB: predicated region body
PF: predicated region fallthrough
CT: control target
= control target key end

     0   :  { %12 = vsyncpa [#allocation3], 0  ;;  %s8186_s0 = inlined_call_operand.hbm [shape: bf16[8,1024], index: 0, kind: input, shape index: {}]   ;;  %s8187_s1 = inlined_call_operand.hbm [shape: bf16[1024,1024], index: 1, kind: input, shape index: {}]   ;;  %s8188_s2 = inlined_call_operand.hbm [shape: f32[1,1024], index: 2, kind: input, shape index: {}]   ;;  %s8189_s3 = inlined_call_operand.hbm [shape: bf16[1024,128], index: 3, kind: input, shape index: {}]   ;;  %s8190_s4 = inlined_call_operand.hbm [shape: f32[1,128], index: 4, kind: input, shape index: {}]   ;;  %s8191_s5 = inlined_call_operand.vmem [shape: bf16[128,9], index: 5, kind: input, shape index: {}]   ;;  %s8192_s6 = inlined_call_operand.hbm [shape: f32[1,9], index: 6, kind: input, shape index: {}]   ;;  %s8193_s7 = inlined_call_operand.hbm [shape: f32[8,9], index: 7, kind: output, shape index: {}]  }
   0x1   :  { %13 = vsyncpa [#allocation6], 0 }
   0x2   :  { %14 = vsyncpa [#allocation9], 0 }
   0x3   :  { %15 = vsyncpa [#allocation12], 0  ;;  %s32_s26 = sshll.u32 %s8187_s1, 4  ;;  %s33_s26 = int_to_ptr.hbm [resolvable:$true] %s32_s26 }
   0x4   :  { %16 = vsyncpa [#allocation4], 0  ;;  %s7937_s27 = smov [#allocation5]   ;;  %s56_s8 = sshll.u32 %s8189_s3, 4  ;;  %s57_s8 = int_to_ptr.hbm [resolvable:$true] %s56_s8 }
   0x5   :  { %s34_s28 = sshll.u32 %s7937_s27, 4  ;;  %s7938_s9 = smov 512   ;;  %s35_s28 = int_to_ptr.vmem [resolvable:$true] %s34_s28 }
   0x6   :  { %s7939_s10 = smov 32   ;;  %s7940_s11 = smov [#allocation8]  }
   0x7   :  { %40 = dma.hbm_to_vmem [thread:$0]  %s33_s26, 65536, %s35_s28, [#allocation6], %s7938_s9, %s7938_s9, %s7939_s10  }
   0x8   :  { %s58_s12 = sshll.u32 %s7940_s11, 4  ;;  %s7941_s13 = smov 64   ;;  %s59_s12 = int_to_ptr.vmem [resolvable:$true] %s58_s12 }
   0x9   :  { %s7942_s14 = smov 4   ;;  %s22_s16 = sshll.u32 %s8186_s0, 4  ;;  %s23_s16 = int_to_ptr.hbm [resolvable:$true] %s22_s16 }
   0xa   :  { %64 = dma.hbm_to_vmem [thread:$0]  %s57_s8, 8192, %s59_s12, [#allocation9], %s7941_s13, %s7941_s13, %s7942_s14  }
   0xb   :  { %s7943_s17 = smov [#allocation2]   ;;  %s46_s20 = sshll.u32 %s8188_s2, 4  ;;  %s47_s20 = int_to_ptr.hbm [resolvable:$true] %s46_s20 }
   0xc   :  { %s24_s18 = sshll.u32 %s7943_s17, 4  ;;  %s7944_s21 = smov [#allocation7]   ;;  %s25_s18 = int_to_ptr.vmem [resolvable:$true] %s24_s18 }
   0xd   :  { %27 = dma.hbm_to_vmem [thread:$0]  %s23_s16, 512, %s25_s18, [#allocation3]  }
   0xe   :  { %s48_s22 = sshll.u32 %s7944_s21, 4  ;;  %s70_s25 = sshll.u32 %s8190_s4, 4  ;;  %s49_s22 = int_to_ptr.vmem [resolvable:$true] %s48_s22  ;;  %s71_s25 = int_to_ptr.hbm [resolvable:$true] %s70_s25 }
   0xf   :  { %51 = dma.hbm_to_vmem [thread:$0]  %s47_s20, 128, %s49_s22, [#allocation6]  }
  0x10   :  { %s83_s27 = sshll.u32 %s8192_s6, 4  ;;  %s7945_s28 = smov [#allocation10]   ;;  %s84_s27 = int_to_ptr.hbm [resolvable:$true] %s83_s27 }
  0x11   :  { %s72_s29 = sshll.u32 %s7945_s28, 4  ;;  %s7946_s2 = smov [#allocation11]   ;;  %s73_s29 = int_to_ptr.vmem [resolvable:$true] %s72_s29 }
  0x12   :  { %75 = dma.hbm_to_vmem [thread:$0]  %s71_s25, 16, %s73_s29, [#allocation9]  }
  0x13   :  { %s85_s30 = sshll.u32 %s7946_s2, 4  ;;  %s86_s30 = int_to_ptr.vmem [resolvable:$true] %s85_s30 }
  0x14   :  { %88 = dma.hbm_to_vmem [thread:$0]  %s84_s27, 16, %s86_s30, [#allocation12]  }
  0x15   :  { %7927 = dma.done.wait [#allocation3], 512  }
  0x16   :  { %7928 = vsyncadd [#allocation3], 4294966784 }
  0x17   :  { %7929 = dma.done.wait [#allocation6], 65664  }
  0x18   :  { %7930 = vsyncadd [#allocation6], 4294901632 }
  0x19   :  { %7931 = dma.done.wait [#allocation9], 8208  }
  0x1a   :  { %7932 = vsyncadd [#allocation9], 4294959088 }
  0x1b   :  { %7933 = dma.done.wait [#allocation12], 16  }
  0x1c   :  { %7934 = vsyncadd [#allocation12], 4294967280  ;;  %v5045_v0 = vld [vmem:[#allocation5 + $0x1c0] sm:$0xf]  ;;  %vm4786_vm0 = vcmask 72704   ;;  %s4806_s23 = sshll.u32 %s8193_s7, 4  ;;  %s4807_s23 = int_to_ptr.hbm [resolvable:$true] %s4806_s23 }
  0x1d   :  { %v7215_v1 = vld [vmem:[#allocation5 + $0x1dc] sm:$0xf0] }
  0x1e   :  { %v5301_v2 = vld [vmem:[#allocation5 + $0x3c0] sm:$0xf]  ;;  %v5046_v3 = vor.u32 %v7215_v1, %v5045_v0 }
  0x1f   :  { %v7279_v4 = vld [vmem:[#allocation5 + $0x3dc] sm:$0xf0] }
  0x20   :  { %v5557_v5 = vld [vmem:[#allocation5 + $0x5c0] sm:$0xf]  ;;  %v5302_v7 = vor.u32 %v7279_v4, %v5301_v2  ;;  %3235 = vmatpush.bf16.msra.mxu0 %v5046_v3 }
  0x21   :  { %v7343_v6 = vld [vmem:[#allocation5 + $0x5dc] sm:$0xf0] }
  0x22   :  { %v5558_v8 = vor.u32 %v7343_v6, %v5557_v5  ;;  %v5813_v9 = vld [vmem:[#allocation5 + $0x7c0] sm:$0xf]  ;;  %3248 = vmatpush.bf16.msra.mxu1 %v5302_v7 }
  0x23   :  { %v7407_v10 = vld [vmem:[#allocation5 + $0x7dc] sm:$0xf0] }
  0x24   :  { %v5013_v11 = vld [vmem:[#allocation5 + $0x180] sm:$0xf]  ;;  %v5814_v12 = vor.u32 %v7407_v10, %v5813_v9  ;;  %3261 = vmatpush.bf16.msra.mxu2 %v5558_v8 }
  0x25   :  { %v7207_v13 = vld [vmem:[#allocation5 + $0x19c] sm:$0xf0] }
  0x26   :  { %v5269_v14 = vld [vmem:[#allocation5 + $0x380] sm:$0xf]  ;;  %v5014_v16 = vor.u32 %v7207_v13, %v5013_v11  ;;  %3274 = vmatpush.bf16.msra.mxu3 %v5814_v12 }
  0x27   :  { %v7271_v15 = vld [vmem:[#allocation5 + $0x39c] sm:$0xf0] }
  0x28   :  { %v5270_v17 = vor.u32 %v7271_v15, %v5269_v14  ;;  %v5525_v18 = vld [vmem:[#allocation5 + $0x580] sm:$0xf]  ;;  %3236 = vmatpush.bf16.msra.mxu0 %v5014_v16 }
  0x29   :  { %v7335_v19 = vld [vmem:[#allocation5 + $0x59c] sm:$0xf0] }
  0x2a   :  { %v5781_v20 = vld [vmem:[#allocation5 + $0x780] sm:$0xf]  ;;  %v5526_v21 = vor.u32 %v7335_v19, %v5525_v18  ;;  %3249 = vmatpush.bf16.msra.mxu1 %v5270_v17 }
  0x2b   :  { %v7399_v22 = vld [vmem:[#allocation5 + $0x79c] sm:$0xf0] }
  0x2c   :  { %v4981_v23 = vld [vmem:[#allocation5 + $0x140] sm:$0xf]  ;;  %v5782_v25 = vor.u32 %v7399_v22, %v5781_v20  ;;  %3262 = vmatpush.bf16.msra.mxu2 %v5526_v21 }
  0x2d   :  { %v7199_v24 = vld [vmem:[#allocation5 + $0x15c] sm:$0xf0] }
  0x2e   :  { %v5237_v26 = vld [vmem:[#allocation5 + $0x340] sm:$0xf]  ;;  %v4982_v29 = vor.u32 %v7199_v24, %v4981_v23  ;;  %3275 = vmatpush.bf16.msra.mxu3 %v5782_v25 }
  0x2f   :  { %v7263_v27 = vld [vmem:[#allocation5 + $0x35c] sm:$0xf0] }
  0x30   :  { %v5493_v28 = vld [vmem:[#allocation5 + $0x540] sm:$0xf]  ;;  %v5238_v33 = vor.u32 %v7263_v27, %v5237_v26  ;;  %3237 = vmatpush.bf16.msra.mxu0 %v4982_v29 }
  0x31   :  { %v7327_v30 = vld [vmem:[#allocation5 + $0x55c] sm:$0xf0] }
  0x32   :  { %v5749_v31 = vld [vmem:[#allocation5 + $0x740] sm:$0xf]  ;;  %v5494_v34 = vor.u32 %v7327_v30, %v5493_v28  ;;  %3250 = vmatpush.bf16.msra.mxu1 %v5238_v33 }
  0x33   :  { %v7391_v32 = vld [vmem:[#allocation5 + $0x75c] sm:$0xf0] }
  0x34   :  { %v4949_v35 = vld [vmem:[#allocation5 + $0x100] sm:$0xf]  ;;  %v5750_v38 = vor.u32 %v7391_v32, %v5749_v31  ;;  %3263 = vmatpush.bf16.msra.mxu2 %v5494_v34 }
  0x35   :  { %v7191_v36 = vld [vmem:[#allocation5 + $0x11c] sm:$0xf0] }
  0x36   :  { %v5205_v37 = vld [vmem:[#allocation5 + $0x300] sm:$0xf]  ;;  %v4950_v44 = vor.u32 %v7191_v36, %v4949_v35  ;;  %3276 = vmatpush.bf16.msra.mxu3 %v5750_v38 }
  0x37   :  { %v7255_v39 = vld [vmem:[#allocation5 + $0x31c] sm:$0xf0] }
  0x38   :  { %v5461_v40 = vld [vmem:[#allocation5 + $0x500] sm:$0xf]  ;;  %v5206_v45 = vor.u32 %v7255_v39, %v5205_v37  ;;  %3238 = vmatpush.bf16.msra.mxu0 %v4950_v44 }
  0x39   :  { %v7319_v41 = vld [vmem:[#allocation5 + $0x51c] sm:$0xf0] }
  0x3a   :  { %v5717_v42 = vld [vmem:[#allocation5 + $0x700] sm:$0xf]  ;;  %v5462_v46 = vor.u32 %v7319_v41, %v5461_v40  ;;  %3251 = vmatpush.bf16.msra.mxu1 %v5206_v45 }
  0x3b   :  { %v7383_v43 = vld [vmem:[#allocation5 + $0x71c] sm:$0xf0] }
  0x3c   :  { %v4917_v47 = vld [vmem:[#allocation5 + $0xc0] sm:$0xf]  ;;  %v5718_v50 = vor.u32 %v7383_v43, %v5717_v42  ;;  %3264 = vmatpush.bf16.msra.mxu2 %v5462_v46 }
  0x3d   :  { %v7183_v48 = vld [vmem:[#allocation5 + $0xdc] sm:$0xf0] }
  0x3e   :  { %v5173_v49 = vld [vmem:[#allocation5 + $0x2c0] sm:$0xf]  ;;  %v4918_v56 = vor.u32 %v7183_v48, %v4917_v47  ;;  %3277 = vmatpush.bf16.msra.mxu3 %v5718_v50 }
  0x3f   :  { %v7247_v51 = vld [vmem:[#allocation5 + $0x2dc] sm:$0xf0] }
  0x40   :  { %v5429_v52 = vld [vmem:[#allocation5 + $0x4c0] sm:$0xf]  ;;  %v5174_v57 = vor.u32 %v7247_v51, %v5173_v49  ;;  %3239 = vmatpush.bf16.msra.mxu0 %v4918_v56 }
  0x41   :  { %v7311_v53 = vld [vmem:[#allocation5 + $0x4dc] sm:$0xf0] }
  0x42   :  { %v5685_v54 = vld [vmem:[#allocation5 + $0x6c0] sm:$0xf]  ;;  %v5430_v58 = vor.u32 %v7311_v53, %v5429_v52  ;;  %3252 = vmatpush.bf16.msra.mxu1 %v5174_v57 }
  0x43   :  { %v7375_v55 = vld [vmem:[#allocation5 + $0x6dc] sm:$0xf0] }
  0x44   :  { %v4885_v59 = vld [vmem:[#allocation5 + $0x80] sm:$0xf]  ;;  %v5686_v62 = vor.u32 %v7375_v55, %v5685_v54  ;;  %3265 = vmatpush.bf16.msra.mxu2 %v5430_v58 }
  0x45   :  { %v7175_v60 = vld [vmem:[#allocation5 + $0x9c] sm:$0xf0] }
  0x46   :  { %v5141_v61 = vld [vmem:[#allocation5 + $0x280] sm:$0xf]  ;;  %v4886_v4 = vor.u32 %v7175_v60, %v4885_v59  ;;  %3278 = vmatpush.bf16.msra.mxu3 %v5686_v62 }
  0x47   :  { %v7239_v63 = vld [vmem:[#allocation5 + $0x29c] sm:$0xf0] }
  0x48   :  { %v5397_v0 = vld [vmem:[#allocation5 + $0x480] sm:$0xf]  ;;  %v5142_v5 = vor.u32 %v7239_v63, %v5141_v61  ;;  %3240 = vmatpush.bf16.msra.mxu0 %v4886_v4 }
  0x49   :  { %v7303_v1 = vld [vmem:[#allocation5 + $0x49c] sm:$0xf0] }
  0x4a   :  { %v5653_v2 = vld [vmem:[#allocation5 + $0x680] sm:$0xf]  ;;  %v5398_v6 = vor.u32 %v7303_v1, %v5397_v0  ;;  %3253 = vmatpush.bf16.msra.mxu1 %v5142_v5 }
  0x4b   :  { %v7367_v3 = vld [vmem:[#allocation5 + $0x69c] sm:$0xf0] }
  0x4c   :  { %v4853_v7 = vld [vmem:[#allocation5 + $0x40] sm:$0xf]  ;;  %v5654_v10 = vor.u32 %v7367_v3, %v5653_v2  ;;  %3266 = vmatpush.bf16.msra.mxu2 %v5398_v6  ;;  %v114_v2 = vld [vmem:[#allocation2 + $0x8] sm:$0xff] }
  0x4d   :  { %v7167_v8 = vld [vmem:[#allocation5 + $0x5c] sm:$0xf0] }
  0x4e   :  { %v5109_v9 = vld [vmem:[#allocation5 + $0x240] sm:$0xf]  ;;  %v4854_v16 = vor.u32 %v7167_v8, %v4853_v7  ;;  %3279 = vmatpush.bf16.msra.mxu3 %v5654_v10  ;;  %v653_v8 = vunpack.c.l.b16 %v114_v2  ;;  %v654_v10 = vunpack.c.h.b16 %v114_v2 }
  0x4f   :  { %v7231_v11 = vld [vmem:[#allocation5 + $0x25c] sm:$0xf0] }
  0x50   :  { %v5365_v12 = vld [vmem:[#allocation5 + $0x440] sm:$0xf]  ;;  %v5110_v19 = vor.u32 %v7231_v11, %v5109_v9  ;;  %3241 = vmatpush.bf16.msra.mxu0 %v4854_v16 }
  0x51   :  { %v7295_v13 = vld [vmem:[#allocation5 + $0x45c] sm:$0xf0] }
  0x52   :  { %v5621_v14 = vld [vmem:[#allocation5 + $0x640] sm:$0xf]  ;;  %v5366_v20 = vor.u32 %v7295_v13, %v5365_v12  ;;  %3254 = vmatpush.bf16.msra.mxu1 %v5110_v19 }
  0x53   :  { %v7359_v15 = vld [vmem:[#allocation5 + $0x65c] sm:$0xf0] }
  0x54   :  { %v4821_v17 = vld [vmem:[#allocation5] sm:$0xf]  ;;  %v5622_v24 = vor.u32 %v7359_v15, %v5621_v14  ;;  %3267 = vmatpush.bf16.msra.mxu2 %v5366_v20  ;;  %v8010_v20 = vpack.c.b16 %v654_v10, %v654_v10  ;;  %v7275_v10 = vld [vmem:[#allocation5 + $0x3c4] sm:$0xf] }
  0x55   :  { %v7159_v18 = vld [vmem:[#allocation5 + $0x1c] sm:$0xf0] }
  0x56   :  { %v5077_v21 = vld [vmem:[#allocation5 + $0x200] sm:$0xf]  ;;  %v4822_v31 = vor.u32 %v7159_v18, %v4821_v17  ;;  %3280 = vmatpush.bf16.msra.mxu3 %v5622_v24  ;;  %v8006_v18 = vpack.c.b16 %v653_v8, %v653_v8  ;;  %v7211_v8 = vld [vmem:[#allocation5 + $0x1c4] sm:$0xf] }
  0x57   :  { %v7223_v22 = vld [vmem:[#allocation5 + $0x21c] sm:$0xf0] }
  0x58   :  { %v5333_v23 = vld [vmem:[#allocation5 + $0x400] sm:$0xf]  ;;  %v5078_v35 = vor.u32 %v7223_v22, %v5077_v21  ;;  %3242 = vmatpush.bf16.msra.mxu0 %v4822_v31 }
  0x59   :  { %v7287_v25 = vld [vmem:[#allocation5 + $0x41c] sm:$0xf0] }
  0x5a   :  { %v5589_v26 = vld [vmem:[#allocation5 + $0x600] sm:$0xf]  ;;  %v5334_v36 = vor.u32 %v7287_v25, %v5333_v23  ;;  %3255 = vmatpush.bf16.msra.mxu1 %v5078_v35 }
  0x5b   :  { %v7351_v27 = vld [vmem:[#allocation5 + $0x61c] sm:$0xf0] }
  0x5c   :  { %v6069_v28 = vld [vmem:[#allocation5 + $0x9c0] sm:$0xf]  ;;  %v5590_v39 = vor.u32 %v7351_v27, %v5589_v26  ;;  %3268 = vmatpush.bf16.msra.mxu2 %v5334_v36 }
  0x5d   :  { %v7471_v29 = vld [vmem:[#allocation5 + $0x9dc] sm:$0xf0] }
  0x5e   :  { %v6325_v30 = vld [vmem:[#allocation5 + $0xbc0] sm:$0xf]  ;;  %v6070_v40 = vor.u32 %v7471_v29, %v6069_v28  ;;  %3281 = vmatpush.bf16.msra.mxu3 %v5590_v39 }
  0x5f   :  { %v7535_v32 = vld [vmem:[#allocation5 + $0xbdc] sm:$0xf0]  ;;  %3269 = vmatmul.bf16.vlgmr.msra.gmra.mxu2 %v8006_v18 }
  0x60   :  { %v6581_v33 = vld [vmem:[#allocation5 + $0xdc0] sm:$0xf]  ;;  %v6326_v41 = vor.u32 %v7535_v32, %v6325_v30  ;;  %3287 = vmatpush.bf16.msrb.mxu0 %v6070_v40 }
  0x61   :  { %v7599_v34 = vld [vmem:[#allocation5 + $0xddc] sm:$0xf0]  ;;  %3282 = vmatmul.bf16.vlgmr.msra.gmra.mxu3 %v8010_v20 }
  0x62   :  { %v6837_v37 = vld [vmem:[#allocation5 + $0xfc0] sm:$0xf]  ;;  %v6582_v42 = vor.u32 %v7599_v34, %v6581_v33  ;;  %3300 = vmatpush.bf16.msrb.mxu1 %v6326_v41 }
  0x63   :  { %v7663_v38 = vld [vmem:[#allocation5 + $0xfdc] sm:$0xf0] }
  0x64   :  { %v6037_v43 = vld [vmem:[#allocation5 + $0x980] sm:$0xf]  ;;  %v6838_v46 = vor.u32 %v7663_v38, %v6837_v37  ;;  %3313 = vmatpush.bf16.msrb.mxu2 %v6582_v42 }
  0x65   :  { %v7463_v44 = vld [vmem:[#allocation5 + $0x99c] sm:$0xf0] }
  0x66   :  { %v6293_v45 = vld [vmem:[#allocation5 + $0xb80] sm:$0xf]  ;;  %v6038_v52 = vor.u32 %v7463_v44, %v6037_v43  ;;  %3326 = vmatpush.bf16.msrb.mxu3 %v6838_v46 }
  0x67   :  { %v7527_v47 = vld [vmem:[#allocation5 + $0xb9c] sm:$0xf0] }
  0x68   :  { %v6549_v48 = vld [vmem:[#allocation5 + $0xd80] sm:$0xf]  ;;  %v6294_v54 = vor.u32 %v7527_v47, %v6293_v45  ;;  %3288 = vmatpush.bf16.msrb.mxu0 %v6038_v52 }
  0x69   :  { %v7591_v49 = vld [vmem:[#allocation5 + $0xd9c] sm:$0xf0] }
  0x6a   :  { %v6805_v50 = vld [vmem:[#allocation5 + $0xf80] sm:$0xf]  ;;  %v6550_v55 = vor.u32 %v7591_v49, %v6549_v48  ;;  %3301 = vmatpush.bf16.msrb.mxu1 %v6294_v54 }
  0x6b   :  { %v7655_v51 = vld [vmem:[#allocation5 + $0xf9c] sm:$0xf0] }
  0x6c   :  { %v6005_v53 = vld [vmem:[#allocation5 + $0x940] sm:$0xf]  ;;  %v6806_v59 = vor.u32 %v7655_v51, %v6805_v50  ;;  %3314 = vmatpush.bf16.msrb.mxu2 %v6550_v55 }
  0x6d   :  { %v7455_v56 = vld [vmem:[#allocation5 + $0x95c] sm:$0xf0] }
  0x6e   :  { %v6261_v57 = vld [vmem:[#allocation5 + $0xb40] sm:$0xf]  ;;  %v6006_v0 = vor.u32 %v7455_v56, %v6005_v53  ;;  %3327 = vmatpush.bf16.msrb.mxu3 %v6806_v59 }
  0x6f   :  { %v7519_v58 = vld [vmem:[#allocation5 + $0xb5c] sm:$0xf0] }
  0x70   :  { %v6517_v60 = vld [vmem:[#allocation5 + $0xd40] sm:$0xf]  ;;  %v6262_v1 = vor.u32 %v7519_v58, %v6261_v57  ;;  %3289 = vmatpush.bf16.msrb.mxu0 %v6006_v0 }
  0x71   :  { %v7583_v61 = vld [vmem:[#allocation5 + $0xd5c] sm:$0xf0] }
  0x72   :  { %v6773_v62 = vld [vmem:[#allocation5 + $0xf40] sm:$0xf]  ;;  %v6518_v4 = vor.u32 %v7583_v61, %v6517_v60  ;;  %3302 = vmatpush.bf16.msrb.mxu1 %v6262_v1 }
  0x73   :  { %v7647_v63 = vld [vmem:[#allocation5 + $0xf5c] sm:$0xf0] }
  0x74   :  { %v113_v3 = vld [vmem:[#allocation2] sm:$0xff]  ;;  %v6774_v11 = vor.u32 %v7647_v63, %v6773_v62  ;;  %3315 = vmatpush.bf16.msrb.mxu2 %v6518_v4 }
  0x75   :  { %v5973_v5 = vld [vmem:[#allocation5 + $0x900] sm:$0xf]  ;;  %v651_v9 = vunpack.c.l.b16 %v113_v3  ;;  %v652_v15 = vunpack.c.h.b16 %v113_v3  ;;  %v116_v3 = vld [vmem:[#allocation2 + $0x18] sm:$0xff] }
  0x76   :  { %v7447_v6 = vld [vmem:[#allocation5 + $0x91c] sm:$0xf0]  ;;  %3328 = vmatpush.bf16.msrb.mxu3 %v6774_v11 }
  0x77   :  { %v6229_v7 = vld [vmem:[#allocation5 + $0xb00] sm:$0xf]  ;;  %v8008_v19 = vpack.c.b16 %v651_v9, %v651_v9  ;;  %v5974_v21 = vor.u32 %v7447_v6, %v5973_v5  ;;  %v8012_v22 = vpack.c.b16 %v652_v15, %v652_v15  ;;  %v5047_v9 = vld [vmem:[#allocation5 + $0x1e0] sm:$0xf0]  ;;  %v657_v15 = vunpack.c.l.b16 %v116_v3 }
  0x78   :  { %v7511_v12 = vld [vmem:[#allocation5 + $0xb1c] sm:$0xf0] }
  0x79   :  { %v6485_v13 = vld [vmem:[#allocation5 + $0xd00] sm:$0xf]  ;;  %v6230_v23 = vor.u32 %v7511_v12, %v6229_v7  ;;  %3243 = vmatmul.bf16.vlgmr.msra.gmra.mxu0 %v8008_v19  ;;  %3256 = vmatmul.bf16.vlgmr.msra.gmra.mxu1 %v8012_v22  ;;  %v115_v7 = vld [vmem:[#allocation2 + $0x10] sm:$0xff]  ;;  %v5303_v12 = vld [vmem:[#allocation5 + $0x3e0] sm:$0xf0] }
  0x7a   :  { %v7575_v14 = vld [vmem:[#allocation5 + $0xd1c] sm:$0xf0]  ;;  %3290 = vmatpush.bf16.msrb.mxu0 %v5974_v21  ;;  %v7403_v21 = vld [vmem:[#allocation5 + $0x7c4] sm:$0xf] }
  0x7b   :  { %v6741_v16 = vld [vmem:[#allocation5 + $0xf00] sm:$0xf]  ;;  %v6486_v24 = vor.u32 %v7575_v14, %v6485_v13  ;;  %3303 = vmatpush.bf16.msrb.mxu1 %v6230_v23  ;;  %v7339_v13 = vld [vmem:[#allocation5 + $0x5c4] sm:$0xf] }
  0x7c   :  { %v7639_v17 = vld [vmem:[#allocation5 + $0xf1c] sm:$0xf0]  ;;  %v5559_v14 = vld [vmem:[#allocation5 + $0x5e0] sm:$0xf0] }
  0x7d   :  { %v5941_v25 = vld [vmem:[#allocation5 + $0x8c0] sm:$0xf]  ;;  %v6742_v28 = vor.u32 %v7639_v17, %v6741_v16  ;;  %3316 = vmatpush.bf16.msrb.mxu2 %v6486_v24  ;;  %v5815_v23 = vld [vmem:[#allocation5 + $0x7e0] sm:$0xf0]  ;;  %v655_v24 = vunpack.c.l.b16 %v115_v7 }
  0x7e   :  { %v7439_v26 = vld [vmem:[#allocation5 + $0x8dc] sm:$0xf0] }
  0x7f   :  { %v6197_v27 = vld [vmem:[#allocation5 + $0xac0] sm:$0xf]  ;;  %v5942_v34 = vor.u32 %v7439_v26, %v5941_v25  ;;  %3329 = vmatpush.bf16.msrb.mxu3 %v6742_v28  ;;  %v658_v25 = vunpack.c.h.b16 %v116_v3  ;;  %v656_v28 = vunpack.c.h.b16 %v115_v7  ;;  %v5719_v3 = vld [vmem:[#allocation5 + $0x720] sm:$0xf0] }
  0x80   :  { %v7503_v29 = vld [vmem:[#allocation5 + $0xadc] sm:$0xf0]  ;;  %v7179_v7 = vld [vmem:[#allocation5 + $0xc4] sm:$0xf] }
  0x81   :  { %v6453_v30 = vld [vmem:[#allocation5 + $0xcc0] sm:$0xf]  ;;  %v6198_v35 = vor.u32 %v7503_v29, %v6197_v27  ;;  %3291 = vmatpush.bf16.msrb.mxu0 %v5942_v34  ;;  %v5050_v27 = vor.u32 %v7211_v8, %v5047_v9  ;;  %v5306_v29 = vor.u32 %v7275_v10, %v5303_v12  ;;  %v5818_v34 = vor.u32 %v7403_v21, %v5815_v23  ;;  %v4919_v8 = vld [vmem:[#allocation5 + $0xe0] sm:$0xf0] }
  0x82   :  { %v7567_v31 = vld [vmem:[#allocation5 + $0xcdc] sm:$0xf0]  ;;  %v7243_v9 = vld [vmem:[#allocation5 + $0x2c4] sm:$0xf] }
  0x83   :  { %v6709_v32 = vld [vmem:[#allocation5 + $0xec0] sm:$0xf]  ;;  %v6454_v36 = vor.u32 %v7567_v31, %v6453_v30  ;;  %3304 = vmatpush.bf16.msrb.mxu1 %v6198_v35  ;;  %v5562_v30 = vor.u32 %v7339_v13, %v5559_v14  ;;  %v7203_v31 = vld [vmem:[#allocation5 + $0x184] sm:$0xf] }
  0x84   :  { %v7631_v33 = vld [vmem:[#allocation5 + $0xedc] sm:$0xf0]  ;;  %v5271_v35 = vld [vmem:[#allocation5 + $0x3a0] sm:$0xf0] }
  0x85   :  { %v5909_v37 = vld [vmem:[#allocation5 + $0x880] sm:$0xf]  ;;  %v6710_v40 = vor.u32 %v7631_v33, %v6709_v32  ;;  %3317 = vmatpush.bf16.msrb.mxu2 %v6454_v36  ;;  %v5015_v32 = vld [vmem:[#allocation5 + $0x1a0] sm:$0xf0] }
  0x86   :  { %v7431_v38 = vld [vmem:[#allocation5 + $0x89c] sm:$0xf0]  ;;  %v7267_v33 = vld [vmem:[#allocation5 + $0x384] sm:$0xf] }
  0x87   :  { %v6165_v39 = vld [vmem:[#allocation5 + $0xa80] sm:$0xf]  ;;  %v5910_v46 = vor.u32 %v7431_v38, %v5909_v37  ;;  %3330 = vmatpush.bf16.msrb.mxu3 %v6710_v40  ;;  %v7331_v36 = vld [vmem:[#allocation5 + $0x584] sm:$0xf]  ;;  %v8018_v38 = vpack.c.b16 %v657_v15, %v657_v15 }
  0x88   :  { %v7495_v41 = vld [vmem:[#allocation5 + $0xa9c] sm:$0xf0]  ;;  %v5527_v37 = vld [vmem:[#allocation5 + $0x5a0] sm:$0xf0] }
  0x89   :  { %v6421_v42 = vld [vmem:[#allocation5 + $0xc80] sm:$0xf]  ;;  %v6166_v47 = vor.u32 %v7495_v41, %v6165_v39  ;;  %3292 = vmatpush.bf16.msrb.mxu0 %v5910_v46  ;;  %v7395_v39 = vld [vmem:[#allocation5 + $0x784] sm:$0xf]  ;;  %v8020_v41 = vpack.c.b16 %v655_v24, %v655_v24  ;;  %v5530_v46 = vor.u32 %v7331_v36, %v5527_v37 }
  0x8a   :  { %v7559_v43 = vld [vmem:[#allocation5 + $0xc9c] sm:$0xf0]  ;;  %v5783_v40 = vld [vmem:[#allocation5 + $0x7a0] sm:$0xf0] }
  0x8b   :  { %v6677_v44 = vld [vmem:[#allocation5 + $0xe80] sm:$0xf]  ;;  %v6422_v48 = vor.u32 %v7559_v43, %v6421_v42  ;;  %3305 = vmatpush.bf16.msrb.mxu1 %v6166_v47  ;;  %v8022_v42 = vpack.c.b16 %v658_v25, %v658_v25  ;;  %v5018_v43 = vor.u32 %v7203_v31, %v5015_v32  ;;  %v7195_v47 = vld [vmem:[#allocation5 + $0x144] sm:$0xf] }
  0x8c   :  { %v7623_v45 = vld [vmem:[#allocation5 + $0xe9c] sm:$0xf0]  ;;  %v7307_v12 = vld [vmem:[#allocation5 + $0x4c4] sm:$0xf] }
  0x8d   :  { %v5877_v49 = vld [vmem:[#allocation5 + $0x840] sm:$0xf]  ;;  %v6678_v52 = vor.u32 %v7623_v45, %v6677_v44  ;;  %3318 = vmatpush.bf16.msrb.mxu2 %v6422_v48  ;;  %v8024_v44 = vpack.c.b16 %v656_v28, %v656_v28  ;;  %v5274_v45 = vor.u32 %v7267_v33, %v5271_v35  ;;  %v4983_v48 = vld [vmem:[#allocation5 + $0x160] sm:$0xf0] }
  0x8e   :  { %v7423_v50 = vld [vmem:[#allocation5 + $0x85c] sm:$0xf0]  ;;  %v5431_v13 = vld [vmem:[#allocation5 + $0x4e0] sm:$0xf0] }
  0x8f   :  { %v6133_v51 = vld [vmem:[#allocation5 + $0xa40] sm:$0xf]  ;;  %v5878_v59 = vor.u32 %v7423_v50, %v5877_v49  ;;  %3331 = vmatpush.bf16.msrb.mxu3 %v6678_v52  ;;  %v7259_v49 = vld [vmem:[#allocation5 + $0x344] sm:$0xf]  ;;  %v5786_v50 = vor.u32 %v7395_v39, %v5783_v40  ;;  %v5434_v21 = vor.u32 %v7307_v12, %v5431_v13 }
  0x90   :  { %v7487_v53 = vld [vmem:[#allocation5 + $0xa5c] sm:$0xf0]  ;;  %v7323_v52 = vld [vmem:[#allocation5 + $0x544] sm:$0xf] }
  0x91   :  { %v6389_v54 = vld [vmem:[#allocation5 + $0xc40] sm:$0xf]  ;;  %v6134_v63 = vor.u32 %v7487_v53, %v6133_v51  ;;  %3293 = vmatpush.bf16.msrb.mxu0 %v5878_v59  ;;  %v5239_v51 = vld [vmem:[#allocation5 + $0x360] sm:$0xf0] }
  0x92   :  { %v7551_v55 = vld [vmem:[#allocation5 + $0xc5c] sm:$0xf0]  ;;  %v5495_v53 = vld [vmem:[#allocation5 + $0x560] sm:$0xf0] }
  0x93   :  { %v6645_v56 = vld [vmem:[#allocation5 + $0xe40] sm:$0xf]  ;;  %v6390_v0 = vor.u32 %v7551_v55, %v6389_v54  ;;  %3306 = vmatpush.bf16.msrb.mxu1 %v6134_v63  ;;  %v7387_v54 = vld [vmem:[#allocation5 + $0x744] sm:$0xf] }
  0x94   :  { %v7615_v57 = vld [vmem:[#allocation5 + $0xe5c] sm:$0xf0]  ;;  %v5751_v55 = vld [vmem:[#allocation5 + $0x760] sm:$0xf0] }
  0x95   :  { %v5845_v58 = vld [vmem:[#allocation5 + $0x800] sm:$0xf]  ;;  %v6646_v4 = vor.u32 %v7615_v57, %v6645_v56  ;;  %3319 = vmatpush.bf16.msrb.mxu2 %v6390_v0  ;;  %v4986_v56 = vor.u32 %v7195_v47, %v4983_v48  ;;  %v5242_v57 = vor.u32 %v7259_v49, %v5239_v51  ;;  %v7187_v59 = vld [vmem:[#allocation5 + $0x104] sm:$0xf] }
  0x96   :  { %v7415_v60 = vld [vmem:[#allocation5 + $0x81c] sm:$0xf0]  ;;  %v5207_v63 = vld [vmem:[#allocation5 + $0x320] sm:$0xf0] }
  0x97   :  { %v6101_v61 = vld [vmem:[#allocation5 + $0xa00] sm:$0xf]  ;;  %v5846_v11 = vor.u32 %v7415_v60, %v5845_v58  ;;  %3332 = vmatpush.bf16.msrb.mxu3 %v6646_v4  ;;  %v5498_v58 = vor.u32 %v7323_v52, %v5495_v53  ;;  %v4951_v60 = vld [vmem:[#allocation5 + $0x120] sm:$0xf0] }
  0x98   :  { %v7479_v62 = vld [vmem:[#allocation5 + $0xa1c] sm:$0xf0]  ;;  %v7315_v0 = vld [vmem:[#allocation5 + $0x504] sm:$0xf]  ;;  %v4954_v4 = vor.u32 %v7187_v59, %v4951_v60 }
  0x99   :  { %v6357_v1 = vld [vmem:[#allocation5 + $0xc00] sm:$0xf]  ;;  %v6102_v16 = vor.u32 %v7479_v62, %v6101_v61  ;;  %3294 = vmatpush.bf16.msrb.mxu0 %v5846_v11  ;;  %v7251_v61 = vld [vmem:[#allocation5 + $0x304] sm:$0xf]  ;;  %v5754_v62 = vor.u32 %v7387_v54, %v5751_v55 }
  0x9a   :  { %v7543_v2 = vld [vmem:[#allocation5 + $0xc1c] sm:$0xf0]  ;;  %v5175_v11 = vld [vmem:[#allocation5 + $0x2e0] sm:$0xf0] }
  0x9b   :  { %v6613_v5 = vld [vmem:[#allocation5 + $0xe00] sm:$0xf]  ;;  %v6358_v17 = vor.u32 %v7543_v2, %v6357_v1  ;;  %3307 = vmatpush.bf16.msrb.mxu1 %v6102_v16  ;;  %v5463_v1 = vld [vmem:[#allocation5 + $0x520] sm:$0xf0]  ;;  %v4922_v16 = vor.u32 %v7179_v7, %v4919_v8 }
  0x9c   :  { %v7607_v6 = vld [vmem:[#allocation5 + $0xe1c] sm:$0xf0]  ;;  %3295 = vmatmul.bf16.vlgmr.msrb.gmra.mxu0 %v8020_v41  ;;  %v7379_v2 = vld [vmem:[#allocation5 + $0x704] sm:$0xf] }
  0x9d   :  { %v6614_v26 = vor.u32 %v7607_v6, %v6613_v5  ;;  %3320 = vmatpush.bf16.msrb.mxu2 %v6358_v17  ;;  %3339 = vmatpush.bf16.msra.mxu0 %v5050_v27  ;;  %v5210_v5 = vor.u32 %v7251_v61, %v5207_v63  ;;  %v5466_v6 = vor.u32 %v7315_v0, %v5463_v1  ;;  %v7371_v14 = vld [vmem:[#allocation5 + $0x6c4] sm:$0xf] }
  0x9e   :  { %3308 = vmatmul.bf16.vlgmr.msrb.gmra.mxu1 %v8024_v44  ;;  %v5722_v10 = vor.u32 %v7379_v2, %v5719_v3  ;;  %v5687_v15 = vld [vmem:[#allocation5 + $0x6e0] sm:$0xf0]  ;;  %v5178_v17 = vor.u32 %v7243_v9, %v5175_v11 }
  0x9f   :  { %3333 = vmatpush.bf16.msrb.mxu3 %v6614_v26  ;;  %3352 = vmatpush.bf16.msra.mxu1 %v5306_v29  ;;  %v7171_v23 = vld [vmem:[#allocation5 + $0x84] sm:$0xf]  ;;  %v5690_v26 = vor.u32 %v7371_v14, %v5687_v15 }
  0xa0   :  { %3321 = vmatmul.bf16.vlgmr.msrb.gmra.mxu2 %v8018_v38  ;;  %v4887_v24 = vld [vmem:[#allocation5 + $0xa0] sm:$0xf0] }
  0xa1   :  { %3365 = vmatpush.bf16.msra.mxu2 %v5562_v30  ;;  %3340 = vmatpush.bf16.msra.mxu0 %v5018_v43  ;;  %v7235_v25 = vld [vmem:[#allocation5 + $0x284] sm:$0xf]  ;;  %v4890_v32 = vor.u32 %v7171_v23, %v4887_v24 }
  0xa2   :  { %3334 = vmatmul.bf16.vlgmr.msrb.gmra.mxu3 %v8022_v42  ;;  %v5143_v27 = vld [vmem:[#allocation5 + $0x2a0] sm:$0xf0] }
  0xa3   :  { %3378 = vmatpush.bf16.msra.mxu3 %v5818_v34  ;;  %3353 = vmatpush.bf16.msra.mxu1 %v5274_v45  ;;  %v7299_v28 = vld [vmem:[#allocation5 + $0x484] sm:$0xf]  ;;  %v5146_v33 = vor.u32 %v7235_v25, %v5143_v27 }
  0xa4   :  { %v5399_v29 = vld [vmem:[#allocation5 + $0x4a0] sm:$0xf0] }
  0xa5   :  { %3366 = vmatpush.bf16.msra.mxu2 %v5530_v46  ;;  %3341 = vmatpush.bf16.msra.mxu0 %v4986_v56  ;;  %v7363_v30 = vld [vmem:[#allocation5 + $0x684] sm:$0xf]  ;;  %v5402_v34 = vor.u32 %v7299_v28, %v5399_v29 }
  0xa6   :  { %v5655_v31 = vld [vmem:[#allocation5 + $0x6a0] sm:$0xf0] }
  0xa7   :  { %3379 = vmatpush.bf16.msra.mxu3 %v5786_v50  ;;  %3354 = vmatpush.bf16.msra.mxu1 %v5242_v57  ;;  %v7163_v35 = vld [vmem:[#allocation5 + $0x44] sm:$0xf]  ;;  %v5658_v39 = vor.u32 %v7363_v30, %v5655_v31 }
  0xa8   :  { %v4855_v36 = vld [vmem:[#allocation5 + $0x60] sm:$0xf0] }
  0xa9   :  { %3367 = vmatpush.bf16.msra.mxu2 %v5498_v58  ;;  %3342 = vmatpush.bf16.msra.mxu0 %v4954_v4  ;;  %v7227_v37 = vld [vmem:[#allocation5 + $0x244] sm:$0xf]  ;;  %v4858_v48 = vor.u32 %v7163_v35, %v4855_v36 }
  0xaa   :  { %v5111_v40 = vld [vmem:[#allocation5 + $0x260] sm:$0xf0] }
  0xab   :  { %3380 = vmatpush.bf16.msra.mxu3 %v5754_v62  ;;  %3355 = vmatpush.bf16.msra.mxu1 %v5210_v5  ;;  %v7291_v43 = vld [vmem:[#allocation5 + $0x444] sm:$0xf]  ;;  %v5114_v51 = vor.u32 %v7227_v37, %v5111_v40 }
  0xac   :  { %v5367_v45 = vld [vmem:[#allocation5 + $0x460] sm:$0xf0] }
  0xad   :  { %3368 = vmatpush.bf16.msra.mxu2 %v5466_v6  ;;  %3343 = vmatpush.bf16.msra.mxu0 %v4922_v16  ;;  %v7355_v46 = vld [vmem:[#allocation5 + $0x644] sm:$0xf]  ;;  %v5370_v52 = vor.u32 %v7291_v43, %v5367_v45 }
  0xae   :  { %v5623_v47 = vld [vmem:[#allocation5 + $0x660] sm:$0xf0] }
  0xaf   :  { %3381 = vmatpush.bf16.msra.mxu3 %v5722_v10  ;;  %3356 = vmatpush.bf16.msra.mxu1 %v5178_v17  ;;  %v7155_v49 = vld [vmem:[#allocation5 + $0x4] sm:$0xf]  ;;  %v5626_v56 = vor.u32 %v7355_v46, %v5623_v47 }
  0xb0   :  { %v4823_v50 = vld [vmem:[#allocation5 + $0x20] sm:$0xf0] }
  0xb1   :  { %3369 = vmatpush.bf16.msra.mxu2 %v5434_v21  ;;  %3344 = vmatpush.bf16.msra.mxu0 %v4890_v32  ;;  %v7219_v53 = vld [vmem:[#allocation5 + $0x204] sm:$0xf]  ;;  %v4826_v63 = vor.u32 %v7155_v49, %v4823_v50 }
  0xb2   :  { %v5079_v54 = vld [vmem:[#allocation5 + $0x220] sm:$0xf0] }
  0xb3   :  { %3382 = vmatpush.bf16.msra.mxu3 %v5690_v26  ;;  %3357 = vmatpush.bf16.msra.mxu1 %v5146_v33  ;;  %v7283_v55 = vld [vmem:[#allocation5 + $0x404] sm:$0xf]  ;;  %v5082_v3 = vor.u32 %v7219_v53, %v5079_v54 }
  0xb4   :  { %v5335_v57 = vld [vmem:[#allocation5 + $0x420] sm:$0xf0] }
  0xb5   :  { %3370 = vmatpush.bf16.msra.mxu2 %v5402_v34  ;;  %v7347_v58 = vld [vmem:[#allocation5 + $0x604] sm:$0xf]  ;;  %3345 = vmatpush.bf16.msra.mxu0 %v4858_v48  ;;  %v5338_v4 = vor.u32 %v7283_v55, %v5335_v57 }
  0xb6   :  { %v5591_v59 = vld [vmem:[#allocation5 + $0x620] sm:$0xf0] }
  0xb7   :  { %3383 = vmatpush.bf16.msra.mxu3 %v5658_v39  ;;  %v7467_v60 = vld [vmem:[#allocation5 + $0x9c4] sm:$0xf]  ;;  %3358 = vmatpush.bf16.msra.mxu1 %v5114_v51  ;;  %v5594_v7 = vor.u32 %v7347_v58, %v5591_v59 }
  0xb8   :  { %v6071_v61 = vld [vmem:[#allocation5 + $0x9e0] sm:$0xf0] }
  0xb9   :  { %v7531_v62 = vld [vmem:[#allocation5 + $0xbc4] sm:$0xf]  ;;  %3371 = vmatpush.bf16.msra.mxu2 %v5370_v52  ;;  %v6074_v8 = vor.u32 %v7467_v60, %v6071_v61  ;;  %3346 = vmatpush.bf16.msra.mxu0 %v4826_v63 }
  0xba   :  { %v6327_v0 = vld [vmem:[#allocation5 + $0xbe0] sm:$0xf0] }
  0xbb   :  { %v7595_v1 = vld [vmem:[#allocation5 + $0xdc4] sm:$0xf]  ;;  %3384 = vmatpush.bf16.msra.mxu3 %v5626_v56  ;;  %v6330_v9 = vor.u32 %v7531_v62, %v6327_v0  ;;  %3359 = vmatpush.bf16.msra.mxu1 %v5082_v3 }
  0xbc   :  { %v6583_v2 = vld [vmem:[#allocation5 + $0xde0] sm:$0xf0]  ;;  %3347 = vmatmul.bf16.vlgmr.msra.gmra.mxu0 %v8008_v19 }
  0xbd   :  { %v7659_v5 = vld [vmem:[#allocation5 + $0xfc4] sm:$0xf]  ;;  %v6586_v10 = vor.u32 %v7595_v1, %v6583_v2  ;;  %3372 = vmatpush.bf16.msra.mxu2 %v5338_v4  ;;  %3391 = vmatpush.bf16.msrb.mxu0 %v6074_v8 }
  0xbe   :  { %v6839_v6 = vld [vmem:[#allocation5 + $0xfe0] sm:$0xf0]  ;;  %3360 = vmatmul.bf16.vlgmr.msra.gmra.mxu1 %v8012_v22 }
  0xbf   :  { %v7459_v11 = vld [vmem:[#allocation5 + $0x984] sm:$0xf]  ;;  %v6842_v14 = vor.u32 %v7659_v5, %v6839_v6  ;;  %3385 = vmatpush.bf16.msra.mxu3 %v5594_v7  ;;  %3404 = vmatpush.bf16.msrb.mxu1 %v6330_v9 }
  0xc0   :  { %v6039_v12 = vld [vmem:[#allocation5 + $0x9a0] sm:$0xf0]  ;;  %3373 = vmatmul.bf16.vlgmr.msra.gmra.mxu2 %v8006_v18 }
  0xc1   :  { %v7523_v13 = vld [vmem:[#allocation5 + $0xb84] sm:$0xf]  ;;  %v6042_v24 = vor.u32 %v7459_v11, %v6039_v12  ;;  %3417 = vmatpush.bf16.msrb.mxu2 %v6586_v10 }
  0xc2   :  { %v6295_v15 = vld [vmem:[#allocation5 + $0xba0] sm:$0xf0]  ;;  %3386 = vmatmul.bf16.vlgmr.msra.gmra.mxu3 %v8010_v20 }
  0xc3   :  { %v7587_v16 = vld [vmem:[#allocation5 + $0xd84] sm:$0xf]  ;;  %v6298_v25 = vor.u32 %v7523_v13, %v6295_v15  ;;  %3430 = vmatpush.bf16.msrb.mxu3 %v6842_v14  ;;  %3392 = vmatpush.bf16.msrb.mxu0 %v6042_v24 }
  0xc4   :  { %v6551_v17 = vld [vmem:[#allocation5 + $0xda0] sm:$0xf0] }
  0xc5   :  { %v7651_v21 = vld [vmem:[#allocation5 + $0xf84] sm:$0xf]  ;;  %v6554_v26 = vor.u32 %v7587_v16, %v6551_v17  ;;  %3405 = vmatpush.bf16.msrb.mxu1 %v6298_v25 }
  0xc6   :  { %v6807_v23 = vld [vmem:[#allocation5 + $0xfa0] sm:$0xf0] }
  0xc7   :  { %v7451_v27 = vld [vmem:[#allocation5 + $0x944] sm:$0xf]  ;;  %v6810_v30 = vor.u32 %v7651_v21, %v6807_v23  ;;  %3418 = vmatpush.bf16.msrb.mxu2 %v6554_v26 }
  0xc8   :  { %v6007_v28 = vld [vmem:[#allocation5 + $0x960] sm:$0xf0] }
  0xc9   :  { %v7515_v29 = vld [vmem:[#allocation5 + $0xb44] sm:$0xf]  ;;  %v6010_v36 = vor.u32 %v7451_v27, %v6007_v28  ;;  %3431 = vmatpush.bf16.msrb.mxu3 %v6810_v30 }
  0xca   :  { %v6263_v31 = vld [vmem:[#allocation5 + $0xb60] sm:$0xf0] }
  0xcb   :  { %v7579_v32 = vld [vmem:[#allocation5 + $0xd44] sm:$0xf]  ;;  %v6266_v37 = vor.u32 %v7515_v29, %v6263_v31  ;;  %3393 = vmatpush.bf16.msrb.mxu0 %v6010_v36 }
  0xcc   :  { %v6519_v33 = vld [vmem:[#allocation5 + $0xd60] sm:$0xf0] }
  0xcd   :  { %v7643_v34 = vld [vmem:[#allocation5 + $0xf44] sm:$0xf]  ;;  %v6522_v39 = vor.u32 %v7579_v32, %v6519_v33  ;;  %3406 = vmatpush.bf16.msrb.mxu1 %v6266_v37 }
  0xce   :  { %v6775_v35 = vld [vmem:[#allocation5 + $0xf60] sm:$0xf0] }
  0xcf   :  { %v7443_v40 = vld [vmem:[#allocation5 + $0x904] sm:$0xf]  ;;  %v6778_v46 = vor.u32 %v7643_v34, %v6775_v35  ;;  %3419 = vmatpush.bf16.msrb.mxu2 %v6522_v39 }
  0xd0   :  { %v5975_v43 = vld [vmem:[#allocation5 + $0x920] sm:$0xf0] }
  0xd1   :  { %v7507_v45 = vld [vmem:[#allocation5 + $0xb04] sm:$0xf]  ;;  %v5978_v52 = vor.u32 %v7443_v40, %v5975_v43  ;;  %3432 = vmatpush.bf16.msrb.mxu3 %v6778_v46  ;;  %v5053_v43 = vld [vmem:[#allocation5 + $0x1c8] sm:$0xf] }
  0xd2   :  { %v6231_v47 = vld [vmem:[#allocation5 + $0xb20] sm:$0xf0]  ;;  %v5309_v46 = vld [vmem:[#allocation5 + $0x3c8] sm:$0xf] }
  0xd3   :  { %v7571_v48 = vld [vmem:[#allocation5 + $0xd04] sm:$0xf]  ;;  %v6234_v53 = vor.u32 %v7507_v45, %v6231_v47  ;;  %3394 = vmatpush.bf16.msrb.mxu0 %v5978_v52  ;;  %v7216_v45 = vld [vmem:[#allocation5 + $0x1e4] sm:$0xf0] }
  0xd4   :  { %v6487_v49 = vld [vmem:[#allocation5 + $0xd20] sm:$0xf0] }
  0xd5   :  { %v7635_v50 = vld [vmem:[#allocation5 + $0xf04] sm:$0xf]  ;;  %v6490_v54 = vor.u32 %v7571_v48, %v6487_v49  ;;  %3407 = vmatpush.bf16.msrb.mxu1 %v6234_v53  ;;  %v7280_v48 = vld [vmem:[#allocation5 + $0x3e4] sm:$0xf0] }
  0xd6   :  { %v6743_v51 = vld [vmem:[#allocation5 + $0xf20] sm:$0xf0]  ;;  %v5565_v49 = vld [vmem:[#allocation5 + $0x5c8] sm:$0xf] }
  0xd7   :  { %v7435_v55 = vld [vmem:[#allocation5 + $0x8c4] sm:$0xf]  ;;  %v6746_v58 = vor.u32 %v7635_v50, %v6743_v51  ;;  %3420 = vmatpush.bf16.msrb.mxu2 %v6490_v54  ;;  %v7344_v50 = vld [vmem:[#allocation5 + $0x5e4] sm:$0xf0] }
  0xd8   :  { %v5943_v56 = vld [vmem:[#allocation5 + $0x8e0] sm:$0xf0]  ;;  %v5821_v53 = vld [vmem:[#allocation5 + $0x7c8] sm:$0xf] }
  0xd9   :  { %v7499_v57 = vld [vmem:[#allocation5 + $0xac4] sm:$0xf]  ;;  %v5946_v0 = vor.u32 %v7435_v55, %v5943_v56  ;;  %3433 = vmatpush.bf16.msrb.mxu3 %v6746_v58  ;;  %v7408_v54 = vld [vmem:[#allocation5 + $0x7e4] sm:$0xf0]  ;;  %v5054_v56 = vor.u32 %v7216_v45, %v5053_v43  ;;  %v5566_v58 = vor.u32 %v7344_v50, %v5565_v49 }
  0xda   :  { %v6199_v59 = vld [vmem:[#allocation5 + $0xae0] sm:$0xf0]  ;;  %v5437_v43 = vld [vmem:[#allocation5 + $0x4c8] sm:$0xf] }
  0xdb   :  { %v7563_v60 = vld [vmem:[#allocation5 + $0xcc4] sm:$0xf]  ;;  %v6202_v1 = vor.u32 %v7499_v57, %v6199_v59  ;;  %3395 = vmatpush.bf16.msrb.mxu0 %v5946_v0  ;;  %v5310_v57 = vor.u32 %v7280_v48, %v5309_v46  ;;  %v5021_v59 = vld [vmem:[#allocation5 + $0x188] sm:$0xf] }
  0xdc   :  { %v6455_v61 = vld [vmem:[#allocation5 + $0xce0] sm:$0xf0]  ;;  %v5533_v0 = vld [vmem:[#allocation5 + $0x588] sm:$0xf] }
  0xdd   :  { %v7627_v62 = vld [vmem:[#allocation5 + $0xec4] sm:$0xf]  ;;  %v6458_v2 = vor.u32 %v7563_v60, %v6455_v61  ;;  %3408 = vmatpush.bf16.msrb.mxu1 %v6202_v1  ;;  %v7208_v60 = vld [vmem:[#allocation5 + $0x1a4] sm:$0xf0] }
  0xde   :  { %v6711_v63 = vld [vmem:[#allocation5 + $0xee0] sm:$0xf0]  ;;  %v5277_v61 = vld [vmem:[#allocation5 + $0x388] sm:$0xf] }
  0xdf   :  { %v7427_v3 = vld [vmem:[#allocation5 + $0x884] sm:$0xf]  ;;  %v6714_v6 = vor.u32 %v7627_v62, %v6711_v63  ;;  %3421 = vmatpush.bf16.msrb.mxu2 %v6458_v2  ;;  %v5822_v62 = vor.u32 %v7408_v54, %v5821_v53  ;;  %v7272_v63 = vld [vmem:[#allocation5 + $0x3a4] sm:$0xf0] }
  0xe0   :  { %v5911_v4 = vld [vmem:[#allocation5 + $0x8a0] sm:$0xf0]  ;;  %v7336_v1 = vld [vmem:[#allocation5 + $0x5a4] sm:$0xf0] }
  0xe1   :  { %v7491_v5 = vld [vmem:[#allocation5 + $0xa84] sm:$0xf]  ;;  %v5914_v12 = vor.u32 %v7427_v3, %v5911_v4  ;;  %3434 = vmatpush.bf16.msrb.mxu3 %v6714_v6  ;;  %v5789_v2 = vld [vmem:[#allocation5 + $0x788] sm:$0xf]  ;;  %v5022_v4 = vor.u32 %v7208_v60, %v5021_v59  ;;  %v5534_v6 = vor.u32 %v7336_v1, %v5533_v0 }
  0xe2   :  { %v6167_v7 = vld [vmem:[#allocation5 + $0xaa0] sm:$0xf0]  ;;  %v7400_v3 = vld [vmem:[#allocation5 + $0x7a4] sm:$0xf0] }
  0xe3   :  { %v7555_v8 = vld [vmem:[#allocation5 + $0xc84] sm:$0xf]  ;;  %v6170_v13 = vor.u32 %v7491_v5, %v6167_v7  ;;  %3396 = vmatpush.bf16.msrb.mxu0 %v5914_v12  ;;  %v5278_v5 = vor.u32 %v7272_v63, %v5277_v61  ;;  %v4989_v7 = vld [vmem:[#allocation5 + $0x148] sm:$0xf] }
  0xe4   :  { %v6423_v9 = vld [vmem:[#allocation5 + $0xca0] sm:$0xf0]  ;;  %v5501_v12 = vld [vmem:[#allocation5 + $0x548] sm:$0xf] }
  0xe5   :  { %v7619_v10 = vld [vmem:[#allocation5 + $0xe84] sm:$0xf]  ;;  %v6426_v14 = vor.u32 %v7555_v8, %v6423_v9  ;;  %3409 = vmatpush.bf16.msrb.mxu1 %v6170_v13  ;;  %v7200_v8 = vld [vmem:[#allocation5 + $0x164] sm:$0xf0] }
  0xe6   :  { %v6679_v11 = vld [vmem:[#allocation5 + $0xea0] sm:$0xf0]  ;;  %v5245_v9 = vld [vmem:[#allocation5 + $0x348] sm:$0xf] }
  0xe7   :  { %v7419_v15 = vld [vmem:[#allocation5 + $0x844] sm:$0xf]  ;;  %v6682_v21 = vor.u32 %v7619_v10, %v6679_v11  ;;  %3422 = vmatpush.bf16.msrb.mxu2 %v6426_v14  ;;  %v5790_v10 = vor.u32 %v7400_v3, %v5789_v2  ;;  %v7264_v11 = vld [vmem:[#allocation5 + $0x364] sm:$0xf0] }
  0xe8   :  { %v5879_v16 = vld [vmem:[#allocation5 + $0x860] sm:$0xf0]  ;;  %v7328_v13 = vld [vmem:[#allocation5 + $0x564] sm:$0xf0] }
  0xe9   :  { %v7483_v17 = vld [vmem:[#allocation5 + $0xa44] sm:$0xf]  ;;  %v5882_v28 = vor.u32 %v7419_v15, %v5879_v16  ;;  %3435 = vmatpush.bf16.msrb.mxu3 %v6682_v21  ;;  %v5757_v14 = vld [vmem:[#allocation5 + $0x748] sm:$0xf]  ;;  %v4990_v16 = vor.u32 %v7200_v8, %v4989_v7  ;;  %v5502_v21 = vor.u32 %v7328_v13, %v5501_v12 }
  0xea   :  { %v6135_v23 = vld [vmem:[#allocation5 + $0xa60] sm:$0xf0]  ;;  %v7392_v15 = vld [vmem:[#allocation5 + $0x764] sm:$0xf0] }
  0xeb   :  { %v7547_v24 = vld [vmem:[#allocation5 + $0xc44] sm:$0xf]  ;;  %v6138_v31 = vor.u32 %v7483_v17, %v6135_v23  ;;  %3397 = vmatpush.bf16.msrb.mxu0 %v5882_v28  ;;  %v5246_v17 = vor.u32 %v7264_v11, %v5245_v9  ;;  %v4957_v23 = vld [vmem:[#allocation5 + $0x108] sm:$0xf] }
  0xec   :  { %v6391_v25 = vld [vmem:[#allocation5 + $0xc60] sm:$0xf0]  ;;  %v5469_v28 = vld [vmem:[#allocation5 + $0x508] sm:$0xf] }
  0xed   :  { %v7611_v26 = vld [vmem:[#allocation5 + $0xe44] sm:$0xf]  ;;  %v6394_v32 = vor.u32 %v7547_v24, %v6391_v25  ;;  %3410 = vmatpush.bf16.msrb.mxu1 %v6138_v31  ;;  %v7192_v24 = vld [vmem:[#allocation5 + $0x124] sm:$0xf0] }
  0xee   :  { %v6647_v27 = vld [vmem:[#allocation5 + $0xe60] sm:$0xf0]  ;;  %v5213_v25 = vld [vmem:[#allocation5 + $0x308] sm:$0xf] }
  0xef   :  { %v7411_v29 = vld [vmem:[#allocation5 + $0x804] sm:$0xf]  ;;  %v6650_v36 = vor.u32 %v7611_v26, %v6647_v27  ;;  %3423 = vmatpush.bf16.msrb.mxu2 %v6394_v32  ;;  %v5758_v26 = vor.u32 %v7392_v15, %v5757_v14  ;;  %v7256_v27 = vld [vmem:[#allocation5 + $0x324] sm:$0xf0]  ;;  %v4958_v32 = vor.u32 %v7192_v24, %v4957_v23 }
  0xf0   :  { %v5847_v30 = vld [vmem:[#allocation5 + $0x820] sm:$0xf0]  ;;  %v7384_v31 = vld [vmem:[#allocation5 + $0x724] sm:$0xf0] }
  0xf1   :  { %v7475_v33 = vld [vmem:[#allocation5 + $0xa04] sm:$0xf]  ;;  %v5850_v47 = vor.u32 %v7411_v29, %v5847_v30  ;;  %3436 = vmatpush.bf16.msrb.mxu3 %v6650_v36  ;;  %v7320_v29 = vld [vmem:[#allocation5 + $0x524] sm:$0xf0] }
  0xf2   :  { %v6103_v34 = vld [vmem:[#allocation5 + $0xa20] sm:$0xf0]  ;;  %v5725_v30 = vld [vmem:[#allocation5 + $0x708] sm:$0xf] }
  0xf3   :  { %v7539_v35 = vld [vmem:[#allocation5 + $0xc04] sm:$0xf]  ;;  %v6106_v51 = vor.u32 %v7475_v33, %v6103_v34  ;;  %3398 = vmatpush.bf16.msrb.mxu0 %v5850_v47  ;;  %v5214_v33 = vor.u32 %v7256_v27, %v5213_v25  ;;  %v5470_v34 = vor.u32 %v7320_v29, %v5469_v28  ;;  %v7184_v36 = vld [vmem:[#allocation5 + $0xe4] sm:$0xf0] }
  0xf4   :  { %v6359_v37 = vld [vmem:[#allocation5 + $0xc20] sm:$0xf0]  ;;  %v7312_v45 = vld [vmem:[#allocation5 + $0x4e4] sm:$0xf0] }
  0xf5   :  { %v7603_v39 = vld [vmem:[#allocation5 + $0xe04] sm:$0xf]  ;;  %v6362_v52 = vor.u32 %v7539_v35, %v6359_v37  ;;  %3411 = vmatpush.bf16.msrb.mxu1 %v6106_v51  ;;  %v4925_v35 = vld [vmem:[#allocation5 + $0xc8] sm:$0xf]  ;;  %v5438_v50 = vor.u32 %v7312_v45, %v5437_v43 }
  0xf6   :  { %v6615_v40 = vld [vmem:[#allocation5 + $0xe20] sm:$0xf0]  ;;  %3399 = vmatmul.bf16.vlgmr.msrb.gmra.mxu0 %v8020_v41  ;;  %v5181_v37 = vld [vmem:[#allocation5 + $0x2c8] sm:$0xf]  ;;  %v4926_v48 = vor.u32 %v7184_v36, %v4925_v35 }
  0xf7   :  { %v6618_v55 = vor.u32 %v7603_v39, %v6615_v40  ;;  %3424 = vmatpush.bf16.msrb.mxu2 %v6362_v52  ;;  %3443 = vmatpush.bf16.msra.mxu0 %v5054_v56  ;;  %v5726_v39 = vor.u32 %v7384_v31, %v5725_v30  ;;  %v7248_v40 = vld [vmem:[#allocation5 + $0x2e4] sm:$0xf0] }
  0xf8   :  { %3412 = vmatmul.bf16.vlgmr.msrb.gmra.mxu1 %v8024_v44  ;;  %v5693_v46 = vld [vmem:[#allocation5 + $0x6c8] sm:$0xf]  ;;  %v5182_v49 = vor.u32 %v7248_v40, %v5181_v37 }
  0xf9   :  { %3437 = vmatpush.bf16.msrb.mxu3 %v6618_v55  ;;  %3456 = vmatpush.bf16.msra.mxu1 %v5310_v57  ;;  %v7376_v47 = vld [vmem:[#allocation5 + $0x6e4] sm:$0xf0] }
  0xfa   :  { %3425 = vmatmul.bf16.vlgmr.msrb.gmra.mxu2 %v8018_v38  ;;  %v4893_v51 = vld [vmem:[#allocation5 + $0x88] sm:$0xf]  ;;  %v5694_v54 = vor.u32 %v7376_v47, %v5693_v46 }
  0xfb   :  { %3469 = vmatpush.bf16.msra.mxu2 %v5566_v58  ;;  %3444 = vmatpush.bf16.msra.mxu0 %v5022_v4  ;;  %v7176_v52 = vld [vmem:[#allocation5 + $0xa4] sm:$0xf0] }
  0xfc   :  { %3438 = vmatmul.bf16.vlgmr.msrb.gmra.mxu3 %v8022_v42  ;;  %v5149_v53 = vld [vmem:[#allocation5 + $0x288] sm:$0xf]  ;;  %v4894_v60 = vor.u32 %v7176_v52, %v4893_v51 }
  0xfd   :  { %3482 = vmatpush.bf16.msra.mxu3 %v5822_v62  ;;  %3457 = vmatpush.bf16.msra.mxu1 %v5278_v5  ;;  %v7240_v55 = vld [vmem:[#allocation5 + $0x2a4] sm:$0xf0] }
  0xfe   :  { %v5405_v56 = vld [vmem:[#allocation5 + $0x488] sm:$0xf]  ;;  %v5150_v61 = vor.u32 %v7240_v55, %v5149_v53 }
  0xff   :  { %3470 = vmatpush.bf16.msra.mxu2 %v5534_v6  ;;  %3445 = vmatpush.bf16.msra.mxu0 %v4990_v16  ;;  %v7304_v57 = vld [vmem:[#allocation5 + $0x4a4] sm:$0xf0] }
 0x100   :  { %v5661_v58 = vld [vmem:[#allocation5 + $0x688] sm:$0xf]  ;;  %v5406_v62 = vor.u32 %v7304_v57, %v5405_v56 }
 0x101   :  { %3483 = vmatpush.bf16.msra.mxu3 %v5790_v10  ;;  %3458 = vmatpush.bf16.msra.mxu1 %v5246_v17  ;;  %v7368_v59 = vld [vmem:[#allocation5 + $0x6a4] sm:$0xf0] }
 0x102   :  { %v4861_v63 = vld [vmem:[#allocation5 + $0x48] sm:$0xf]  ;;  %v5662_v2 = vor.u32 %v7368_v59, %v5661_v58 }
 0x103   :  { %3471 = vmatpush.bf16.msra.mxu2 %v5502_v21  ;;  %3446 = vmatpush.bf16.msra.mxu0 %v4958_v32  ;;  %v7168_v0 = vld [vmem:[#allocation5 + $0x64] sm:$0xf0] }
 0x104   :  { %v5117_v1 = vld [vmem:[#allocation5 + $0x248] sm:$0xf]  ;;  %v4862_v8 = vor.u32 %v7168_v0, %v4861_v63 }
 0x105   :  { %3484 = vmatpush.bf16.msra.mxu3 %v5758_v26  ;;  %3459 = vmatpush.bf16.msra.mxu1 %v5214_v33  ;;  %v7232_v3 = vld [vmem:[#allocation5 + $0x264] sm:$0xf0] }
 0x106   :  { %v5373_v4 = vld [vmem:[#allocation5 + $0x448] sm:$0xf]  ;;  %v5118_v11 = vor.u32 %v7232_v3, %v5117_v1 }
 0x107   :  { %3472 = vmatpush.bf16.msra.mxu2 %v5470_v34  ;;  %3447 = vmatpush.bf16.msra.mxu0 %v4926_v48  ;;  %v7296_v5 = vld [vmem:[#allocation5 + $0x464] sm:$0xf0] }
 0x108   :  { %v5629_v6 = vld [vmem:[#allocation5 + $0x648] sm:$0xf]  ;;  %v5374_v12 = vor.u32 %v7296_v5, %v5373_v4 }
 0x109   :  { %3485 = vmatpush.bf16.msra.mxu3 %v5726_v39  ;;  %3460 = vmatpush.bf16.msra.mxu1 %v5182_v49  ;;  %v7360_v7 = vld [vmem:[#allocation5 + $0x664] sm:$0xf0] }
 0x10a   :  { %v4829_v9 = vld [vmem:[#allocation5 + $0x8] sm:$0xf]  ;;  %v5630_v16 = vor.u32 %v7360_v7, %v5629_v6 }
 0x10b   :  { %3473 = vmatpush.bf16.msra.mxu2 %v5438_v50  ;;  %3448 = vmatpush.bf16.msra.mxu0 %v4894_v60  ;;  %v7160_v10 = vld [vmem:[#allocation5 + $0x24] sm:$0xf0] }
 0x10c   :  { %v5085_v13 = vld [vmem:[#allocation5 + $0x208] sm:$0xf]  ;;  %v4830_v27 = vor.u32 %v7160_v10, %v4829_v9 }
 0x10d   :  { %3486 = vmatpush.bf16.msra.mxu3 %v5694_v54  ;;  %3461 = vmatpush.bf16.msra.mxu1 %v5150_v61  ;;  %v7224_v14 = vld [vmem:[#allocation5 + $0x224] sm:$0xf0] }
 0x10e   :  { %v5341_v15 = vld [vmem:[#allocation5 + $0x408] sm:$0xf]  ;;  %v5086_v31 = vor.u32 %v7224_v14, %v5085_v13 }
 0x10f   :  { %3474 = vmatpush.bf16.msra.mxu2 %v5406_v62  ;;  %v7288_v17 = vld [vmem:[#allocation5 + $0x424] sm:$0xf0]  ;;  %3449 = vmatpush.bf16.msra.mxu0 %v4862_v8 }
 0x110   :  { %v5597_v21 = vld [vmem:[#allocation5 + $0x608] sm:$0xf]  ;;  %v5342_v32 = vor.u32 %v7288_v17, %v5341_v15 }
 0x111   :  { %3487 = vmatpush.bf16.msra.mxu3 %v5662_v2  ;;  %v7352_v23 = vld [vmem:[#allocation5 + $0x624] sm:$0xf0]  ;;  %3462 = vmatpush.bf16.msra.mxu1 %v5118_v11 }
 0x112   :  { %v6077_v24 = vld [vmem:[#allocation5 + $0x9c8] sm:$0xf]  ;;  %v5598_v35 = vor.u32 %v7352_v23, %v5597_v21 }
 0x113   :  { %v7472_v25 = vld [vmem:[#allocation5 + $0x9e4] sm:$0xf0]  ;;  %3475 = vmatpush.bf16.msra.mxu2 %v5374_v12  ;;  %3450 = vmatpush.bf16.msra.mxu0 %v4830_v27 }
 0x114   :  { %v6333_v26 = vld [vmem:[#allocation5 + $0xbc8] sm:$0xf]  ;;  %v6078_v36 = vor.u32 %v7472_v25, %v6077_v24 }
 0x115   :  { %v7536_v28 = vld [vmem:[#allocation5 + $0xbe4] sm:$0xf0]  ;;  %3488 = vmatpush.bf16.msra.mxu3 %v5630_v16  ;;  %3463 = vmatpush.bf16.msra.mxu1 %v5086_v31 }
 0x116   :  { %v6589_v29 = vld [vmem:[#allocation5 + $0xdc8] sm:$0xf]  ;;  %v6334_v37 = vor.u32 %v7536_v28, %v6333_v26  ;;  %3451 = vmatmul.bf16.vlgmr.msra.gmra.mxu0 %v8008_v19  ;;  %v8042_v26 = vld [vmem:[#allocation7] sm:$0xff] }
 0x117   :  { %v7600_v30 = vld [vmem:[#allocation5 + $0xde4] sm:$0xf0]  ;;  %3476 = vmatpush.bf16.msra.mxu2 %v5342_v32  ;;  %3495 = vmatpush.bf16.msrb.mxu0 %v6078_v36 }
 0x118   :  { %v6845_v33 = vld [vmem:[#allocation5 + $0xfc8] sm:$0xf]  ;;  %v6590_v39 = vor.u32 %v7600_v30, %v6589_v29  ;;  %3464 = vmatmul.bf16.vlgmr.msra.gmra.mxu1 %v8012_v22 }
 0x119   :  { %v7664_v34 = vld [vmem:[#allocation5 + $0xfe4] sm:$0xf0]  ;;  %3489 = vmatpush.bf16.msra.mxu3 %v5598_v35  ;;  %3508 = vmatpush.bf16.msrb.mxu1 %v6334_v37  ;;  %v631_v35 = vperm.slane %v8042_v26, 0 }
 0x11a   :  { %v6045_v40 = vld [vmem:[#allocation5 + $0x988] sm:$0xf]  ;;  %v6846_v46 = vor.u32 %v7664_v34, %v6845_v33  ;;  %3477 = vmatmul.bf16.vlgmr.msra.gmra.mxu2 %v8006_v18 }
 0x11b   :  { %v7464_v43 = vld [vmem:[#allocation5 + $0x9a4] sm:$0xf0]  ;;  %3521 = vmatpush.bf16.msrb.mxu2 %v6590_v39 }
 0x11c   :  { %v6301_v45 = vld [vmem:[#allocation5 + $0xb88] sm:$0xf]  ;;  %v6046_v52 = vor.u32 %v7464_v43, %v6045_v40  ;;  %3490 = vmatmul.bf16.vlgmr.msra.gmra.mxu3 %v8010_v20 }
 0x11d   :  { %v7528_v47 = vld [vmem:[#allocation5 + $0xba4] sm:$0xf0]  ;;  %3534 = vmatpush.bf16.msrb.mxu3 %v6846_v46 }
 0x11e   :  { %v6557_v48 = vld [vmem:[#allocation5 + $0xd88] sm:$0xf]  ;;  %v6302_v53 = vor.u32 %v7528_v47, %v6301_v45  ;;  %3496 = vmatpush.bf16.msrb.mxu0 %v6046_v52  ;;  %v3244_v47 = vpop.f32.mrf.mxu0 }
 0x11f   :  { %v7592_v49 = vld [vmem:[#allocation5 + $0xda4] sm:$0xf0] }
 0x120   :  { %v6813_v50 = vld [vmem:[#allocation5 + $0xf88] sm:$0xf]  ;;  %v6558_v54 = vor.u32 %v7592_v49, %v6557_v48  ;;  %3509 = vmatpush.bf16.msrb.mxu1 %v6302_v53  ;;  %v3245_v53 = vadd.f32 %v3244_v47, %v631_v35  ;;  %v7396_v47 = vld [vmem:[#allocation5 + $0x78c] sm:$0xf] }
 0x121   :  { %v7656_v51 = vld [vmem:[#allocation5 + $0xfa4] sm:$0xf0] }
 0x122   :  { %v6013_v55 = vld [vmem:[#allocation5 + $0x948] sm:$0xf]  ;;  %v6814_v58 = vor.u32 %v7656_v51, %v6813_v50  ;;  %3522 = vmatpush.bf16.msrb.mxu2 %v6558_v54  ;;  %v3257_v54 = vpop.f32.mrf.mxu1 }
 0x123   :  { %v7456_v56 = vld [vmem:[#allocation5 + $0x964] sm:$0xf0] }
 0x124   :  { %v6269_v57 = vld [vmem:[#allocation5 + $0xb48] sm:$0xf]  ;;  %v6014_v0 = vor.u32 %v7456_v56, %v6013_v55  ;;  %3535 = vmatpush.bf16.msrb.mxu3 %v6814_v58 }
 0x125   :  { %v7520_v59 = vld [vmem:[#allocation5 + $0xb64] sm:$0xf0] }
 0x126   :  { %v6525_v60 = vld [vmem:[#allocation5 + $0xd48] sm:$0xf]  ;;  %v6270_v1 = vor.u32 %v7520_v59, %v6269_v57  ;;  %3497 = vmatpush.bf16.msrb.mxu0 %v6014_v0 }
 0x127   :  { %v7584_v61 = vld [vmem:[#allocation5 + $0xd64] sm:$0xf0] }
 0x128   :  { %v6781_v62 = vld [vmem:[#allocation5 + $0xf48] sm:$0xf]  ;;  %v6526_v2 = vor.u32 %v7584_v61, %v6525_v60  ;;  %3510 = vmatpush.bf16.msrb.mxu1 %v6270_v1  ;;  %v3258_v61 = vadd.f32 %v3257_v54, %v3245_v53  ;;  %v7196_v54 = vld [vmem:[#allocation5 + $0x14c] sm:$0xf] }
 0x129   :  { %v7648_v63 = vld [vmem:[#allocation5 + $0xf64] sm:$0xf0] }
 0x12a   :  { %v5981_v3 = vld [vmem:[#allocation5 + $0x908] sm:$0xf]  ;;  %v6782_v6 = vor.u32 %v7648_v63, %v6781_v62  ;;  %3523 = vmatpush.bf16.msrb.mxu2 %v6526_v2 }
 0x12b   :  { %v7448_v4 = vld [vmem:[#allocation5 + $0x924] sm:$0xf0] }
 0x12c   :  { %v6237_v5 = vld [vmem:[#allocation5 + $0xb08] sm:$0xf]  ;;  %v5982_v12 = vor.u32 %v7448_v4, %v5981_v3  ;;  %3536 = vmatpush.bf16.msrb.mxu3 %v6782_v6  ;;  %v3270_v6 = vpop.f32.mrf.mxu2 }
 0x12d   :  { %v7512_v7 = vld [vmem:[#allocation5 + $0xb24] sm:$0xf0] }
 0x12e   :  { %v6493_v8 = vld [vmem:[#allocation5 + $0xd08] sm:$0xf]  ;;  %v6238_v14 = vor.u32 %v7512_v7, %v6237_v5  ;;  %3498 = vmatpush.bf16.msrb.mxu0 %v5982_v12  ;;  %v3283_v12 = vpop.f32.mrf.mxu3 }
 0x12f   :  { %v7576_v9 = vld [vmem:[#allocation5 + $0xd24] sm:$0xf0] }
 0x130   :  { %v6749_v10 = vld [vmem:[#allocation5 + $0xf08] sm:$0xf]  ;;  %v6494_v15 = vor.u32 %v7576_v9, %v6493_v8  ;;  %3511 = vmatpush.bf16.msrb.mxu1 %v6238_v14  ;;  %v5055_v14 = vld [vmem:[#allocation5 + $0x1e8] sm:$0xf0] }
 0x131   :  { %v7640_v11 = vld [vmem:[#allocation5 + $0xf24] sm:$0xf0] }
 0x132   :  { %v5949_v13 = vld [vmem:[#allocation5 + $0x8c8] sm:$0xf]  ;;  %v6750_v23 = vor.u32 %v7640_v11, %v6749_v10  ;;  %3524 = vmatpush.bf16.msrb.mxu2 %v6494_v15  ;;  %v3271_v11 = vadd.f32 %v3270_v6, %v3258_v61  ;;  %v7276_v15 = vld [vmem:[#allocation5 + $0x3cc] sm:$0xf] }
 0x133   :  { %v7440_v16 = vld [vmem:[#allocation5 + $0x8e4] sm:$0xf0]  ;;  %v7388_v61 = vld [vmem:[#allocation5 + $0x74c] sm:$0xf] }
 0x134   :  { %v6205_v17 = vld [vmem:[#allocation5 + $0xac8] sm:$0xf]  ;;  %v5950_v29 = vor.u32 %v7440_v16, %v5949_v13  ;;  %3537 = vmatpush.bf16.msrb.mxu3 %v6750_v23  ;;  %v7212_v13 = vld [vmem:[#allocation5 + $0x1cc] sm:$0xf] }
 0x135   :  { %v7504_v21 = vld [vmem:[#allocation5 + $0xae4] sm:$0xf0]  ;;  %v5567_v23 = vld [vmem:[#allocation5 + $0x5e8] sm:$0xf0] }
 0x136   :  { %v6461_v24 = vld [vmem:[#allocation5 + $0xcc8] sm:$0xf]  ;;  %v6206_v31 = vor.u32 %v7504_v21, %v6205_v17  ;;  %3499 = vmatpush.bf16.msrb.mxu0 %v5950_v29  ;;  %v5311_v17 = vld [vmem:[#allocation5 + $0x3e8] sm:$0xf0] }
 0x137   :  { %v7568_v25 = vld [vmem:[#allocation5 + $0xce4] sm:$0xf0]  ;;  %v7340_v21 = vld [vmem:[#allocation5 + $0x5cc] sm:$0xf] }
 0x138   :  { %v6717_v27 = vld [vmem:[#allocation5 + $0xec8] sm:$0xf]  ;;  %v6462_v32 = vor.u32 %v7568_v25, %v6461_v24  ;;  %3512 = vmatpush.bf16.msrb.mxu1 %v6206_v31  ;;  %v8045_v24 = vadd.f32 %v3283_v12, %v3271_v11  ;;  %v3246_v25 = vpop.f32.mrf.mxu0  ;;  %v7404_v29 = vld [vmem:[#allocation5 + $0x7cc] sm:$0xf]  ;;  %v3259_v31 = vpop.f32.mrf.mxu1  ;;  %v5570_v35 = vor.u32 %v7340_v21, %v5567_v23 }
 0x139   :  { %v7632_v28 = vld [vmem:[#allocation5 + $0xee4] sm:$0xf0]  ;;  %v5215_v6 = vld [vmem:[#allocation5 + $0x328] sm:$0xf0] }
 0x13a   :  { %v5917_v30 = vld [vmem:[#allocation5 + $0x888] sm:$0xf]  ;;  %v6718_v36 = vor.u32 %v7632_v28, %v6717_v27  ;;  %3525 = vmatpush.bf16.msrb.mxu2 %v6462_v32  ;;  %v5695_v31 = vld [vmem:[#allocation5 + $0x6e8] sm:$0xf0] }
 0x13b   :  { %v7432_v33 = vld [vmem:[#allocation5 + $0x8a4] sm:$0xf0] }
 0x13c   :  { %v6173_v34 = vld [vmem:[#allocation5 + $0xa88] sm:$0xf]  ;;  %v5918_v46 = vor.u32 %v7432_v33, %v5917_v30  ;;  %3538 = vmatpush.bf16.msrb.mxu3 %v6718_v36  ;;  %v5823_v30 = vld [vmem:[#allocation5 + $0x7e8] sm:$0xf0]  ;;  %v5058_v33 = vor.u32 %v7212_v13, %v5055_v14 }
 0x13d   :  { %v7496_v37 = vld [vmem:[#allocation5 + $0xaa4] sm:$0xf0]  ;;  %v7204_v36 = vld [vmem:[#allocation5 + $0x18c] sm:$0xf] }
 0x13e   :  { %v6429_v39 = vld [vmem:[#allocation5 + $0xc88] sm:$0xf]  ;;  %v6174_v48 = vor.u32 %v7496_v37, %v6173_v34  ;;  %3500 = vmatpush.bf16.msrb.mxu0 %v5918_v46  ;;  %v5314_v34 = vor.u32 %v7276_v15, %v5311_v17  ;;  %v5023_v37 = vld [vmem:[#allocation5 + $0x1a8] sm:$0xf0] }
 0x13f   :  { %v7560_v40 = vld [vmem:[#allocation5 + $0xca4] sm:$0xf0]  ;;  %v5535_v46 = vld [vmem:[#allocation5 + $0x5a8] sm:$0xf0] }
 0x140   :  { %v6685_v43 = vld [vmem:[#allocation5 + $0xe88] sm:$0xf]  ;;  %v6430_v49 = vor.u32 %v7560_v40, %v6429_v39  ;;  %3513 = vmatpush.bf16.msrb.mxu1 %v6174_v48  ;;  %v7268_v39 = vld [vmem:[#allocation5 + $0x38c] sm:$0xf]  ;;  %v5826_v40 = vor.u32 %v7404_v29, %v5823_v30  ;;  %v3296_v12 = vpop.f32.mrf.mxu0  ;;  %v3309_v23 = vpop.f32.mrf.mxu1 }
 0x141   :  { %v7624_v45 = vld [vmem:[#allocation5 + $0xea4] sm:$0xf0]  ;;  %v5791_v48 = vld [vmem:[#allocation5 + $0x7a8] sm:$0xf0]  ;;  %v3297_v21 = vadd.f32 %v3296_v12, %v8045_v24 }
 0x142   :  { %v5885_v50 = vld [vmem:[#allocation5 + $0x848] sm:$0xf]  ;;  %v6686_v55 = vor.u32 %v7624_v45, %v6685_v43  ;;  %3526 = vmatpush.bf16.msrb.mxu2 %v6430_v49  ;;  %v5279_v43 = vld [vmem:[#allocation5 + $0x3a8] sm:$0xf0]  ;;  %v3272_v49 = vpop.f32.mrf.mxu2 }
 0x143   :  { %v7424_v51 = vld [vmem:[#allocation5 + $0x864] sm:$0xf0]  ;;  %v7332_v45 = vld [vmem:[#allocation5 + $0x58c] sm:$0xf] }
 0x144   :  { %v6141_v52 = vld [vmem:[#allocation5 + $0xa48] sm:$0xf]  ;;  %v5886_v62 = vor.u32 %v7424_v51, %v5885_v50  ;;  %3539 = vmatpush.bf16.msrb.mxu3 %v6686_v55  ;;  %v5026_v50 = vor.u32 %v7204_v36, %v5023_v37  ;;  %v3285_v51 = vpop.f32.mrf.mxu3  ;;  %v5538_v53 = vor.u32 %v7332_v45, %v5535_v46  ;;  %v4991_v55 = vld [vmem:[#allocation5 + $0x168] sm:$0xf0] }
 0x145   :  { %v7488_v56 = vld [vmem:[#allocation5 + $0xa64] sm:$0xf0]  ;;  %v7180_v15 = vld [vmem:[#allocation5 + $0xcc] sm:$0xf] }
 0x146   :  { %v6397_v57 = vld [vmem:[#allocation5 + $0xc48] sm:$0xf]  ;;  %v6142_v1 = vor.u32 %v7488_v56, %v6141_v52  ;;  %3501 = vmatpush.bf16.msrb.mxu0 %v5886_v62  ;;  %v5282_v52 = vor.u32 %v7268_v39, %v5279_v43  ;;  %v7260_v56 = vld [vmem:[#allocation5 + $0x34c] sm:$0xf] }
 0x147   :  { %v7552_v58 = vld [vmem:[#allocation5 + $0xc64] sm:$0xf0]  ;;  %v5759_v62 = vld [vmem:[#allocation5 + $0x768] sm:$0xf0] }
 0x148   :  { %v6653_v59 = vld [vmem:[#allocation5 + $0xe48] sm:$0xf]  ;;  %v6398_v2 = vor.u32 %v7552_v58, %v6397_v57  ;;  %3514 = vmatpush.bf16.msrb.mxu1 %v6142_v1  ;;  %v5794_v57 = vor.u32 %v7396_v47, %v5791_v48  ;;  %v5247_v58 = vld [vmem:[#allocation5 + $0x368] sm:$0xf0] }
 0x149   :  { %v7616_v60 = vld [vmem:[#allocation5 + $0xe64] sm:$0xf0]  ;;  %v7244_v17 = vld [vmem:[#allocation5 + $0x2cc] sm:$0xf] }
 0x14a   :  { %v5853_v63 = vld [vmem:[#allocation5 + $0x808] sm:$0xf]  ;;  %v6654_v7 = vor.u32 %v7616_v60, %v6653_v59  ;;  %3527 = vmatpush.bf16.msrb.mxu2 %v6398_v2  ;;  %v7324_v59 = vld [vmem:[#allocation5 + $0x54c] sm:$0xf] }
 0x14b   :  { %v7416_v0 = vld [vmem:[#allocation5 + $0x824] sm:$0xf0]  ;;  %v5503_v60 = vld [vmem:[#allocation5 + $0x568] sm:$0xf0] }
 0x14c   :  { %v6109_v3 = vld [vmem:[#allocation5 + $0xa08] sm:$0xf]  ;;  %v5854_v16 = vor.u32 %v7416_v0, %v5853_v63  ;;  %3540 = vmatpush.bf16.msrb.mxu3 %v6654_v7  ;;  %v4994_v63 = vor.u32 %v7196_v54, %v4991_v55  ;;  %v5250_v0 = vor.u32 %v7260_v56, %v5247_v58  ;;  %v5506_v1 = vor.u32 %v7324_v59, %v5503_v60  ;;  %v7188_v2 = vld [vmem:[#allocation5 + $0x10c] sm:$0xf]  ;;  %v3335_v48 = vpop.f32.mrf.mxu3  ;;  %v3311_v59 = vpop.f32.mrf.mxu1 }
 0x14d   :  { %v7480_v4 = vld [vmem:[#allocation5 + $0xa24] sm:$0xf0]  ;;  %v7316_v7 = vld [vmem:[#allocation5 + $0x50c] sm:$0xf] }
 0x14e   :  { %v6365_v5 = vld [vmem:[#allocation5 + $0xc08] sm:$0xf]  ;;  %v6110_v27 = vor.u32 %v7480_v4, %v6109_v3  ;;  %3502 = vmatpush.bf16.msrb.mxu0 %v5854_v16  ;;  %v4959_v3 = vld [vmem:[#allocation5 + $0x128] sm:$0xf0] }
 0x14f   :  { %v7544_v8 = vld [vmem:[#allocation5 + $0xc24] sm:$0xf0]  ;;  %v7252_v4 = vld [vmem:[#allocation5 + $0x30c] sm:$0xf]  ;;  %v4962_v11 = vor.u32 %v7188_v2, %v4959_v3 }
 0x150   :  { %v6621_v9 = vld [vmem:[#allocation5 + $0xe08] sm:$0xf]  ;;  %v6366_v28 = vor.u32 %v7544_v8, %v6365_v5  ;;  %3515 = vmatpush.bf16.msrb.mxu1 %v6110_v27  ;;  %v5762_v5 = vor.u32 %v7388_v61, %v5759_v62  ;;  %v5471_v8 = vld [vmem:[#allocation5 + $0x528] sm:$0xf0]  ;;  %v5218_v13 = vor.u32 %v7252_v4, %v5215_v6 }
 0x151   :  { %v7608_v10 = vld [vmem:[#allocation5 + $0xe24] sm:$0xf0]  ;;  %3503 = vmatmul.bf16.vlgmr.msrb.gmra.mxu0 %v8020_v41  ;;  %v5474_v14 = vor.u32 %v7316_v7, %v5471_v8  ;;  %v4927_v16 = vld [vmem:[#allocation5 + $0xe8] sm:$0xf0] }
 0x152   :  { %v6622_v32 = vor.u32 %v7608_v10, %v6621_v9  ;;  %3528 = vmatpush.bf16.msrb.mxu2 %v6366_v28  ;;  %3547 = vmatpush.bf16.msra.mxu0 %v5058_v33  ;;  %v7380_v9 = vld [vmem:[#allocation5 + $0x70c] sm:$0xf]  ;;  %v4930_v33 = vor.u32 %v7180_v15, %v4927_v16 }
 0x153   :  { %3516 = vmatmul.bf16.vlgmr.msrb.gmra.mxu1 %v8024_v44  ;;  %v5727_v10 = vld [vmem:[#allocation5 + $0x728] sm:$0xf0] }
 0x154   :  { %3541 = vmatpush.bf16.msrb.mxu3 %v6622_v32  ;;  %3560 = vmatpush.bf16.msra.mxu1 %v5314_v34  ;;  %v5730_v25 = vor.u32 %v7380_v9, %v5727_v10  ;;  %v5183_v27 = vld [vmem:[#allocation5 + $0x2e8] sm:$0xf0]  ;;  %v3310_v32 = vadd.f32 %v3309_v23, %v3297_v21  ;;  %v3337_v15 = vpop.f32.mrf.mxu3 }
 0x155   :  { %3529 = vmatmul.bf16.vlgmr.msrb.gmra.mxu2 %v8018_v38  ;;  %v7308_v28 = vld [vmem:[#allocation5 + $0x4cc] sm:$0xf]  ;;  %v5186_v34 = vor.u32 %v7244_v17, %v5183_v27 }
 0x156   :  { %3573 = vmatpush.bf16.msra.mxu2 %v5570_v35  ;;  %3548 = vmatpush.bf16.msra.mxu0 %v5026_v50  ;;  %v5439_v29 = vld [vmem:[#allocation5 + $0x4e8] sm:$0xf0] }
 0x157   :  { %3542 = vmatmul.bf16.vlgmr.msrb.gmra.mxu3 %v8022_v42  ;;  %v7372_v30 = vld [vmem:[#allocation5 + $0x6cc] sm:$0xf]  ;;  %v5442_v35 = vor.u32 %v7308_v28, %v5439_v29 }
 0x158   :  { %3586 = vmatpush.bf16.msra.mxu3 %v5826_v40  ;;  %3561 = vmatpush.bf16.msra.mxu1 %v5282_v52  ;;  %v7172_v36 = vld [vmem:[#allocation5 + $0x8c] sm:$0xf]  ;;  %v3322_v40 = vpop.f32.mrf.mxu2  ;;  %v5698_v24 = vor.u32 %v7372_v30, %v5695_v31 }
 0x159   :  { %v4895_v37 = vld [vmem:[#allocation5 + $0xa8] sm:$0xf0]  ;;  %v3323_v47 = vadd.f32 %v3322_v40, %v3310_v32 }
 0x15a   :  { %3574 = vmatpush.bf16.msra.mxu2 %v5538_v53  ;;  %3549 = vmatpush.bf16.msra.mxu0 %v4994_v63  ;;  %v7236_v39 = vld [vmem:[#allocation5 + $0x28c] sm:$0xf]  ;;  %v4898_v51 = vor.u32 %v7172_v36, %v4895_v37  ;;  %v3298_v53 = vpop.f32.mrf.mxu0 }
 0x15b   :  { %v5151_v43 = vld [vmem:[#allocation5 + $0x2a8] sm:$0xf0]  ;;  %v8052_v52 = vadd.f32 %v3335_v48, %v3323_v47 }
 0x15c   :  { %3587 = vmatpush.bf16.msra.mxu3 %v5794_v57  ;;  %3562 = vmatpush.bf16.msra.mxu1 %v5250_v0  ;;  %v7300_v45 = vld [vmem:[#allocation5 + $0x48c] sm:$0xf]  ;;  %v5154_v54 = vor.u32 %v7236_v39, %v5151_v43 }
 0x15d   :  { %v5407_v46 = vld [vmem:[#allocation5 + $0x4a8] sm:$0xf0] }
 0x15e   :  { %3575 = vmatpush.bf16.msra.mxu2 %v5506_v1  ;;  %3550 = vmatpush.bf16.msra.mxu0 %v4962_v11  ;;  %v7364_v49 = vld [vmem:[#allocation5 + $0x68c] sm:$0xf]  ;;  %v5410_v55 = vor.u32 %v7300_v45, %v5407_v46 }
 0x15f   :  { %v5663_v50 = vld [vmem:[#allocation5 + $0x6a8] sm:$0xf0] }
 0x160   :  { %3588 = vmatpush.bf16.msra.mxu3 %v5762_v5  ;;  %3563 = vmatpush.bf16.msra.mxu1 %v5218_v13  ;;  %v7164_v56 = vld [vmem:[#allocation5 + $0x4c] sm:$0xf]  ;;  %v5666_v60 = vor.u32 %v7364_v49, %v5663_v50  ;;  %v3324_v10 = vpop.f32.mrf.mxu2 }
 0x161   :  { %v4863_v57 = vld [vmem:[#allocation5 + $0x68] sm:$0xf0] }
 0x162   :  { %3576 = vmatpush.bf16.msra.mxu2 %v5474_v14  ;;  %3551 = vmatpush.bf16.msra.mxu0 %v4930_v33  ;;  %v7228_v58 = vld [vmem:[#allocation5 + $0x24c] sm:$0xf]  ;;  %v4866_v2 = vor.u32 %v7164_v56, %v4863_v57 }
 0x163   :  { %v5119_v61 = vld [vmem:[#allocation5 + $0x268] sm:$0xf0] }
 0x164   :  { %3589 = vmatpush.bf16.msra.mxu3 %v5730_v25  ;;  %3564 = vmatpush.bf16.msra.mxu1 %v5186_v34  ;;  %v7292_v62 = vld [vmem:[#allocation5 + $0x44c] sm:$0xf]  ;;  %v5122_v5 = vor.u32 %v7228_v58, %v5119_v61 }
 0x165   :  { %v5375_v63 = vld [vmem:[#allocation5 + $0x468] sm:$0xf0] }
 0x166   :  { %3577 = vmatpush.bf16.msra.mxu2 %v5442_v35  ;;  %v7356_v0 = vld [vmem:[#allocation5 + $0x64c] sm:$0xf]  ;;  %3552 = vmatpush.bf16.msra.mxu0 %v4898_v51  ;;  %v5378_v6 = vor.u32 %v7292_v62, %v5375_v63 }
 0x167   :  { %v5631_v1 = vld [vmem:[#allocation5 + $0x668] sm:$0xf0] }
 0x168   :  { %3590 = vmatpush.bf16.msra.mxu3 %v5698_v24  ;;  %v7156_v3 = vld [vmem:[#allocation5 + $0xc] sm:$0xf]  ;;  %3565 = vmatpush.bf16.msra.mxu1 %v5154_v54  ;;  %v5634_v11 = vor.u32 %v7356_v0, %v5631_v1 }
 0x169   :  { %v4831_v4 = vld [vmem:[#allocation5 + $0x28] sm:$0xf0] }
 0x16a   :  { %3578 = vmatpush.bf16.msra.mxu2 %v5410_v55  ;;  %v7220_v7 = vld [vmem:[#allocation5 + $0x20c] sm:$0xf]  ;;  %3553 = vmatpush.bf16.msra.mxu0 %v4866_v2  ;;  %v4834_v23 = vor.u32 %v7156_v3, %v4831_v4  ;;  %v632_v4 = vperm.slane %v8042_v26, 1 }
 0x16b   :  { %v5087_v8 = vld [vmem:[#allocation5 + $0x228] sm:$0xf0] }
 0x16c   :  { %v7284_v9 = vld [vmem:[#allocation5 + $0x40c] sm:$0xf]  ;;  %3591 = vmatpush.bf16.msra.mxu3 %v5666_v60  ;;  %3566 = vmatpush.bf16.msra.mxu1 %v5122_v5  ;;  %v5090_v29 = vor.u32 %v7220_v7, %v5087_v8 }
 0x16d   :  { %v5343_v12 = vld [vmem:[#allocation5 + $0x428] sm:$0xf0] }
 0x16e   :  { %v7348_v13 = vld [vmem:[#allocation5 + $0x60c] sm:$0xf]  ;;  %3579 = vmatpush.bf16.msra.mxu2 %v5378_v6  ;;  %v5346_v30 = vor.u32 %v7284_v9, %v5343_v12  ;;  %3554 = vmatpush.bf16.msra.mxu0 %v4834_v23  ;;  %v3348_v12 = vpop.f32.mrf.mxu0  ;;  %v3361_v23 = vpop.f32.mrf.mxu1 }
 0x16f   :  { %v5599_v14 = vld [vmem:[#allocation5 + $0x628] sm:$0xf0] }
 0x170   :  { %v7468_v16 = vld [vmem:[#allocation5 + $0x9cc] sm:$0xf]  ;;  %3592 = vmatpush.bf16.msra.mxu3 %v5634_v11  ;;  %v5602_v33 = vor.u32 %v7348_v13, %v5599_v14  ;;  %3567 = vmatpush.bf16.msra.mxu1 %v5090_v29 }
 0x171   :  { %v6079_v17 = vld [vmem:[#allocation5 + $0x9e8] sm:$0xf0]  ;;  %3555 = vmatmul.bf16.vlgmr.msra.gmra.mxu0 %v8008_v19 }
 0x172   :  { %v7532_v21 = vld [vmem:[#allocation5 + $0xbcc] sm:$0xf]  ;;  %v6082_v34 = vor.u32 %v7468_v16, %v6079_v17  ;;  %3580 = vmatpush.bf16.msra.mxu2 %v5346_v30 }
 0x173   :  { %v6335_v25 = vld [vmem:[#allocation5 + $0xbe8] sm:$0xf0]  ;;  %3568 = vmatmul.bf16.vlgmr.msra.gmra.mxu1 %v8012_v22 }
 0x174   :  { %v7596_v27 = vld [vmem:[#allocation5 + $0xdcc] sm:$0xf]  ;;  %v6338_v35 = vor.u32 %v7532_v21, %v6335_v25  ;;  %3593 = vmatpush.bf16.msra.mxu3 %v5602_v33  ;;  %3599 = vmatpush.bf16.msrb.mxu0 %v6082_v34  ;;  %v3349_v21 = vadd.f32 %v3348_v12, %v632_v4 }
 0x175   :  { %v6591_v28 = vld [vmem:[#allocation5 + $0xde8] sm:$0xf0]  ;;  %3581 = vmatmul.bf16.vlgmr.msra.gmra.mxu2 %v8006_v18 }
 0x176   :  { %v7660_v31 = vld [vmem:[#allocation5 + $0xfcc] sm:$0xf]  ;;  %v6594_v36 = vor.u32 %v7596_v27, %v6591_v28  ;;  %3612 = vmatpush.bf16.msrb.mxu1 %v6338_v35 }
 0x177   :  { %v6847_v32 = vld [vmem:[#allocation5 + $0xfe8] sm:$0xf0]  ;;  %3594 = vmatmul.bf16.vlgmr.msra.gmra.mxu3 %v8010_v20 }
 0x178   :  { %v7460_v37 = vld [vmem:[#allocation5 + $0x98c] sm:$0xf]  ;;  %v6850_v24 = vor.u32 %v7660_v31, %v6847_v32  ;;  %3625 = vmatpush.bf16.msrb.mxu2 %v6594_v36  ;;  %v3362_v31 = vadd.f32 %v3361_v23, %v3349_v21  ;;  %v5317_v21 = vld [vmem:[#allocation5 + $0x3d0] sm:$0xf] }
 0x179   :  { %v6047_v39 = vld [vmem:[#allocation5 + $0x9a8] sm:$0xf0] }
 0x17a   :  { %v7524_v40 = vld [vmem:[#allocation5 + $0xb8c] sm:$0xf]  ;;  %v6050_v49 = vor.u32 %v7460_v37, %v6047_v39  ;;  %3638 = vmatpush.bf16.msrb.mxu3 %v6850_v24  ;;  %v3374_v39 = vpop.f32.mrf.mxu2 }
 0x17b   :  { %v6303_v43 = vld [vmem:[#allocation5 + $0xba8] sm:$0xf0] }
 0x17c   :  { %v7588_v45 = vld [vmem:[#allocation5 + $0xd8c] sm:$0xf]  ;;  %v6306_v50 = vor.u32 %v7524_v40, %v6303_v43  ;;  %3600 = vmatpush.bf16.msrb.mxu0 %v6050_v49 }
 0x17d   :  { %v6559_v46 = vld [vmem:[#allocation5 + $0xda8] sm:$0xf0] }
 0x17e   :  { %v7652_v47 = vld [vmem:[#allocation5 + $0xf8c] sm:$0xf]  ;;  %v6562_v51 = vor.u32 %v7588_v45, %v6559_v46  ;;  %3613 = vmatpush.bf16.msrb.mxu1 %v6306_v50  ;;  %v3375_v46 = vadd.f32 %v3374_v39, %v3362_v31  ;;  %v7409_v31 = vld [vmem:[#allocation5 + $0x7ec] sm:$0xf0] }
 0x17f   :  { %v6815_v48 = vld [vmem:[#allocation5 + $0xfa8] sm:$0xf0]  ;;  %v5285_v39 = vld [vmem:[#allocation5 + $0x390] sm:$0xf] }
 0x180   :  { %v7452_v53 = vld [vmem:[#allocation5 + $0x94c] sm:$0xf]  ;;  %v6818_v56 = vor.u32 %v7652_v47, %v6815_v48  ;;  %3626 = vmatpush.bf16.msrb.mxu2 %v6562_v51  ;;  %v3387_v47 = vpop.f32.mrf.mxu3 }
 0x181   :  { %v6015_v54 = vld [vmem:[#allocation5 + $0x968] sm:$0xf0]  ;;  %v8059_v51 = vadd.f32 %v3387_v47, %v3375_v46  ;;  %v5797_v46 = vld [vmem:[#allocation5 + $0x790] sm:$0xf] }
 0x182   :  { %v7516_v55 = vld [vmem:[#allocation5 + $0xb4c] sm:$0xf]  ;;  %v6018_v62 = vor.u32 %v7452_v53, %v6015_v54  ;;  %3639 = vmatpush.bf16.msrb.mxu3 %v6818_v56  ;;  %v3350_v53 = vpop.f32.mrf.mxu0  ;;  %v7401_v47 = vld [vmem:[#allocation5 + $0x7ac] sm:$0xf0] }
 0x183   :  { %v6271_v57 = vld [vmem:[#allocation5 + $0xb68] sm:$0xf0]  ;;  %v4997_v53 = vld [vmem:[#allocation5 + $0x150] sm:$0xf] }
 0x184   :  { %v7580_v58 = vld [vmem:[#allocation5 + $0xd4c] sm:$0xf]  ;;  %v6274_v0 = vor.u32 %v7516_v55, %v6271_v57  ;;  %3601 = vmatpush.bf16.msrb.mxu0 %v6018_v62 }
 0x185   :  { %v6527_v59 = vld [vmem:[#allocation5 + $0xd68] sm:$0xf0] }
 0x186   :  { %v7644_v60 = vld [vmem:[#allocation5 + $0xf4c] sm:$0xf]  ;;  %v6530_v1 = vor.u32 %v7580_v58, %v6527_v59  ;;  %3614 = vmatpush.bf16.msrb.mxu1 %v6274_v0  ;;  %v3363_v59 = vpop.f32.mrf.mxu1 }
 0x187   :  { %v6783_v61 = vld [vmem:[#allocation5 + $0xf68] sm:$0xf0]  ;;  %v7329_v59 = vld [vmem:[#allocation5 + $0x56c] sm:$0xf0] }
 0x188   :  { %v7444_v63 = vld [vmem:[#allocation5 + $0x90c] sm:$0xf]  ;;  %v6786_v5 = vor.u32 %v7644_v60, %v6783_v61  ;;  %3627 = vmatpush.bf16.msrb.mxu2 %v6530_v1 }
 0x189   :  { %v5983_v2 = vld [vmem:[#allocation5 + $0x928] sm:$0xf0] }
 0x18a   :  { %v7508_v3 = vld [vmem:[#allocation5 + $0xb0c] sm:$0xf]  ;;  %v5986_v11 = vor.u32 %v7444_v63, %v5983_v2  ;;  %3640 = vmatpush.bf16.msrb.mxu3 %v6786_v5 }
 0x18b   :  { %v6239_v6 = vld [vmem:[#allocation5 + $0xb28] sm:$0xf0] }
 0x18c   :  { %v7572_v7 = vld [vmem:[#allocation5 + $0xd0c] sm:$0xf]  ;;  %v6242_v13 = vor.u32 %v7508_v3, %v6239_v6  ;;  %3602 = vmatpush.bf16.msrb.mxu0 %v5986_v11 }
 0x18d   :  { %v6495_v8 = vld [vmem:[#allocation5 + $0xd28] sm:$0xf0] }
 0x18e   :  { %v7636_v9 = vld [vmem:[#allocation5 + $0xf0c] sm:$0xf]  ;;  %v6498_v14 = vor.u32 %v7572_v7, %v6495_v8  ;;  %3615 = vmatpush.bf16.msrb.mxu1 %v6242_v13 }
 0x18f   :  { %v6751_v10 = vld [vmem:[#allocation5 + $0xf28] sm:$0xf0] }
 0x190   :  { %v7436_v15 = vld [vmem:[#allocation5 + $0x8cc] sm:$0xf]  ;;  %v6754_v26 = vor.u32 %v7636_v9, %v6751_v10  ;;  %3628 = vmatpush.bf16.msrb.mxu2 %v6498_v14  ;;  %v3376_v10 = vpop.f32.mrf.mxu2 }
 0x191   :  { %v5951_v16 = vld [vmem:[#allocation5 + $0x8e8] sm:$0xf0] }
 0x192   :  { %v7500_v17 = vld [vmem:[#allocation5 + $0xacc] sm:$0xf]  ;;  %v5954_v32 = vor.u32 %v7436_v15, %v5951_v16  ;;  %3641 = vmatpush.bf16.msrb.mxu3 %v6754_v26  ;;  %v3389_v15 = vpop.f32.mrf.mxu3  ;;  %v5061_v16 = vld [vmem:[#allocation5 + $0x1d0] sm:$0xf] }
 0x193   :  { %v6207_v25 = vld [vmem:[#allocation5 + $0xae8] sm:$0xf0]  ;;  %v7281_v26 = vld [vmem:[#allocation5 + $0x3ec] sm:$0xf0] }
 0x194   :  { %v7564_v27 = vld [vmem:[#allocation5 + $0xccc] sm:$0xf]  ;;  %v6210_v33 = vor.u32 %v7500_v17, %v6207_v25  ;;  %3603 = vmatpush.bf16.msrb.mxu0 %v5954_v32  ;;  %v7217_v17 = vld [vmem:[#allocation5 + $0x1ec] sm:$0xf0] }
 0x195   :  { %v6463_v28 = vld [vmem:[#allocation5 + $0xce8] sm:$0xf0]  ;;  %v5573_v25 = vld [vmem:[#allocation5 + $0x5d0] sm:$0xf] }
 0x196   :  { %v7628_v29 = vld [vmem:[#allocation5 + $0xecc] sm:$0xf]  ;;  %v6466_v34 = vor.u32 %v7564_v27, %v6463_v28  ;;  %3616 = vmatpush.bf16.msrb.mxu1 %v6210_v33  ;;  %v7345_v27 = vld [vmem:[#allocation5 + $0x5ec] sm:$0xf0]  ;;  %v5062_v33 = vor.u32 %v7217_v17, %v5061_v16 }
 0x197   :  { %v6719_v30 = vld [vmem:[#allocation5 + $0xee8] sm:$0xf0]  ;;  %v7185_v15 = vld [vmem:[#allocation5 + $0xec] sm:$0xf0] }
 0x198   :  { %v7428_v35 = vld [vmem:[#allocation5 + $0x88c] sm:$0xf]  ;;  %v6722_v40 = vor.u32 %v7628_v29, %v6719_v30  ;;  %3629 = vmatpush.bf16.msrb.mxu2 %v6466_v34  ;;  %v5829_v30 = vld [vmem:[#allocation5 + $0x7d0] sm:$0xf]  ;;  %v5318_v34 = vor.u32 %v7281_v26, %v5317_v21  ;;  %v3413_v21 = vpop.f32.mrf.mxu1 }
 0x199   :  { %v5919_v36 = vld [vmem:[#allocation5 + $0x8a8] sm:$0xf0]  ;;  %v5189_v16 = vld [vmem:[#allocation5 + $0x2d0] sm:$0xf] }
 0x19a   :  { %v7492_v37 = vld [vmem:[#allocation5 + $0xa8c] sm:$0xf]  ;;  %v5922_v50 = vor.u32 %v7428_v35, %v5919_v36  ;;  %3642 = vmatpush.bf16.msrb.mxu3 %v6722_v40  ;;  %v5574_v35 = vor.u32 %v7345_v27, %v5573_v25  ;;  %v5029_v36 = vld [vmem:[#allocation5 + $0x190] sm:$0xf]  ;;  %v5830_v40 = vor.u32 %v7409_v31, %v5829_v30 }
 0x19b   :  { %v6175_v24 = vld [vmem:[#allocation5 + $0xaa8] sm:$0xf0]  ;;  %v7249_v26 = vld [vmem:[#allocation5 + $0x2ec] sm:$0xf0] }
 0x19c   :  { %v7556_v43 = vld [vmem:[#allocation5 + $0xc8c] sm:$0xf]  ;;  %v6178_v54 = vor.u32 %v7492_v37, %v6175_v24  ;;  %3604 = vmatpush.bf16.msrb.mxu0 %v5922_v50  ;;  %v7209_v37 = vld [vmem:[#allocation5 + $0x1ac] sm:$0xf0] }
 0x19d   :  { %v6431_v45 = vld [vmem:[#allocation5 + $0xca8] sm:$0xf0]  ;;  %v7273_v24 = vld [vmem:[#allocation5 + $0x3ac] sm:$0xf0] }
 0x19e   :  { %v7620_v48 = vld [vmem:[#allocation5 + $0xe8c] sm:$0xf]  ;;  %v6434_v55 = vor.u32 %v7556_v43, %v6431_v45  ;;  %3617 = vmatpush.bf16.msrb.mxu1 %v6178_v54  ;;  %v5541_v43 = vld [vmem:[#allocation5 + $0x590] sm:$0xf] }
 0x19f   :  { %v6687_v49 = vld [vmem:[#allocation5 + $0xea8] sm:$0xf0]  ;;  %v7337_v45 = vld [vmem:[#allocation5 + $0x5ac] sm:$0xf0] }
 0x1a0   :  { %v7420_v56 = vld [vmem:[#allocation5 + $0x84c] sm:$0xf]  ;;  %v6690_v60 = vor.u32 %v7620_v48, %v6687_v49  ;;  %3630 = vmatpush.bf16.msrb.mxu2 %v6434_v55  ;;  %v5030_v48 = vor.u32 %v7209_v37, %v5029_v36  ;;  %v5286_v49 = vor.u32 %v7273_v24, %v5285_v39  ;;  %v5542_v50 = vor.u32 %v7337_v45, %v5541_v43  ;;  %v7201_v54 = vld [vmem:[#allocation5 + $0x16c] sm:$0xf0]  ;;  %v3426_v37 = vpop.f32.mrf.mxu2  ;;  %v3439_v45 = vpop.f32.mrf.mxu3 }
 0x1a1   :  { %v5887_v57 = vld [vmem:[#allocation5 + $0x868] sm:$0xf0]  ;;  %v5253_v55 = vld [vmem:[#allocation5 + $0x350] sm:$0xf] }
 0x1a2   :  { %v7484_v58 = vld [vmem:[#allocation5 + $0xa4c] sm:$0xf]  ;;  %v5890_v2 = vor.u32 %v7420_v56, %v5887_v57  ;;  %3643 = vmatpush.bf16.msrb.mxu3 %v6690_v60  ;;  %v5798_v56 = vor.u32 %v7401_v47, %v5797_v46  ;;  %v7265_v57 = vld [vmem:[#allocation5 + $0x36c] sm:$0xf0] }
 0x1a3   :  { %v6143_v61 = vld [vmem:[#allocation5 + $0xa68] sm:$0xf0]  ;;  %v5765_v60 = vld [vmem:[#allocation5 + $0x750] sm:$0xf] }
 0x1a4   :  { %v7548_v62 = vld [vmem:[#allocation5 + $0xc4c] sm:$0xf]  ;;  %v6146_v5 = vor.u32 %v7484_v58, %v6143_v61  ;;  %3605 = vmatpush.bf16.msrb.mxu0 %v5890_v2  ;;  %v5509_v58 = vld [vmem:[#allocation5 + $0x550] sm:$0xf] }
 0x1a5   :  { %v6399_v63 = vld [vmem:[#allocation5 + $0xc68] sm:$0xf0]  ;;  %v7393_v61 = vld [vmem:[#allocation5 + $0x76c] sm:$0xf0] }
 0x1a6   :  { %v7612_v0 = vld [vmem:[#allocation5 + $0xe4c] sm:$0xf]  ;;  %v6402_v6 = vor.u32 %v7548_v62, %v6399_v63  ;;  %3618 = vmatpush.bf16.msrb.mxu1 %v6146_v5  ;;  %v4998_v62 = vor.u32 %v7201_v54, %v4997_v53  ;;  %v5254_v63 = vor.u32 %v7265_v57, %v5253_v55  ;;  %v7193_v2 = vld [vmem:[#allocation5 + $0x12c] sm:$0xf0] }
 0x1a7   :  { %v6655_v1 = vld [vmem:[#allocation5 + $0xe68] sm:$0xf0]  ;;  %v7257_v5 = vld [vmem:[#allocation5 + $0x32c] sm:$0xf0] }
 0x1a8   :  { %v7412_v3 = vld [vmem:[#allocation5 + $0x80c] sm:$0xf]  ;;  %v6658_v11 = vor.u32 %v7612_v0, %v6655_v1  ;;  %3631 = vmatpush.bf16.msrb.mxu2 %v6402_v6  ;;  %v5510_v0 = vor.u32 %v7329_v59, %v5509_v58  ;;  %v4965_v1 = vld [vmem:[#allocation5 + $0x110] sm:$0xf]  ;;  %v3415_v58 = vpop.f32.mrf.mxu1 }
 0x1a9   :  { %v5855_v4 = vld [vmem:[#allocation5 + $0x828] sm:$0xf0]  ;;  %v5477_v6 = vld [vmem:[#allocation5 + $0x510] sm:$0xf]  ;;  %v4966_v10 = vor.u32 %v7193_v2, %v4965_v1 }
 0x1aa   :  { %v7476_v7 = vld [vmem:[#allocation5 + $0xa0c] sm:$0xf]  ;;  %v5858_v23 = vor.u32 %v7412_v3, %v5855_v4  ;;  %3644 = vmatpush.bf16.msrb.mxu3 %v6658_v11  ;;  %v5221_v3 = vld [vmem:[#allocation5 + $0x310] sm:$0xf]  ;;  %v5766_v4 = vor.u32 %v7393_v61, %v5765_v60  ;;  %v3400_v11 = vpop.f32.mrf.mxu0 }
 0x1ab   :  { %v6111_v8 = vld [vmem:[#allocation5 + $0xa28] sm:$0xf0]  ;;  %v3401_v17 = vadd.f32 %v3400_v11, %v8059_v51  ;;  %v5445_v25 = vld [vmem:[#allocation5 + $0x4d0] sm:$0xf] }
 0x1ac   :  { %v7540_v9 = vld [vmem:[#allocation5 + $0xc0c] sm:$0xf]  ;;  %v6114_v28 = vor.u32 %v7476_v7, %v6111_v8  ;;  %3606 = vmatpush.bf16.msrb.mxu0 %v5858_v23  ;;  %v7321_v7 = vld [vmem:[#allocation5 + $0x52c] sm:$0xf0] }
 0x1ad   :  { %v6367_v12 = vld [vmem:[#allocation5 + $0xc28] sm:$0xf0]  ;;  %v5733_v8 = vld [vmem:[#allocation5 + $0x710] sm:$0xf]  ;;  %v3414_v30 = vadd.f32 %v3413_v21, %v3401_v17 }
 0x1ae   :  { %v7604_v13 = vld [vmem:[#allocation5 + $0xe0c] sm:$0xf]  ;;  %v6370_v29 = vor.u32 %v7540_v9, %v6367_v12  ;;  %3619 = vmatpush.bf16.msrb.mxu1 %v6114_v28  ;;  %v7385_v9 = vld [vmem:[#allocation5 + $0x72c] sm:$0xf0]  ;;  %v5222_v12 = vor.u32 %v7257_v5, %v5221_v3 }
 0x1af   :  { %v6623_v14 = vld [vmem:[#allocation5 + $0xe28] sm:$0xf0]  ;;  %3607 = vmatmul.bf16.vlgmr.msrb.gmra.mxu0 %v8020_v41  ;;  %v5734_v23 = vor.u32 %v7385_v9, %v5733_v8  ;;  %v7313_v27 = vld [vmem:[#allocation5 + $0x4ec] sm:$0xf0]  ;;  %v3427_v43 = vadd.f32 %v3426_v37, %v3414_v30  ;;  %v3428_v9 = vpop.f32.mrf.mxu2 }
 0x1b0   :  { %v6626_v32 = vor.u32 %v7604_v13, %v6623_v14  ;;  %3632 = vmatpush.bf16.msrb.mxu2 %v6370_v29  ;;  %3651 = vmatpush.bf16.msra.mxu0 %v5062_v33  ;;  %v5478_v13 = vor.u32 %v7321_v7, %v5477_v6  ;;  %v4933_v14 = vld [vmem:[#allocation5 + $0xd0] sm:$0xf]  ;;  %v5446_v33 = vor.u32 %v7313_v27, %v5445_v25 }
 0x1b1   :  { %3620 = vmatmul.bf16.vlgmr.msrb.gmra.mxu1 %v8024_v44  ;;  %v5701_v28 = vld [vmem:[#allocation5 + $0x6d0] sm:$0xf]  ;;  %v4934_v31 = vor.u32 %v7185_v15, %v4933_v14  ;;  %v3441_v14 = vpop.f32.mrf.mxu3 }
 0x1b2   :  { %3645 = vmatpush.bf16.msrb.mxu3 %v6626_v32  ;;  %3664 = vmatpush.bf16.msra.mxu1 %v5318_v34  ;;  %v7377_v29 = vld [vmem:[#allocation5 + $0x6ec] sm:$0xf0]  ;;  %v5190_v32 = vor.u32 %v7249_v26, %v5189_v16 }
 0x1b3   :  { %3633 = vmatmul.bf16.vlgmr.msrb.gmra.mxu2 %v8018_v38  ;;  %v4901_v34 = vld [vmem:[#allocation5 + $0x90] sm:$0xf]  ;;  %v5702_v51 = vor.u32 %v7377_v29, %v5701_v28 }
 0x1b4   :  { %3677 = vmatpush.bf16.msra.mxu2 %v5574_v35  ;;  %3652 = vmatpush.bf16.msra.mxu0 %v5030_v48  ;;  %v7177_v35 = vld [vmem:[#allocation5 + $0xac] sm:$0xf0] }
 0x1b5   :  { %3646 = vmatmul.bf16.vlgmr.msrb.gmra.mxu3 %v8022_v42  ;;  %v5157_v36 = vld [vmem:[#allocation5 + $0x290] sm:$0xf]  ;;  %v4902_v48 = vor.u32 %v7177_v35, %v4901_v34 }
 0x1b6   :  { %3690 = vmatpush.bf16.msra.mxu3 %v5830_v40  ;;  %3665 = vmatpush.bf16.msra.mxu1 %v5286_v49  ;;  %v7241_v39 = vld [vmem:[#allocation5 + $0x2ac] sm:$0xf0]  ;;  %v8066_v49 = vadd.f32 %v3439_v45, %v3427_v43 }
 0x1b7   :  { %v5413_v40 = vld [vmem:[#allocation5 + $0x490] sm:$0xf]  ;;  %v5158_v53 = vor.u32 %v7241_v39, %v5157_v36 }
 0x1b8   :  { %3678 = vmatpush.bf16.msra.mxu2 %v5542_v50  ;;  %3653 = vmatpush.bf16.msra.mxu0 %v4998_v62  ;;  %v7305_v24 = vld [vmem:[#allocation5 + $0x4ac] sm:$0xf0]  ;;  %v3402_v50 = vpop.f32.mrf.mxu0 }
 0x1b9   :  { %v5669_v46 = vld [vmem:[#allocation5 + $0x690] sm:$0xf]  ;;  %v5414_v54 = vor.u32 %v7305_v24, %v5413_v40 }
 0x1ba   :  { %3691 = vmatpush.bf16.msra.mxu3 %v5798_v56  ;;  %3666 = vmatpush.bf16.msra.mxu1 %v5254_v63  ;;  %v7369_v47 = vld [vmem:[#allocation5 + $0x6ac] sm:$0xf0] }
 0x1bb   :  { %v4869_v55 = vld [vmem:[#allocation5 + $0x50] sm:$0xf]  ;;  %v5670_v59 = vor.u32 %v7369_v47, %v5669_v46 }
 0x1bc   :  { %3679 = vmatpush.bf16.msra.mxu2 %v5510_v0  ;;  %3654 = vmatpush.bf16.msra.mxu0 %v4966_v10  ;;  %v7169_v56 = vld [vmem:[#allocation5 + $0x6c] sm:$0xf0] }
 0x1bd   :  { %v5125_v57 = vld [vmem:[#allocation5 + $0x250] sm:$0xf]  ;;  %v4870_v1 = vor.u32 %v7169_v56, %v4869_v55 }
 0x1be   :  { %3692 = vmatpush.bf16.msra.mxu3 %v5766_v4  ;;  %3667 = vmatpush.bf16.msra.mxu1 %v5222_v12  ;;  %v7233_v60 = vld [vmem:[#allocation5 + $0x26c] sm:$0xf0] }
 0x1bf   :  { %v5381_v61 = vld [vmem:[#allocation5 + $0x450] sm:$0xf]  ;;  %v5126_v4 = vor.u32 %v7233_v60, %v5125_v57 }
 0x1c0   :  { %3680 = vmatpush.bf16.msra.mxu2 %v5478_v13  ;;  %3655 = vmatpush.bf16.msra.mxu0 %v4934_v31  ;;  %v7297_v62 = vld [vmem:[#allocation5 + $0x46c] sm:$0xf0] }
 0x1c1   :  { %v5637_v63 = vld [vmem:[#allocation5 + $0x650] sm:$0xf]  ;;  %v5382_v5 = vor.u32 %v7297_v62, %v5381_v61 }
 0x1c2   :  { %3693 = vmatpush.bf16.msra.mxu3 %v5734_v23  ;;  %3668 = vmatpush.bf16.msra.mxu1 %v5190_v32  ;;  %v7361_v0 = vld [vmem:[#allocation5 + $0x66c] sm:$0xf0] }
 0x1c3   :  { %v4837_v2 = vld [vmem:[#allocation5 + $0x10] sm:$0xf]  ;;  %v5638_v10 = vor.u32 %v7361_v0, %v5637_v63 }
 0x1c4   :  { %3681 = vmatpush.bf16.msra.mxu2 %v5446_v33  ;;  %3656 = vmatpush.bf16.msra.mxu0 %v4902_v48  ;;  %v7161_v3 = vld [vmem:[#allocation5 + $0x2c] sm:$0xf0] }
 0x1c5   :  { %v5093_v6 = vld [vmem:[#allocation5 + $0x210] sm:$0xf]  ;;  %v4838_v21 = vor.u32 %v7161_v3, %v4837_v2  ;;  %v8072_v3 = vld [vmem:[#allocation7] sm:$0xff] }
 0x1c6   :  { %3694 = vmatpush.bf16.msra.mxu3 %v5702_v51  ;;  %3669 = vmatpush.bf16.msra.mxu1 %v5158_v53  ;;  %v7225_v7 = vld [vmem:[#allocation5 + $0x22c] sm:$0xf0] }
 0x1c7   :  { %v5349_v8 = vld [vmem:[#allocation5 + $0x410] sm:$0xf]  ;;  %v5094_v27 = vor.u32 %v7225_v7, %v5093_v6 }
 0x1c8   :  { %3682 = vmatpush.bf16.msra.mxu2 %v5414_v54  ;;  %v7289_v11 = vld [vmem:[#allocation5 + $0x42c] sm:$0xf0]  ;;  %3657 = vmatpush.bf16.msra.mxu0 %v4870_v1 }
 0x1c9   :  { %v5605_v12 = vld [vmem:[#allocation5 + $0x610] sm:$0xf]  ;;  %v5350_v28 = vor.u32 %v7289_v11, %v5349_v8 }
 0x1ca   :  { %3695 = vmatpush.bf16.msra.mxu3 %v5670_v59  ;;  %v7353_v13 = vld [vmem:[#allocation5 + $0x62c] sm:$0xf0]  ;;  %3670 = vmatpush.bf16.msra.mxu1 %v5126_v4  ;;  %v633_v4 = vperm.slane %v8072_v3, 2 }
 0x1cb   :  { %v6085_v15 = vld [vmem:[#allocation5 + $0x9d0] sm:$0xf]  ;;  %v5606_v31 = vor.u32 %v7353_v13, %v5605_v12  ;;  %v3452_v12 = vpop.f32.mrf.mxu0 }
 0x1cc   :  { %v7473_v16 = vld [vmem:[#allocation5 + $0x9ec] sm:$0xf0]  ;;  %3683 = vmatpush.bf16.msra.mxu2 %v5382_v5  ;;  %3658 = vmatpush.bf16.msra.mxu0 %v4838_v21  ;;  %v3453_v21 = vadd.f32 %v3452_v12, %v633_v4 }
 0x1cd   :  { %v6341_v17 = vld [vmem:[#allocation5 + $0xbd0] sm:$0xf]  ;;  %v6086_v32 = vor.u32 %v7473_v16, %v6085_v15 }
 0x1ce   :  { %v7537_v23 = vld [vmem:[#allocation5 + $0xbec] sm:$0xf0]  ;;  %3696 = vmatpush.bf16.msra.mxu3 %v5638_v10  ;;  %3671 = vmatpush.bf16.msra.mxu1 %v5094_v27 }
 0x1cf   :  { %v6597_v26 = vld [vmem:[#allocation5 + $0xdd0] sm:$0xf]  ;;  %v6342_v33 = vor.u32 %v7537_v23, %v6341_v17  ;;  %3659 = vmatmul.bf16.vlgmr.msra.gmra.mxu0 %v8008_v19  ;;  %v3465_v23 = vpop.f32.mrf.mxu1 }
 0x1d0   :  { %v7601_v25 = vld [vmem:[#allocation5 + $0xdec] sm:$0xf0]  ;;  %3684 = vmatpush.bf16.msra.mxu2 %v5350_v28  ;;  %3703 = vmatpush.bf16.msrb.mxu0 %v6086_v32 }
 0x1d1   :  { %v6853_v29 = vld [vmem:[#allocation5 + $0xfd0] sm:$0xf]  ;;  %v6598_v34 = vor.u32 %v7601_v25, %v6597_v26  ;;  %3672 = vmatmul.bf16.vlgmr.msra.gmra.mxu1 %v8012_v22 }
 0x1d2   :  { %v7665_v30 = vld [vmem:[#allocation5 + $0xfec] sm:$0xf0]  ;;  %3697 = vmatpush.bf16.msra.mxu3 %v5606_v31  ;;  %3716 = vmatpush.bf16.msrb.mxu1 %v6342_v33  ;;  %v3466_v31 = vadd.f32 %v3465_v23, %v3453_v21  ;;  %v7213_v21 = vld [vmem:[#allocation5 + $0x1d4] sm:$0xf] }
 0x1d3   :  { %v6053_v35 = vld [vmem:[#allocation5 + $0x990] sm:$0xf]  ;;  %v6854_v51 = vor.u32 %v7665_v30, %v6853_v29  ;;  %3685 = vmatmul.bf16.vlgmr.msra.gmra.mxu2 %v8006_v18  ;;  %v5063_v23 = vld [vmem:[#allocation5 + $0x1f0] sm:$0xf0] }
 0x1d4   :  { %v7465_v36 = vld [vmem:[#allocation5 + $0x9ac] sm:$0xf0]  ;;  %3729 = vmatpush.bf16.msrb.mxu2 %v6598_v34 }
 0x1d5   :  { %v6309_v37 = vld [vmem:[#allocation5 + $0xb90] sm:$0xf]  ;;  %v6054_v46 = vor.u32 %v7465_v36, %v6053_v35  ;;  %3698 = vmatmul.bf16.vlgmr.msra.gmra.mxu3 %v8010_v20 }
 0x1d6   :  { %v7529_v39 = vld [vmem:[#allocation5 + $0xbac] sm:$0xf0]  ;;  %3742 = vmatpush.bf16.msrb.mxu3 %v6854_v51  ;;  %v3478_v51 = vpop.f32.mrf.mxu2 }
 0x1d7   :  { %v6565_v40 = vld [vmem:[#allocation5 + $0xd90] sm:$0xf]  ;;  %v6310_v47 = vor.u32 %v7529_v39, %v6309_v37  ;;  %3704 = vmatpush.bf16.msrb.mxu0 %v6054_v46  ;;  %v3491_v46 = vpop.f32.mrf.mxu3 }
 0x1d8   :  { %v7593_v24 = vld [vmem:[#allocation5 + $0xdac] sm:$0xf0] }
 0x1d9   :  { %v6821_v43 = vld [vmem:[#allocation5 + $0xf90] sm:$0xf]  ;;  %v6566_v48 = vor.u32 %v7593_v24, %v6565_v40  ;;  %3717 = vmatpush.bf16.msrb.mxu1 %v6310_v47 }
 0x1da   :  { %v7657_v45 = vld [vmem:[#allocation5 + $0xfac] sm:$0xf0] }
 0x1db   :  { %v6021_v50 = vld [vmem:[#allocation5 + $0x950] sm:$0xf]  ;;  %v6822_v55 = vor.u32 %v7657_v45, %v6821_v43  ;;  %3730 = vmatpush.bf16.msrb.mxu2 %v6566_v48  ;;  %v3479_v45 = vadd.f32 %v3478_v51, %v3466_v31  ;;  %v7205_v51 = vld [vmem:[#allocation5 + $0x194] sm:$0xf] }
 0x1dc   :  { %v7457_v53 = vld [vmem:[#allocation5 + $0x96c] sm:$0xf0] }
 0x1dd   :  { %v6277_v54 = vld [vmem:[#allocation5 + $0xb50] sm:$0xf]  ;;  %v6022_v61 = vor.u32 %v7457_v53, %v6021_v50  ;;  %3743 = vmatpush.bf16.msrb.mxu3 %v6822_v55  ;;  %v8075_v53 = vadd.f32 %v3491_v46, %v3479_v45  ;;  %v7333_v45 = vld [vmem:[#allocation5 + $0x594] sm:$0xf] }
 0x1de   :  { %v7521_v56 = vld [vmem:[#allocation5 + $0xb6c] sm:$0xf0]  ;;  %v3480_v12 = vpop.f32.mrf.mxu2  ;;  %v5543_v46 = vld [vmem:[#allocation5 + $0x5b0] sm:$0xf0] }
 0x1df   :  { %v6533_v57 = vld [vmem:[#allocation5 + $0xd50] sm:$0xf]  ;;  %v6278_v63 = vor.u32 %v7521_v56, %v6277_v54  ;;  %3705 = vmatpush.bf16.msrb.mxu0 %v6022_v61  ;;  %v3454_v54 = vpop.f32.mrf.mxu0  ;;  %v7381_v12 = vld [vmem:[#allocation5 + $0x714] sm:$0xf] }
 0x1e0   :  { %v7585_v58 = vld [vmem:[#allocation5 + $0xd6c] sm:$0xf0] }
 0x1e1   :  { %v6789_v59 = vld [vmem:[#allocation5 + $0xf50] sm:$0xf]  ;;  %v6534_v0 = vor.u32 %v7585_v58, %v6533_v57  ;;  %3718 = vmatpush.bf16.msrb.mxu1 %v6278_v63 }
 0x1e2   :  { %v7649_v60 = vld [vmem:[#allocation5 + $0xf6c] sm:$0xf0] }
 0x1e3   :  { %v5989_v62 = vld [vmem:[#allocation5 + $0x910] sm:$0xf]  ;;  %v6790_v5 = vor.u32 %v7649_v60, %v6789_v59  ;;  %3731 = vmatpush.bf16.msrb.mxu2 %v6534_v0  ;;  %v3467_v60 = vpop.f32.mrf.mxu1 }
 0x1e4   :  { %v7449_v1 = vld [vmem:[#allocation5 + $0x92c] sm:$0xf0]  ;;  %v5255_v60 = vld [vmem:[#allocation5 + $0x370] sm:$0xf0] }
 0x1e5   :  { %v6245_v2 = vld [vmem:[#allocation5 + $0xb10] sm:$0xf]  ;;  %v5990_v11 = vor.u32 %v7449_v1, %v5989_v62  ;;  %3744 = vmatpush.bf16.msrb.mxu3 %v6790_v5 }
 0x1e6   :  { %v7513_v6 = vld [vmem:[#allocation5 + $0xb2c] sm:$0xf0] }
 0x1e7   :  { %v6501_v7 = vld [vmem:[#allocation5 + $0xd10] sm:$0xf]  ;;  %v6246_v13 = vor.u32 %v7513_v6, %v6245_v2  ;;  %3706 = vmatpush.bf16.msrb.mxu0 %v5990_v11 }
 0x1e8   :  { %v7577_v8 = vld [vmem:[#allocation5 + $0xd2c] sm:$0xf0] }
 0x1e9   :  { %v6757_v9 = vld [vmem:[#allocation5 + $0xf10] sm:$0xf]  ;;  %v6502_v14 = vor.u32 %v7577_v8, %v6501_v7  ;;  %3719 = vmatpush.bf16.msrb.mxu1 %v6246_v13 }
 0x1ea   :  { %v7641_v10 = vld [vmem:[#allocation5 + $0xf2c] sm:$0xf0] }
 0x1eb   :  { %v5957_v15 = vld [vmem:[#allocation5 + $0x8d0] sm:$0xf]  ;;  %v6758_v26 = vor.u32 %v7641_v10, %v6757_v9  ;;  %3732 = vmatpush.bf16.msrb.mxu2 %v6502_v14 }
 0x1ec   :  { %v7441_v16 = vld [vmem:[#allocation5 + $0x8ec] sm:$0xf0] }
 0x1ed   :  { %v6213_v17 = vld [vmem:[#allocation5 + $0xad0] sm:$0xf]  ;;  %v5958_v32 = vor.u32 %v7441_v16, %v5957_v15  ;;  %3745 = vmatpush.bf16.msrb.mxu3 %v6758_v26  ;;  %v7277_v26 = vld [vmem:[#allocation5 + $0x3d4] sm:$0xf] }
 0x1ee   :  { %v7505_v25 = vld [vmem:[#allocation5 + $0xaec] sm:$0xf0] }
 0x1ef   :  { %v6469_v27 = vld [vmem:[#allocation5 + $0xcd0] sm:$0xf]  ;;  %v6214_v33 = vor.u32 %v7505_v25, %v6213_v17  ;;  %3707 = vmatpush.bf16.msrb.mxu0 %v5958_v32  ;;  %v3493_v17 = vpop.f32.mrf.mxu3  ;;  %v7405_v32 = vld [vmem:[#allocation5 + $0x7d4] sm:$0xf] }
 0x1f0   :  { %v7569_v28 = vld [vmem:[#allocation5 + $0xcec] sm:$0xf0] }
 0x1f1   :  { %v6725_v29 = vld [vmem:[#allocation5 + $0xed0] sm:$0xf]  ;;  %v6470_v34 = vor.u32 %v7569_v28, %v6469_v27  ;;  %3720 = vmatpush.bf16.msrb.mxu1 %v6214_v33  ;;  %v5319_v27 = vld [vmem:[#allocation5 + $0x3f0] sm:$0xf0] }
 0x1f2   :  { %v7633_v30 = vld [vmem:[#allocation5 + $0xeec] sm:$0xf0]  ;;  %v7341_v28 = vld [vmem:[#allocation5 + $0x5d4] sm:$0xf] }
 0x1f3   :  { %v5925_v35 = vld [vmem:[#allocation5 + $0x890] sm:$0xf]  ;;  %v6726_v39 = vor.u32 %v7633_v30, %v6725_v29  ;;  %3733 = vmatpush.bf16.msrb.mxu2 %v6470_v34  ;;  %v5575_v29 = vld [vmem:[#allocation5 + $0x5f0] sm:$0xf0] }
 0x1f4   :  { %v7433_v36 = vld [vmem:[#allocation5 + $0x8ac] sm:$0xf0]  ;;  %v5831_v33 = vld [vmem:[#allocation5 + $0x7f0] sm:$0xf0] }
 0x1f5   :  { %v6181_v37 = vld [vmem:[#allocation5 + $0xa90] sm:$0xf]  ;;  %v5926_v50 = vor.u32 %v7433_v36, %v5925_v35  ;;  %3746 = vmatpush.bf16.msrb.mxu3 %v6726_v39  ;;  %v5066_v35 = vor.u32 %v7213_v21, %v5063_v23  ;;  %v5322_v36 = vor.u32 %v7277_v26, %v5319_v27  ;;  %v5031_v39 = vld [vmem:[#allocation5 + $0x1b0] sm:$0xf0]  ;;  %v3517_v27 = vpop.f32.mrf.mxu1 }
 0x1f6   :  { %v7497_v40 = vld [vmem:[#allocation5 + $0xaac] sm:$0xf0]  ;;  %v7181_v21 = vld [vmem:[#allocation5 + $0xd4] sm:$0xf] }
 0x1f7   :  { %v6437_v24 = vld [vmem:[#allocation5 + $0xc90] sm:$0xf]  ;;  %v6182_v55 = vor.u32 %v7497_v40, %v6181_v37  ;;  %3708 = vmatpush.bf16.msrb.mxu0 %v5926_v50  ;;  %v5578_v37 = vor.u32 %v7341_v28, %v5575_v29  ;;  %v7269_v40 = vld [vmem:[#allocation5 + $0x394] sm:$0xf]  ;;  %v5034_v50 = vor.u32 %v7205_v51, %v5031_v39 }
 0x1f8   :  { %v7561_v43 = vld [vmem:[#allocation5 + $0xcac] sm:$0xf0]  ;;  %v4935_v23 = vld [vmem:[#allocation5 + $0xf0] sm:$0xf0] }
 0x1f9   :  { %v6693_v47 = vld [vmem:[#allocation5 + $0xe90] sm:$0xf]  ;;  %v6438_v56 = vor.u32 %v7561_v43, %v6437_v24  ;;  %3721 = vmatpush.bf16.msrb.mxu1 %v6182_v55  ;;  %v5834_v24 = vor.u32 %v7405_v32, %v5831_v33  ;;  %v5287_v43 = vld [vmem:[#allocation5 + $0x3b0] sm:$0xf0]  ;;  %v5546_v55 = vor.u32 %v7333_v45, %v5543_v46 }
 0x1fa   :  { %v7625_v48 = vld [vmem:[#allocation5 + $0xeac] sm:$0xf0]  ;;  %v5290_v54 = vor.u32 %v7269_v40, %v5287_v43  ;;  %v7245_v26 = vld [vmem:[#allocation5 + $0x2d4] sm:$0xf] }
 0x1fb   :  { %v5893_v57 = vld [vmem:[#allocation5 + $0x850] sm:$0xf]  ;;  %v6694_v61 = vor.u32 %v7625_v48, %v6693_v47  ;;  %3734 = vmatpush.bf16.msrb.mxu2 %v6438_v56  ;;  %v7397_v47 = vld [vmem:[#allocation5 + $0x794] sm:$0xf] }
 0x1fc   :  { %v7425_v58 = vld [vmem:[#allocation5 + $0x86c] sm:$0xf0]  ;;  %v5799_v48 = vld [vmem:[#allocation5 + $0x7b0] sm:$0xf0] }
 0x1fd   :  { %v6149_v59 = vld [vmem:[#allocation5 + $0xa50] sm:$0xf]  ;;  %v5894_v4 = vor.u32 %v7425_v58, %v5893_v57  ;;  %3747 = vmatpush.bf16.msrb.mxu3 %v6694_v61  ;;  %v7197_v56 = vld [vmem:[#allocation5 + $0x154] sm:$0xf] }
 0x1fe   :  { %v7489_v62 = vld [vmem:[#allocation5 + $0xa6c] sm:$0xf0]  ;;  %v4999_v57 = vld [vmem:[#allocation5 + $0x170] sm:$0xf0] }
 0x1ff   :  { %v6405_v63 = vld [vmem:[#allocation5 + $0xc50] sm:$0xf]  ;;  %v6150_v7 = vor.u32 %v7489_v62, %v6149_v59  ;;  %3709 = vmatpush.bf16.msrb.mxu0 %v5894_v4  ;;  %v7261_v58 = vld [vmem:[#allocation5 + $0x354] sm:$0xf]  ;;  %v5802_v59 = vor.u32 %v7397_v47, %v5799_v48  ;;  %v3543_v48 = vpop.f32.mrf.mxu3 }
 0x200   :  { %v7553_v0 = vld [vmem:[#allocation5 + $0xc6c] sm:$0xf0]  ;;  %v7325_v61 = vld [vmem:[#allocation5 + $0x554] sm:$0xf] }
 0x201   :  { %v6661_v1 = vld [vmem:[#allocation5 + $0xe50] sm:$0xf]  ;;  %v6406_v8 = vor.u32 %v7553_v0, %v6405_v63  ;;  %3722 = vmatpush.bf16.msrb.mxu1 %v6150_v7  ;;  %v5511_v62 = vld [vmem:[#allocation5 + $0x570] sm:$0xf0] }
 0x202   :  { %v7617_v2 = vld [vmem:[#allocation5 + $0xe6c] sm:$0xf0]  ;;  %v7389_v63 = vld [vmem:[#allocation5 + $0x754] sm:$0xf]  ;;  %v5514_v4 = vor.u32 %v7325_v61, %v5511_v62 }
 0x203   :  { %v5861_v5 = vld [vmem:[#allocation5 + $0x810] sm:$0xf]  ;;  %v6662_v13 = vor.u32 %v7617_v2, %v6661_v1  ;;  %3735 = vmatpush.bf16.msrb.mxu2 %v6406_v8  ;;  %v5767_v0 = vld [vmem:[#allocation5 + $0x770] sm:$0xf0]  ;;  %v5002_v1 = vor.u32 %v7197_v56, %v4999_v57  ;;  %v5258_v2 = vor.u32 %v7261_v58, %v5255_v60 }
 0x204   :  { %v7417_v6 = vld [vmem:[#allocation5 + $0x82c] sm:$0xf0]  ;;  %v7253_v7 = vld [vmem:[#allocation5 + $0x314] sm:$0xf]  ;;  %v5770_v8 = vor.u32 %v7389_v63, %v5767_v0  ;;  %v3519_v63 = vpop.f32.mrf.mxu1 }
 0x205   :  { %v6117_v9 = vld [vmem:[#allocation5 + $0xa10] sm:$0xf]  ;;  %v5862_v25 = vor.u32 %v7417_v6, %v5861_v5  ;;  %3748 = vmatpush.bf16.msrb.mxu3 %v6662_v13  ;;  %v7189_v5 = vld [vmem:[#allocation5 + $0x114] sm:$0xf] }
 0x206   :  { %v7481_v10 = vld [vmem:[#allocation5 + $0xa2c] sm:$0xf0]  ;;  %v4967_v6 = vld [vmem:[#allocation5 + $0x130] sm:$0xf0] }
 0x207   :  { %v6373_v11 = vld [vmem:[#allocation5 + $0xc10] sm:$0xf]  ;;  %v6118_v30 = vor.u32 %v7481_v10, %v6117_v9  ;;  %3710 = vmatpush.bf16.msrb.mxu0 %v5862_v25  ;;  %v5223_v9 = vld [vmem:[#allocation5 + $0x330] sm:$0xf0] }
 0x208   :  { %v7545_v14 = vld [vmem:[#allocation5 + $0xc2c] sm:$0xf0]  ;;  %v7317_v10 = vld [vmem:[#allocation5 + $0x514] sm:$0xf] }
 0x209   :  { %v6629_v15 = vld [vmem:[#allocation5 + $0xe10] sm:$0xf]  ;;  %v6374_v31 = vor.u32 %v7545_v14, %v6373_v11  ;;  %3723 = vmatpush.bf16.msrb.mxu1 %v6118_v30  ;;  %v5479_v11 = vld [vmem:[#allocation5 + $0x530] sm:$0xf0]  ;;  %v4970_v14 = vor.u32 %v7189_v5, %v4967_v6 }
 0x20a   :  { %v7609_v16 = vld [vmem:[#allocation5 + $0xe2c] sm:$0xf0]  ;;  %3711 = vmatmul.bf16.vlgmr.msrb.gmra.mxu0 %v8020_v41  ;;  %v5735_v13 = vld [vmem:[#allocation5 + $0x730] sm:$0xf0]  ;;  %v5482_v17 = vor.u32 %v7317_v10, %v5479_v11 }
 0x20b   :  { %v6630_v34 = vor.u32 %v7609_v16, %v6629_v15  ;;  %3736 = vmatpush.bf16.msrb.mxu2 %v6374_v31  ;;  %3755 = vmatpush.bf16.msra.mxu0 %v5066_v35  ;;  %v3504_v15 = vpop.f32.mrf.mxu0  ;;  %v5226_v16 = vor.u32 %v7253_v7, %v5223_v9  ;;  %v5738_v28 = vor.u32 %v7381_v12, %v5735_v13  ;;  %v5191_v29 = vld [vmem:[#allocation5 + $0x2f0] sm:$0xf0] }
 0x20c   :  { %3724 = vmatmul.bf16.vlgmr.msrb.gmra.mxu1 %v8024_v44  ;;  %v3505_v25 = vadd.f32 %v3504_v15, %v8075_v53  ;;  %v7309_v30 = vld [vmem:[#allocation5 + $0x4d4] sm:$0xf]  ;;  %v4938_v35 = vor.u32 %v7181_v21, %v4935_v23 }
 0x20d   :  { %3749 = vmatpush.bf16.msrb.mxu3 %v6630_v34  ;;  %3768 = vmatpush.bf16.msra.mxu1 %v5322_v36  ;;  %v5447_v31 = vld [vmem:[#allocation5 + $0x4f0] sm:$0xf0]  ;;  %v5194_v36 = vor.u32 %v7245_v26, %v5191_v29  ;;  %v3545_v26 = vpop.f32.mrf.mxu3 }
 0x20e   :  { %3737 = vmatmul.bf16.vlgmr.msrb.gmra.mxu2 %v8018_v38  ;;  %v7373_v32 = vld [vmem:[#allocation5 + $0x6d4] sm:$0xf]  ;;  %v3518_v34 = vadd.f32 %v3517_v27, %v3505_v25 }
 0x20f   :  { %3781 = vmatpush.bf16.msra.mxu2 %v5578_v37  ;;  %3756 = vmatpush.bf16.msra.mxu0 %v5034_v50  ;;  %v5703_v33 = vld [vmem:[#allocation5 + $0x6f0] sm:$0xf0]  ;;  %v5450_v37 = vor.u32 %v7309_v30, %v5447_v31 }
 0x210   :  { %3750 = vmatmul.bf16.vlgmr.msrb.gmra.mxu3 %v8022_v42  ;;  %v7173_v51 = vld [vmem:[#allocation5 + $0x94] sm:$0xf]  ;;  %v5706_v53 = vor.u32 %v7373_v32, %v5703_v33 }
 0x211   :  { %3794 = vmatpush.bf16.msra.mxu3 %v5834_v24  ;;  %3769 = vmatpush.bf16.msra.mxu1 %v5290_v54  ;;  %v4903_v39 = vld [vmem:[#allocation5 + $0xb0] sm:$0xf0]  ;;  %v3530_v24 = vpop.f32.mrf.mxu2 }
 0x212   :  { %v7237_v40 = vld [vmem:[#allocation5 + $0x294] sm:$0xf]  ;;  %v3531_v47 = vadd.f32 %v3530_v24, %v3518_v34 }
 0x213   :  { %3782 = vmatpush.bf16.msra.mxu2 %v5546_v55  ;;  %3757 = vmatpush.bf16.msra.mxu0 %v5002_v1  ;;  %v5159_v43 = vld [vmem:[#allocation5 + $0x2b0] sm:$0xf0]  ;;  %v4906_v55 = vor.u32 %v7173_v51, %v4903_v39  ;;  %v3506_v57 = vpop.f32.mrf.mxu0 }
 0x214   :  { %v7301_v45 = vld [vmem:[#allocation5 + $0x494] sm:$0xf]  ;;  %v8082_v56 = vadd.f32 %v3543_v48, %v3531_v47  ;;  %v5162_v58 = vor.u32 %v7237_v40, %v5159_v43 }
 0x215   :  { %3795 = vmatpush.bf16.msra.mxu3 %v5802_v59  ;;  %3770 = vmatpush.bf16.msra.mxu1 %v5258_v2  ;;  %v5415_v46 = vld [vmem:[#allocation5 + $0x4b0] sm:$0xf0] }
 0x216   :  { %v7365_v50 = vld [vmem:[#allocation5 + $0x694] sm:$0xf]  ;;  %v5418_v59 = vor.u32 %v7301_v45, %v5415_v46 }
 0x217   :  { %3783 = vmatpush.bf16.msra.mxu2 %v5514_v4  ;;  %3758 = vmatpush.bf16.msra.mxu0 %v4970_v14  ;;  %v5671_v54 = vld [vmem:[#allocation5 + $0x6b0] sm:$0xf0] }
 0x218   :  { %v7165_v60 = vld [vmem:[#allocation5 + $0x54] sm:$0xf]  ;;  %v5674_v0 = vor.u32 %v7365_v50, %v5671_v54 }
 0x219   :  { %3796 = vmatpush.bf16.msra.mxu3 %v5770_v8  ;;  %3771 = vmatpush.bf16.msra.mxu1 %v5226_v16  ;;  %v4871_v61 = vld [vmem:[#allocation5 + $0x70] sm:$0xf0]  ;;  %v3532_v15 = vpop.f32.mrf.mxu2 }
 0x21a   :  { %v7229_v62 = vld [vmem:[#allocation5 + $0x254] sm:$0xf]  ;;  %v4874_v7 = vor.u32 %v7165_v60, %v4871_v61 }
 0x21b   :  { %3784 = vmatpush.bf16.msra.mxu2 %v5482_v17  ;;  %3759 = vmatpush.bf16.msra.mxu0 %v4938_v35  ;;  %v5127_v1 = vld [vmem:[#allocation5 + $0x270] sm:$0xf0] }
 0x21c   :  { %v7293_v2 = vld [vmem:[#allocation5 + $0x454] sm:$0xf]  ;;  %v5130_v10 = vor.u32 %v7229_v62, %v5127_v1 }
 0x21d   :  { %3797 = vmatpush.bf16.msra.mxu3 %v5738_v28  ;;  %3772 = vmatpush.bf16.msra.mxu1 %v5194_v36  ;;  %v5383_v4 = vld [vmem:[#allocation5 + $0x470] sm:$0xf0] }
 0x21e   :  { %v7357_v5 = vld [vmem:[#allocation5 + $0x654] sm:$0xf]  ;;  %v5386_v11 = vor.u32 %v7293_v2, %v5383_v4 }
 0x21f   :  { %3785 = vmatpush.bf16.msra.mxu2 %v5450_v37  ;;  %v5639_v6 = vld [vmem:[#allocation5 + $0x670] sm:$0xf0]  ;;  %3760 = vmatpush.bf16.msra.mxu0 %v4906_v55 }
 0x220   :  { %v7157_v8 = vld [vmem:[#allocation5 + $0x14] sm:$0xf]  ;;  %v5642_v16 = vor.u32 %v7357_v5, %v5639_v6 }
 0x221   :  { %3798 = vmatpush.bf16.msra.mxu3 %v5706_v53  ;;  %v4839_v9 = vld [vmem:[#allocation5 + $0x30] sm:$0xf0]  ;;  %3773 = vmatpush.bf16.msra.mxu1 %v5162_v58 }
 0x222   :  { %v7221_v12 = vld [vmem:[#allocation5 + $0x214] sm:$0xf]  ;;  %v4842_v29 = vor.u32 %v7157_v8, %v4839_v9 }
 0x223   :  { %3786 = vmatpush.bf16.msra.mxu2 %v5418_v59  ;;  %v5095_v13 = vld [vmem:[#allocation5 + $0x230] sm:$0xf0]  ;;  %3761 = vmatpush.bf16.msra.mxu0 %v4874_v7 }
 0x224   :  { %v7285_v14 = vld [vmem:[#allocation5 + $0x414] sm:$0xf]  ;;  %v5098_v33 = vor.u32 %v7221_v12, %v5095_v13 }
 0x225   :  { %3799 = vmatpush.bf16.msra.mxu3 %v5674_v0  ;;  %v5351_v17 = vld [vmem:[#allocation5 + $0x430] sm:$0xf0]  ;;  %3774 = vmatpush.bf16.msra.mxu1 %v5130_v10 }
 0x226   :  { %v7349_v21 = vld [vmem:[#allocation5 + $0x614] sm:$0xf]  ;;  %v5354_v34 = vor.u32 %v7285_v14, %v5351_v17 }
 0x227   :  { %v5607_v23 = vld [vmem:[#allocation5 + $0x630] sm:$0xf0]  ;;  %3787 = vmatpush.bf16.msra.mxu2 %v5386_v11  ;;  %3762 = vmatpush.bf16.msra.mxu0 %v4842_v29  ;;  %v634_v11 = vperm.slane %v8072_v3, 3 }
 0x228   :  { %v7469_v25 = vld [vmem:[#allocation5 + $0x9d4] sm:$0xf]  ;;  %v5610_v37 = vor.u32 %v7349_v21, %v5607_v23  ;;  %v3556_v23 = vpop.f32.mrf.mxu0 }
 0x229   :  { %v6087_v27 = vld [vmem:[#allocation5 + $0x9f0] sm:$0xf0]  ;;  %3800 = vmatpush.bf16.msra.mxu3 %v5642_v16  ;;  %3775 = vmatpush.bf16.msra.mxu1 %v5098_v33 }
 0x22a   :  { %v7533_v28 = vld [vmem:[#allocation5 + $0xbd4] sm:$0xf]  ;;  %v6090_v51 = vor.u32 %v7469_v25, %v6087_v27  ;;  %3763 = vmatmul.bf16.vlgmr.msra.gmra.mxu0 %v8008_v19 }
 0x22b   :  { %v6343_v30 = vld [vmem:[#allocation5 + $0xbf0] sm:$0xf0]  ;;  %3788 = vmatpush.bf16.msra.mxu2 %v5354_v34 }
 0x22c   :  { %v7597_v31 = vld [vmem:[#allocation5 + $0xdd4] sm:$0xf]  ;;  %v6346_v39 = vor.u32 %v7533_v28, %v6343_v30  ;;  %3807 = vmatpush.bf16.msrb.mxu0 %v6090_v51  ;;  %3776 = vmatmul.bf16.vlgmr.msra.gmra.mxu1 %v8012_v22  ;;  %v3557_v30 = vadd.f32 %v3556_v23, %v634_v11 }
 0x22d   :  { %v6599_v32 = vld [vmem:[#allocation5 + $0xdf0] sm:$0xf0]  ;;  %3801 = vmatpush.bf16.msra.mxu3 %v5610_v37 }
 0x22e   :  { %v7661_v35 = vld [vmem:[#allocation5 + $0xfd4] sm:$0xf]  ;;  %v6602_v40 = vor.u32 %v7597_v31, %v6599_v32  ;;  %3820 = vmatpush.bf16.msrb.mxu1 %v6346_v39  ;;  %3789 = vmatmul.bf16.vlgmr.msra.gmra.mxu2 %v8006_v18  ;;  %v3569_v31 = vpop.f32.mrf.mxu1 }
 0x22f   :  { %v6855_v36 = vld [vmem:[#allocation5 + $0xff0] sm:$0xf0]  ;;  %v3570_v37 = vadd.f32 %v3569_v31, %v3557_v30  ;;  %v5069_v30 = vld [vmem:[#allocation5 + $0x1d8] sm:$0xf] }
 0x230   :  { %v7461_v24 = vld [vmem:[#allocation5 + $0x994] sm:$0xf]  ;;  %v6858_v45 = vor.u32 %v7661_v35, %v6855_v36  ;;  %3833 = vmatpush.bf16.msrb.mxu2 %v6602_v40  ;;  %3802 = vmatmul.bf16.vlgmr.msra.gmra.mxu3 %v8010_v20  ;;  %v7218_v31 = vld [vmem:[#allocation5 + $0x1f4] sm:$0xf0] }
 0x231   :  { %v6055_v53 = vld [vmem:[#allocation5 + $0x9b0] sm:$0xf0] }
 0x232   :  { %v7525_v43 = vld [vmem:[#allocation5 + $0xb94] sm:$0xf]  ;;  %v6058_v55 = vor.u32 %v7461_v24, %v6055_v53  ;;  %3846 = vmatpush.bf16.msrb.mxu3 %v6858_v45  ;;  %v3582_v45 = vpop.f32.mrf.mxu2 }
 0x233   :  { %v6311_v46 = vld [vmem:[#allocation5 + $0xbb0] sm:$0xf0] }
 0x234   :  { %v7589_v47 = vld [vmem:[#allocation5 + $0xd94] sm:$0xf]  ;;  %v6314_v57 = vor.u32 %v7525_v43, %v6311_v46  ;;  %3808 = vmatpush.bf16.msrb.mxu0 %v6058_v55  ;;  %v3595_v55 = vpop.f32.mrf.mxu3 }
 0x235   :  { %v6567_v48 = vld [vmem:[#allocation5 + $0xdb0] sm:$0xf0] }
 0x236   :  { %v7653_v50 = vld [vmem:[#allocation5 + $0xf94] sm:$0xf]  ;;  %v6570_v58 = vor.u32 %v7589_v47, %v6567_v48  ;;  %3821 = vmatpush.bf16.msrb.mxu1 %v6314_v57 }
 0x237   :  { %v6823_v54 = vld [vmem:[#allocation5 + $0xfb0] sm:$0xf0] }
 0x238   :  { %v7453_v59 = vld [vmem:[#allocation5 + $0x954] sm:$0xf]  ;;  %v6826_v62 = vor.u32 %v7653_v50, %v6823_v54  ;;  %3834 = vmatpush.bf16.msrb.mxu2 %v6570_v58  ;;  %v3583_v54 = vadd.f32 %v3582_v45, %v3570_v37  ;;  %v5037_v45 = vld [vmem:[#allocation5 + $0x198] sm:$0xf] }
 0x239   :  { %v6023_v60 = vld [vmem:[#allocation5 + $0x970] sm:$0xf0] }
 0x23a   :  { %v7517_v61 = vld [vmem:[#allocation5 + $0xb54] sm:$0xf]  ;;  %v6026_v5 = vor.u32 %v7453_v59, %v6023_v60  ;;  %3847 = vmatpush.bf16.msrb.mxu3 %v6826_v62  ;;  %v8089_v60 = vadd.f32 %v3595_v55, %v3583_v54  ;;  %v3584_v23 = vpop.f32.mrf.mxu2  ;;  %v5549_v54 = vld [vmem:[#allocation5 + $0x598] sm:$0xf] }
 0x23b   :  { %v6279_v63 = vld [vmem:[#allocation5 + $0xb70] sm:$0xf0]  ;;  %v7338_v55 = vld [vmem:[#allocation5 + $0x5b4] sm:$0xf0] }
 0x23c   :  { %v7581_v0 = vld [vmem:[#allocation5 + $0xd54] sm:$0xf]  ;;  %v6282_v7 = vor.u32 %v7517_v61, %v6279_v63  ;;  %3809 = vmatpush.bf16.msrb.mxu0 %v6026_v5  ;;  %v3558_v61 = vpop.f32.mrf.mxu0  ;;  %v5741_v23 = vld [vmem:[#allocation5 + $0x718] sm:$0xf] }
 0x23d   :  { %v6535_v1 = vld [vmem:[#allocation5 + $0xd70] sm:$0xf0] }
 0x23e   :  { %v7645_v2 = vld [vmem:[#allocation5 + $0xf54] sm:$0xf]  ;;  %v6538_v8 = vor.u32 %v7581_v0, %v6535_v1  ;;  %3822 = vmatpush.bf16.msrb.mxu1 %v6282_v7 }
 0x23f   :  { %v6791_v4 = vld [vmem:[#allocation5 + $0xf70] sm:$0xf0] }
 0x240   :  { %v7445_v6 = vld [vmem:[#allocation5 + $0x914] sm:$0xf]  ;;  %v6794_v12 = vor.u32 %v7645_v2, %v6791_v4  ;;  %3835 = vmatpush.bf16.msrb.mxu2 %v6538_v8  ;;  %v3571_v4 = vpop.f32.mrf.mxu1 }
 0x241   :  { %v5991_v9 = vld [vmem:[#allocation5 + $0x930] sm:$0xf0]  ;;  %v7266_v4 = vld [vmem:[#allocation5 + $0x374] sm:$0xf0] }
 0x242   :  { %v7509_v10 = vld [vmem:[#allocation5 + $0xb14] sm:$0xf]  ;;  %v5994_v21 = vor.u32 %v7445_v6, %v5991_v9  ;;  %3848 = vmatpush.bf16.msrb.mxu3 %v6794_v12 }
 0x243   :  { %v6247_v13 = vld [vmem:[#allocation5 + $0xb30] sm:$0xf0] }
 0x244   :  { %v7573_v14 = vld [vmem:[#allocation5 + $0xd14] sm:$0xf]  ;;  %v6250_v26 = vor.u32 %v7509_v10, %v6247_v13  ;;  %3810 = vmatpush.bf16.msrb.mxu0 %v5994_v21 }
 0x245   :  { %v6503_v15 = vld [vmem:[#allocation5 + $0xd30] sm:$0xf0] }
 0x246   :  { %v7637_v16 = vld [vmem:[#allocation5 + $0xf14] sm:$0xf]  ;;  %v6506_v25 = vor.u32 %v7573_v14, %v6503_v15  ;;  %3823 = vmatpush.bf16.msrb.mxu1 %v6250_v26 }
 0x247   :  { %v6759_v17 = vld [vmem:[#allocation5 + $0xf30] sm:$0xf0] }
 0x248   :  { %v7437_v27 = vld [vmem:[#allocation5 + $0x8d4] sm:$0xf]  ;;  %v6762_v3 = vor.u32 %v7637_v16, %v6759_v17  ;;  %3836 = vmatpush.bf16.msrb.mxu2 %v6506_v25 }
 0x249   :  { %v5959_v28 = vld [vmem:[#allocation5 + $0x8f0] sm:$0xf0] }
 0x24a   :  { %v7501_v29 = vld [vmem:[#allocation5 + $0xad4] sm:$0xf]  ;;  %v5962_v51 = vor.u32 %v7437_v27, %v5959_v28  ;;  %3849 = vmatpush.bf16.msrb.mxu3 %v6762_v3  ;;  %v5325_v3 = vld [vmem:[#allocation5 + $0x3d8] sm:$0xf] }
 0x24b   :  { %v6215_v32 = vld [vmem:[#allocation5 + $0xaf0] sm:$0xf0] }
 0x24c   :  { %v7565_v33 = vld [vmem:[#allocation5 + $0xcd4] sm:$0xf]  ;;  %v6218_v39 = vor.u32 %v7501_v29, %v6215_v32  ;;  %3811 = vmatpush.bf16.msrb.mxu0 %v5962_v51  ;;  %v3597_v29 = vpop.f32.mrf.mxu3  ;;  %v5837_v51 = vld [vmem:[#allocation5 + $0x7d8] sm:$0xf] }
 0x24d   :  { %v6471_v34 = vld [vmem:[#allocation5 + $0xcf0] sm:$0xf0] }
 0x24e   :  { %v7629_v35 = vld [vmem:[#allocation5 + $0xed4] sm:$0xf]  ;;  %v6474_v40 = vor.u32 %v7565_v33, %v6471_v34  ;;  %3824 = vmatpush.bf16.msrb.mxu1 %v6218_v39  ;;  %v7282_v33 = vld [vmem:[#allocation5 + $0x3f4] sm:$0xf0] }
 0x24f   :  { %v6727_v36 = vld [vmem:[#allocation5 + $0xef0] sm:$0xf0]  ;;  %v5581_v34 = vld [vmem:[#allocation5 + $0x5d8] sm:$0xf] }
 0x250   :  { %v7429_v24 = vld [vmem:[#allocation5 + $0x894] sm:$0xf]  ;;  %v6730_v46 = vor.u32 %v7629_v35, %v6727_v36  ;;  %3837 = vmatpush.bf16.msrb.mxu2 %v6474_v40  ;;  %v7346_v35 = vld [vmem:[#allocation5 + $0x5f4] sm:$0xf0] }
 0x251   :  { %v5927_v53 = vld [vmem:[#allocation5 + $0x8b0] sm:$0xf0]  ;;  %v7410_v39 = vld [vmem:[#allocation5 + $0x7f4] sm:$0xf0] }
 0x252   :  { %v7493_v43 = vld [vmem:[#allocation5 + $0xa94] sm:$0xf]  ;;  %v5930_v59 = vor.u32 %v7429_v24, %v5927_v53  ;;  %3850 = vmatpush.bf16.msrb.mxu3 %v6730_v46  ;;  %v5070_v24 = vor.u32 %v7218_v31, %v5069_v30  ;;  %v5326_v53 = vor.u32 %v7282_v33, %v5325_v3  ;;  %v7210_v46 = vld [vmem:[#allocation5 + $0x1b4] sm:$0xf0]  ;;  %v3621_v33 = vpop.f32.mrf.mxu1 }
 0x253   :  { %v6183_v47 = vld [vmem:[#allocation5 + $0xab0] sm:$0xf0]  ;;  %v4941_v30 = vld [vmem:[#allocation5 + $0xd8] sm:$0xf] }
 0x254   :  { %v7557_v48 = vld [vmem:[#allocation5 + $0xc94] sm:$0xf]  ;;  %v6186_v62 = vor.u32 %v7493_v43, %v6183_v47  ;;  %3812 = vmatpush.bf16.msrb.mxu0 %v5930_v59  ;;  %v5582_v43 = vor.u32 %v7346_v35, %v5581_v34  ;;  %v5293_v47 = vld [vmem:[#allocation5 + $0x398] sm:$0xf]  ;;  %v5038_v59 = vor.u32 %v7210_v46, %v5037_v45 }
 0x255   :  { %v6439_v50 = vld [vmem:[#allocation5 + $0xcb0] sm:$0xf0]  ;;  %v7186_v31 = vld [vmem:[#allocation5 + $0xf4] sm:$0xf0] }
 0x256   :  { %v7621_v57 = vld [vmem:[#allocation5 + $0xe94] sm:$0xf]  ;;  %v6442_v63 = vor.u32 %v7557_v48, %v6439_v50  ;;  %3825 = vmatpush.bf16.msrb.mxu1 %v6186_v62  ;;  %v5838_v48 = vor.u32 %v7410_v39, %v5837_v51  ;;  %v7274_v50 = vld [vmem:[#allocation5 + $0x3b4] sm:$0xf0]  ;;  %v5550_v62 = vor.u32 %v7338_v55, %v5549_v54 }
 0x257   :  { %v6695_v58 = vld [vmem:[#allocation5 + $0xeb0] sm:$0xf0]  ;;  %v5294_v61 = vor.u32 %v7274_v50, %v5293_v47  ;;  %v5197_v3 = vld [vmem:[#allocation5 + $0x2d8] sm:$0xf] }
 0x258   :  { %v7421_v0 = vld [vmem:[#allocation5 + $0x854] sm:$0xf]  ;;  %v6698_v5 = vor.u32 %v7621_v57, %v6695_v58  ;;  %3838 = vmatpush.bf16.msrb.mxu2 %v6442_v63  ;;  %v5805_v57 = vld [vmem:[#allocation5 + $0x798] sm:$0xf] }
 0x259   :  { %v5895_v1 = vld [vmem:[#allocation5 + $0x870] sm:$0xf0]  ;;  %v7402_v58 = vld [vmem:[#allocation5 + $0x7b4] sm:$0xf0] }
 0x25a   :  { %v7485_v2 = vld [vmem:[#allocation5 + $0xa54] sm:$0xf]  ;;  %v5898_v11 = vor.u32 %v7421_v0, %v5895_v1  ;;  %3851 = vmatpush.bf16.msrb.mxu3 %v6698_v5  ;;  %v5005_v63 = vld [vmem:[#allocation5 + $0x158] sm:$0xf] }
 0x25b   :  { %v6151_v6 = vld [vmem:[#allocation5 + $0xa70] sm:$0xf0]  ;;  %v7202_v0 = vld [vmem:[#allocation5 + $0x174] sm:$0xf0] }
 0x25c   :  { %v7549_v7 = vld [vmem:[#allocation5 + $0xc54] sm:$0xf]  ;;  %v6154_v14 = vor.u32 %v7485_v2, %v6151_v6  ;;  %3813 = vmatpush.bf16.msrb.mxu0 %v5898_v11  ;;  %v5261_v1 = vld [vmem:[#allocation5 + $0x358] sm:$0xf]  ;;  %v5806_v2 = vor.u32 %v7402_v58, %v5805_v57  ;;  %v3647_v58 = vpop.f32.mrf.mxu3 }
 0x25d   :  { %v6407_v8 = vld [vmem:[#allocation5 + $0xc70] sm:$0xf0]  ;;  %v5517_v5 = vld [vmem:[#allocation5 + $0x558] sm:$0xf] }
 0x25e   :  { %v7613_v9 = vld [vmem:[#allocation5 + $0xe54] sm:$0xf]  ;;  %v6410_v15 = vor.u32 %v7549_v7, %v6407_v8  ;;  %3826 = vmatpush.bf16.msrb.mxu1 %v6154_v14  ;;  %v7330_v6 = vld [vmem:[#allocation5 + $0x574] sm:$0xf0] }
 0x25f   :  { %v6663_v10 = vld [vmem:[#allocation5 + $0xe70] sm:$0xf0]  ;;  %v5773_v7 = vld [vmem:[#allocation5 + $0x758] sm:$0xf]  ;;  %v5518_v11 = vor.u32 %v7330_v6, %v5517_v5 }
 0x260   :  { %v7413_v12 = vld [vmem:[#allocation5 + $0x814] sm:$0xf]  ;;  %v6666_v26 = vor.u32 %v7613_v9, %v6663_v10  ;;  %3839 = vmatpush.bf16.msrb.mxu2 %v6410_v15  ;;  %v7394_v8 = vld [vmem:[#allocation5 + $0x774] sm:$0xf0]  ;;  %v5006_v9 = vor.u32 %v7202_v0, %v5005_v63  ;;  %v5262_v10 = vor.u32 %v7266_v4, %v5261_v1 }
 0x261   :  { %v5863_v13 = vld [vmem:[#allocation5 + $0x830] sm:$0xf0]  ;;  %v5229_v14 = vld [vmem:[#allocation5 + $0x318] sm:$0xf]  ;;  %v5774_v15 = vor.u32 %v7394_v8, %v5773_v7  ;;  %v3623_v7 = vpop.f32.mrf.mxu1 }
 0x262   :  { %v7477_v16 = vld [vmem:[#allocation5 + $0xa14] sm:$0xf]  ;;  %v5866_v32 = vor.u32 %v7413_v12, %v5863_v13  ;;  %3852 = vmatpush.bf16.msrb.mxu3 %v6666_v26  ;;  %v4973_v12 = vld [vmem:[#allocation5 + $0x118] sm:$0xf] }
 0x263   :  { %v6119_v17 = vld [vmem:[#allocation5 + $0xa30] sm:$0xf0]  ;;  %v7194_v13 = vld [vmem:[#allocation5 + $0x134] sm:$0xf0] }
 0x264   :  { %v7541_v21 = vld [vmem:[#allocation5 + $0xc14] sm:$0xf]  ;;  %v6122_v36 = vor.u32 %v7477_v16, %v6119_v17  ;;  %3814 = vmatpush.bf16.msrb.mxu0 %v5866_v32  ;;  %v7258_v16 = vld [vmem:[#allocation5 + $0x334] sm:$0xf0] }
 0x265   :  { %v6375_v25 = vld [vmem:[#allocation5 + $0xc30] sm:$0xf0]  ;;  %v5485_v17 = vld [vmem:[#allocation5 + $0x518] sm:$0xf] }
 0x266   :  { %v7605_v27 = vld [vmem:[#allocation5 + $0xe14] sm:$0xf]  ;;  %v6378_v37 = vor.u32 %v7541_v21, %v6375_v25  ;;  %3827 = vmatpush.bf16.msrb.mxu1 %v6122_v36  ;;  %v7322_v21 = vld [vmem:[#allocation5 + $0x534] sm:$0xf0]  ;;  %v4974_v25 = vor.u32 %v7194_v13, %v4973_v12 }
 0x267   :  { %v6631_v28 = vld [vmem:[#allocation5 + $0xe30] sm:$0xf0]  ;;  %3815 = vmatmul.bf16.vlgmr.msrb.gmra.mxu0 %v8020_v41  ;;  %v7386_v26 = vld [vmem:[#allocation5 + $0x734] sm:$0xf0]  ;;  %v5486_v29 = vor.u32 %v7322_v21, %v5485_v17 }
 0x268   :  { %v6634_v40 = vor.u32 %v7605_v27, %v6631_v28  ;;  %3840 = vmatpush.bf16.msrb.mxu2 %v6378_v37  ;;  %3859 = vmatpush.bf16.msra.mxu0 %v5070_v24  ;;  %v3608_v27 = vpop.f32.mrf.mxu0  ;;  %v5230_v28 = vor.u32 %v7258_v16, %v5229_v14  ;;  %v5742_v34 = vor.u32 %v7386_v26, %v5741_v23  ;;  %v7250_v35 = vld [vmem:[#allocation5 + $0x2f4] sm:$0xf0] }
 0x269   :  { %3828 = vmatmul.bf16.vlgmr.msrb.gmra.mxu1 %v8024_v44  ;;  %v3609_v32 = vadd.f32 %v3608_v27, %v8089_v60  ;;  %v5453_v36 = vld [vmem:[#allocation5 + $0x4d8] sm:$0xf]  ;;  %v4942_v24 = vor.u32 %v7186_v31, %v4941_v30 }
 0x26a   :  { %3853 = vmatpush.bf16.msrb.mxu3 %v6634_v40  ;;  %3872 = vmatpush.bf16.msra.mxu1 %v5326_v53  ;;  %v7314_v37 = vld [vmem:[#allocation5 + $0x4f4] sm:$0xf0]  ;;  %v5198_v53 = vor.u32 %v7250_v35, %v5197_v3  ;;  %v3649_v3 = vpop.f32.mrf.mxu3 }
 0x26b   :  { %3841 = vmatmul.bf16.vlgmr.msrb.gmra.mxu2 %v8018_v38  ;;  %v5709_v51 = vld [vmem:[#allocation5 + $0x6d8] sm:$0xf]  ;;  %v3622_v40 = vadd.f32 %v3621_v33, %v3609_v32 }
 0x26c   :  { %3885 = vmatpush.bf16.msra.mxu2 %v5582_v43  ;;  %3860 = vmatpush.bf16.msra.mxu0 %v5038_v59  ;;  %v7378_v39 = vld [vmem:[#allocation5 + $0x6f4] sm:$0xf0]  ;;  %v5454_v43 = vor.u32 %v7314_v37, %v5453_v36 }
 0x26d   :  { %3854 = vmatmul.bf16.vlgmr.msrb.gmra.mxu3 %v8022_v42  ;;  %v4909_v45 = vld [vmem:[#allocation5 + $0x98] sm:$0xf]  ;;  %v5710_v60 = vor.u32 %v7378_v39, %v5709_v51 }
 0x26e   :  { %3898 = vmatpush.bf16.msra.mxu3 %v5838_v48  ;;  %3873 = vmatpush.bf16.msra.mxu1 %v5294_v61  ;;  %v7178_v46 = vld [vmem:[#allocation5 + $0xb4] sm:$0xf0]  ;;  %v3634_v48 = vpop.f32.mrf.mxu2 }
 0x26f   :  { %v5165_v47 = vld [vmem:[#allocation5 + $0x298] sm:$0xf]  ;;  %v3635_v57 = vadd.f32 %v3634_v48, %v3622_v40 }
 0x270   :  { %3886 = vmatpush.bf16.msra.mxu2 %v5550_v62  ;;  %3861 = vmatpush.bf16.msra.mxu0 %v5006_v9  ;;  %v7242_v50 = vld [vmem:[#allocation5 + $0x2b4] sm:$0xf0]  ;;  %v4910_v62 = vor.u32 %v7178_v46, %v4909_v45  ;;  %v3610_v0 = vpop.f32.mrf.mxu0 }
 0x271   :  { %v5421_v54 = vld [vmem:[#allocation5 + $0x498] sm:$0xf]  ;;  %v8096_v63 = vadd.f32 %v3647_v58, %v3635_v57  ;;  %v5166_v1 = vor.u32 %v7242_v50, %v5165_v47 }
 0x272   :  { %3899 = vmatpush.bf16.msra.mxu3 %v5806_v2  ;;  %3874 = vmatpush.bf16.msra.mxu1 %v5262_v10  ;;  %v7306_v55 = vld [vmem:[#allocation5 + $0x4b4] sm:$0xf0] }
 0x273   :  { %v5677_v59 = vld [vmem:[#allocation5 + $0x698] sm:$0xf]  ;;  %v5422_v2 = vor.u32 %v7306_v55, %v5421_v54 }
 0x274   :  { %3887 = vmatpush.bf16.msra.mxu2 %v5518_v11  ;;  %3862 = vmatpush.bf16.msra.mxu0 %v4974_v25  ;;  %v7370_v61 = vld [vmem:[#allocation5 + $0x6b4] sm:$0xf0] }
 0x275   :  { %v4877_v4 = vld [vmem:[#allocation5 + $0x58] sm:$0xf]  ;;  %v5678_v8 = vor.u32 %v7370_v61, %v5677_v59 }
 0x276   :  { %3900 = vmatpush.bf16.msra.mxu3 %v5774_v15  ;;  %3875 = vmatpush.bf16.msra.mxu1 %v5230_v28  ;;  %v7170_v5 = vld [vmem:[#allocation5 + $0x74] sm:$0xf0]  ;;  %v3636_v27 = vpop.f32.mrf.mxu2 }
 0x277   :  { %v5133_v6 = vld [vmem:[#allocation5 + $0x258] sm:$0xf]  ;;  %v4878_v14 = vor.u32 %v7170_v5, %v4877_v4 }
 0x278   :  { %3888 = vmatpush.bf16.msra.mxu2 %v5486_v29  ;;  %3863 = vmatpush.bf16.msra.mxu0 %v4942_v24  ;;  %v7234_v9 = vld [vmem:[#allocation5 + $0x274] sm:$0xf0]  ;;  %v3660_v3 = vpop.f32.mrf.mxu0 }
 0x279   :  { %v5389_v10 = vld [vmem:[#allocation5 + $0x458] sm:$0xf]  ;;  %v5134_v17 = vor.u32 %v7234_v9, %v5133_v6 }
 0x27a   :  { %3901 = vmatpush.bf16.msra.mxu3 %v5742_v34  ;;  %3876 = vmatpush.bf16.msra.mxu1 %v5198_v53  ;;  %v7298_v11 = vld [vmem:[#allocation5 + $0x474] sm:$0xf0] }
 0x27b   :  { %v5645_v12 = vld [vmem:[#allocation5 + $0x658] sm:$0xf]  ;;  %v5390_v21 = vor.u32 %v7298_v11, %v5389_v10 }
 0x27c   :  { %3889 = vmatpush.bf16.msra.mxu2 %v5454_v43  ;;  %v7362_v13 = vld [vmem:[#allocation5 + $0x674] sm:$0xf0]  ;;  %3864 = vmatpush.bf16.msra.mxu0 %v4910_v62 }
 0x27d   :  { %v4845_v15 = vld [vmem:[#allocation5 + $0x18] sm:$0xf]  ;;  %v5646_v28 = vor.u32 %v7362_v13, %v5645_v12 }
 0x27e   :  { %3902 = vmatpush.bf16.msra.mxu3 %v5710_v60  ;;  %v7162_v16 = vld [vmem:[#allocation5 + $0x34] sm:$0xf0]  ;;  %3877 = vmatpush.bf16.msra.mxu1 %v5166_v1 }
 0x27f   :  { %v5101_v23 = vld [vmem:[#allocation5 + $0x218] sm:$0xf]  ;;  %v4846_v35 = vor.u32 %v7162_v16, %v4845_v15 }
 0x280   :  { %3890 = vmatpush.bf16.msra.mxu2 %v5422_v2  ;;  %v7226_v26 = vld [vmem:[#allocation5 + $0x234] sm:$0xf0]  ;;  %3865 = vmatpush.bf16.msra.mxu0 %v4878_v14 }
 0x281   :  { %v5357_v25 = vld [vmem:[#allocation5 + $0x418] sm:$0xf]  ;;  %v5102_v39 = vor.u32 %v7226_v26, %v5101_v23 }
 0x282   :  { %3903 = vmatpush.bf16.msra.mxu3 %v5678_v8  ;;  %v7290_v29 = vld [vmem:[#allocation5 + $0x434] sm:$0xf0]  ;;  %3878 = vmatpush.bf16.msra.mxu1 %v5134_v17 }
 0x283   :  { %v5613_v30 = vld [vmem:[#allocation5 + $0x618] sm:$0xf]  ;;  %v5358_v40 = vor.u32 %v7290_v29, %v5357_v25 }
 0x284   :  { %v7354_v31 = vld [vmem:[#allocation5 + $0x634] sm:$0xf0]  ;;  %3891 = vmatpush.bf16.msra.mxu2 %v5390_v21  ;;  %3866 = vmatpush.bf16.msra.mxu0 %v4846_v35  ;;  %v8102_v21 = vld [vmem:[#allocation7] sm:$0xff] }
 0x285   :  { %v6093_v32 = vld [vmem:[#allocation5 + $0x9d8] sm:$0xf]  ;;  %v5614_v43 = vor.u32 %v7354_v31, %v5613_v30  ;;  %v635_v23 = vperm.slane %v8102_v21, 4 }
 0x286   :  { %v7474_v33 = vld [vmem:[#allocation5 + $0x9f4] sm:$0xf0]  ;;  %3904 = vmatpush.bf16.msra.mxu3 %v5646_v28  ;;  %3879 = vmatpush.bf16.msra.mxu1 %v5102_v39 }
 0x287   :  { %v6349_v34 = vld [vmem:[#allocation5 + $0xbd8] sm:$0xf]  ;;  %v6094_v45 = vor.u32 %v7474_v33, %v6093_v32  ;;  %3867 = vmatmul.bf16.vlgmr.msra.gmra.mxu0 %v8008_v19 }
 0x288   :  { %v7538_v36 = vld [vmem:[#allocation5 + $0xbf4] sm:$0xf0]  ;;  %3892 = vmatpush.bf16.msra.mxu2 %v5358_v40 }
 0x289   :  { %v6605_v37 = vld [vmem:[#allocation5 + $0xdd8] sm:$0xf]  ;;  %v6350_v46 = vor.u32 %v7538_v36, %v6349_v34  ;;  %3911 = vmatpush.bf16.msrb.mxu0 %v6094_v45  ;;  %3880 = vmatmul.bf16.vlgmr.msra.gmra.mxu1 %v8012_v22 }
 0x28a   :  { %v7602_v51 = vld [vmem:[#allocation5 + $0xdf4] sm:$0xf0]  ;;  %3905 = vmatpush.bf16.msra.mxu3 %v5614_v43 }
 0x28b   :  { %v6861_v24 = vld [vmem:[#allocation5 + $0xfd8] sm:$0xf]  ;;  %v6606_v47 = vor.u32 %v7602_v51, %v6605_v37  ;;  %3924 = vmatpush.bf16.msrb.mxu1 %v6350_v46  ;;  %3893 = vmatmul.bf16.vlgmr.msra.gmra.mxu2 %v8006_v18  ;;  %v3661_v37 = vadd.f32 %v3660_v3, %v635_v23  ;;  %v3673_v51 = vpop.f32.mrf.mxu1 }
 0x28c   :  { %v7666_v53 = vld [vmem:[#allocation5 + $0xff4] sm:$0xf0] }
 0x28d   :  { %v6061_v48 = vld [vmem:[#allocation5 + $0x998] sm:$0xf]  ;;  %v6862_v54 = vor.u32 %v7666_v53, %v6861_v24  ;;  %3937 = vmatpush.bf16.msrb.mxu2 %v6606_v47  ;;  %3906 = vmatmul.bf16.vlgmr.msra.gmra.mxu3 %v8010_v20  ;;  %v3674_v46 = vadd.f32 %v3673_v51, %v3661_v37 }
 0x28e   :  { %v7466_v60 = vld [vmem:[#allocation5 + $0x9b4] sm:$0xf0] }
 0x28f   :  { %v6317_v50 = vld [vmem:[#allocation5 + $0xb98] sm:$0xf]  ;;  %v6062_v62 = vor.u32 %v7466_v60, %v6061_v48  ;;  %3950 = vmatpush.bf16.msrb.mxu3 %v6862_v54 }
 0x290   :  { %v7530_v55 = vld [vmem:[#allocation5 + $0xbb4] sm:$0xf0] }
 0x291   :  { %v6573_v57 = vld [vmem:[#allocation5 + $0xd98] sm:$0xf]  ;;  %v6318_v0 = vor.u32 %v7530_v55, %v6317_v50  ;;  %3912 = vmatpush.bf16.msrb.mxu0 %v6062_v62 }
 0x292   :  { %v7594_v58 = vld [vmem:[#allocation5 + $0xdb4] sm:$0xf0] }
 0x293   :  { %v6829_v59 = vld [vmem:[#allocation5 + $0xf98] sm:$0xf]  ;;  %v6574_v1 = vor.u32 %v7594_v58, %v6573_v57  ;;  %3925 = vmatpush.bf16.msrb.mxu1 %v6318_v0  ;;  %v3686_v57 = vpop.f32.mrf.mxu2 }
 0x294   :  { %v7658_v61 = vld [vmem:[#allocation5 + $0xfb4] sm:$0xf0]  ;;  %v3687_v0 = vadd.f32 %v3686_v57, %v3674_v46  ;;  %v5583_v46 = vld [vmem:[#allocation5 + $0x5f8] sm:$0xf0] }
 0x295   :  { %v6029_v2 = vld [vmem:[#allocation5 + $0x958] sm:$0xf]  ;;  %v6830_v6 = vor.u32 %v7658_v61, %v6829_v59  ;;  %3938 = vmatpush.bf16.msrb.mxu2 %v6574_v1  ;;  %v3699_v1 = vpop.f32.mrf.mxu3 }
 0x296   :  { %v7458_v4 = vld [vmem:[#allocation5 + $0x974] sm:$0xf0] }
 0x297   :  { %v6285_v5 = vld [vmem:[#allocation5 + $0xb58] sm:$0xf]  ;;  %v6030_v12 = vor.u32 %v7458_v4, %v6029_v2  ;;  %3951 = vmatpush.bf16.msrb.mxu3 %v6830_v6  ;;  %v8105_v6 = vadd.f32 %v3699_v1, %v3687_v0  ;;  %v5295_v1 = vld [vmem:[#allocation5 + $0x3b8] sm:$0xf0] }
 0x298   :  { %v7522_v7 = vld [vmem:[#allocation5 + $0xb74] sm:$0xf0] }
 0x299   :  { %v6541_v8 = vld [vmem:[#allocation5 + $0xd58] sm:$0xf]  ;;  %v6286_v14 = vor.u32 %v7522_v7, %v6285_v5  ;;  %3913 = vmatpush.bf16.msrb.mxu0 %v6030_v12  ;;  %v3662_v7 = vpop.f32.mrf.mxu0 }
 0x29a   :  { %v7586_v9 = vld [vmem:[#allocation5 + $0xd74] sm:$0xf0]  ;;  %v5807_v7 = vld [vmem:[#allocation5 + $0x7b8] sm:$0xf0] }
 0x29b   :  { %v6797_v10 = vld [vmem:[#allocation5 + $0xf58] sm:$0xf]  ;;  %v6542_v15 = vor.u32 %v7586_v9, %v6541_v8  ;;  %3926 = vmatpush.bf16.msrb.mxu1 %v6286_v14 }
 0x29c   :  { %v7650_v11 = vld [vmem:[#allocation5 + $0xf74] sm:$0xf0] }
 0x29d   :  { %v5997_v13 = vld [vmem:[#allocation5 + $0x918] sm:$0xf]  ;;  %v6798_v26 = vor.u32 %v7650_v11, %v6797_v10  ;;  %3939 = vmatpush.bf16.msrb.mxu2 %v6542_v15  ;;  %v3701_v51 = vpop.f32.mrf.mxu3 }
 0x29e   :  { %v7450_v16 = vld [vmem:[#allocation5 + $0x934] sm:$0xf0] }
 0x29f   :  { %v6253_v17 = vld [vmem:[#allocation5 + $0xb18] sm:$0xf]  ;;  %v5998_v31 = vor.u32 %v7450_v16, %v5997_v13  ;;  %3952 = vmatpush.bf16.msrb.mxu3 %v6798_v26  ;;  %v3675_v13 = vpop.f32.mrf.mxu1 }
 0x2a0   :  { %v7514_v25 = vld [vmem:[#allocation5 + $0xb34] sm:$0xf0]  ;;  %v7262_v13 = vld [vmem:[#allocation5 + $0x35c] sm:$0xf] }
 0x2a1   :  { %v6509_v27 = vld [vmem:[#allocation5 + $0xd18] sm:$0xf]  ;;  %v6254_v32 = vor.u32 %v7514_v25, %v6253_v17  ;;  %3914 = vmatpush.bf16.msrb.mxu0 %v5998_v31  ;;  %v3712_v51 = vpop.f32.mrf.mxu0 }
 0x2a2   :  { %v7578_v28 = vld [vmem:[#allocation5 + $0xd34] sm:$0xf0] }
 0x2a3   :  { %v6765_v29 = vld [vmem:[#allocation5 + $0xf18] sm:$0xf]  ;;  %v6510_v33 = vor.u32 %v7578_v28, %v6509_v27  ;;  %3927 = vmatpush.bf16.msrb.mxu1 %v6254_v32 }
 0x2a4   :  { %v7642_v30 = vld [vmem:[#allocation5 + $0xf34] sm:$0xf0] }
 0x2a5   :  { %v5965_v34 = vld [vmem:[#allocation5 + $0x8d8] sm:$0xf]  ;;  %v6766_v39 = vor.u32 %v7642_v30, %v6765_v29  ;;  %3940 = vmatpush.bf16.msrb.mxu2 %v6510_v33  ;;  %v3688_v33 = vpop.f32.mrf.mxu2 }
 0x2a6   :  { %v7442_v35 = vld [vmem:[#allocation5 + $0x8f4] sm:$0xf0]  ;;  %v7318_v33 = vld [vmem:[#allocation5 + $0x51c] sm:$0xf] }
 0x2a7   :  { %v6221_v36 = vld [vmem:[#allocation5 + $0xad8] sm:$0xf]  ;;  %v5966_v47 = vor.u32 %v7442_v35, %v5965_v34  ;;  %3953 = vmatpush.bf16.msrb.mxu3 %v6766_v39  ;;  %v7214_v39 = vld [vmem:[#allocation5 + $0x1dc] sm:$0xf] }
 0x2a8   :  { %v7506_v40 = vld [vmem:[#allocation5 + $0xaf4] sm:$0xf0] }
 0x2a9   :  { %v6477_v24 = vld [vmem:[#allocation5 + $0xcd8] sm:$0xf]  ;;  %v6222_v48 = vor.u32 %v7506_v40, %v6221_v36  ;;  %3915 = vmatpush.bf16.msrb.mxu0 %v5966_v47  ;;  %v5071_v40 = vld [vmem:[#allocation5 + $0x1f8] sm:$0xf0] }
 0x2aa   :  { %v7570_v53 = vld [vmem:[#allocation5 + $0xcf4] sm:$0xf0] }
 0x2ab   :  { %v6733_v43 = vld [vmem:[#allocation5 + $0xed8] sm:$0xf]  ;;  %v6478_v60 = vor.u32 %v7570_v53, %v6477_v24  ;;  %3928 = vmatpush.bf16.msrb.mxu1 %v6222_v48  ;;  %v7278_v24 = vld [vmem:[#allocation5 + $0x3dc] sm:$0xf] }
 0x2ac   :  { %v7634_v45 = vld [vmem:[#allocation5 + $0xef4] sm:$0xf0] }
 0x2ad   :  { %v5933_v50 = vld [vmem:[#allocation5 + $0x898] sm:$0xf]  ;;  %v6734_v58 = vor.u32 %v7634_v45, %v6733_v43  ;;  %3941 = vmatpush.bf16.msrb.mxu2 %v6478_v60  ;;  %v5327_v43 = vld [vmem:[#allocation5 + $0x3f8] sm:$0xf0] }
 0x2ae   :  { %v7434_v54 = vld [vmem:[#allocation5 + $0x8b4] sm:$0xf0]  ;;  %v7342_v45 = vld [vmem:[#allocation5 + $0x5dc] sm:$0xf]  ;;  %v5330_v57 = vor.u32 %v7278_v24, %v5327_v43 }
 0x2af   :  { %v6189_v55 = vld [vmem:[#allocation5 + $0xa98] sm:$0xf]  ;;  %v5934_v5 = vor.u32 %v7434_v54, %v5933_v50  ;;  %3954 = vmatpush.bf16.msrb.mxu3 %v6734_v58  ;;  %v7406_v60 = vld [vmem:[#allocation5 + $0x7dc] sm:$0xf]  ;;  %v5586_v58 = vor.u32 %v7342_v45, %v5583_v46  ;;  %v3713_v45 = vadd.f32 %v3712_v51, %v8105_v6  ;;  %v3725_v46 = vpop.f32.mrf.mxu1 }
 0x2b0   :  { %v7498_v59 = vld [vmem:[#allocation5 + $0xab4] sm:$0xf0]  ;;  %v5839_v50 = vld [vmem:[#allocation5 + $0x7f8] sm:$0xf0] }
 0x2b1   :  { %v6445_v61 = vld [vmem:[#allocation5 + $0xc98] sm:$0xf]  ;;  %v6190_v8 = vor.u32 %v7498_v59, %v6189_v55  ;;  %3916 = vmatpush.bf16.msrb.mxu0 %v5934_v5  ;;  %v5074_v55 = vor.u32 %v7214_v39, %v5071_v40  ;;  %v7206_v59 = vld [vmem:[#allocation5 + $0x19c] sm:$0xf]  ;;  %v5842_v0 = vor.u32 %v7406_v60, %v5839_v50 }
 0x2b2   :  { %v7562_v62 = vld [vmem:[#allocation5 + $0xcb4] sm:$0xf0]  ;;  %v7398_v5 = vld [vmem:[#allocation5 + $0x79c] sm:$0xf] }
 0x2b3   :  { %v6701_v2 = vld [vmem:[#allocation5 + $0xe98] sm:$0xf]  ;;  %v6446_v9 = vor.u32 %v7562_v62, %v6445_v61  ;;  %3929 = vmatpush.bf16.msrb.mxu1 %v6190_v8  ;;  %v5039_v61 = vld [vmem:[#allocation5 + $0x1b8] sm:$0xf0] }
 0x2b4   :  { %v7626_v4 = vld [vmem:[#allocation5 + $0xeb4] sm:$0xf0]  ;;  %v7270_v62 = vld [vmem:[#allocation5 + $0x39c] sm:$0xf]  ;;  %v5042_v8 = vor.u32 %v7206_v59, %v5039_v61 }
 0x2b5   :  { %v5901_v10 = vld [vmem:[#allocation5 + $0x858] sm:$0xf]  ;;  %v6702_v14 = vor.u32 %v7626_v4, %v6701_v2  ;;  %3942 = vmatpush.bf16.msrb.mxu2 %v6446_v9  ;;  %v7334_v2 = vld [vmem:[#allocation5 + $0x59c] sm:$0xf]  ;;  %v5298_v9 = vor.u32 %v7270_v62, %v5295_v1 }
 0x2b6   :  { %v7426_v11 = vld [vmem:[#allocation5 + $0x874] sm:$0xf0]  ;;  %v5551_v4 = vld [vmem:[#allocation5 + $0x5b8] sm:$0xf0] }
 0x2b7   :  { %v6157_v12 = vld [vmem:[#allocation5 + $0xa58] sm:$0xf]  ;;  %v5902_v25 = vor.u32 %v7426_v11, %v5901_v10  ;;  %3955 = vmatpush.bf16.msrb.mxu3 %v6702_v14  ;;  %v5554_v10 = vor.u32 %v7334_v2, %v5551_v4  ;;  %v7198_v11 = vld [vmem:[#allocation5 + $0x15c] sm:$0xf]  ;;  %v5810_v14 = vor.u32 %v7398_v5, %v5807_v7  ;;  %v3738_v2 = vpop.f32.mrf.mxu2 }
 0x2b8   :  { %v7490_v15 = vld [vmem:[#allocation5 + $0xa74] sm:$0xf0]  ;;  %v7182_v24 = vld [vmem:[#allocation5 + $0xdc] sm:$0xf] }
 0x2b9   :  { %v6413_v16 = vld [vmem:[#allocation5 + $0xc58] sm:$0xf]  ;;  %v6158_v29 = vor.u32 %v7490_v15, %v6157_v12  ;;  %3917 = vmatpush.bf16.msrb.mxu0 %v5902_v25  ;;  %v5007_v12 = vld [vmem:[#allocation5 + $0x178] sm:$0xf0] }
 0x2ba   :  { %v7554_v17 = vld [vmem:[#allocation5 + $0xc74] sm:$0xf0]  ;;  %v5263_v15 = vld [vmem:[#allocation5 + $0x378] sm:$0xf0]  ;;  %v5010_v25 = vor.u32 %v7198_v11, %v5007_v12 }
 0x2bb   :  { %v6669_v23 = vld [vmem:[#allocation5 + $0xe58] sm:$0xf]  ;;  %v6414_v30 = vor.u32 %v7554_v17, %v6413_v16  ;;  %3930 = vmatpush.bf16.msrb.mxu1 %v6158_v29  ;;  %v7326_v16 = vld [vmem:[#allocation5 + $0x55c] sm:$0xf] }
 0x2bc   :  { %v7618_v26 = vld [vmem:[#allocation5 + $0xe74] sm:$0xf0]  ;;  %v5519_v17 = vld [vmem:[#allocation5 + $0x578] sm:$0xf0] }
 0x2bd   :  { %v5869_v27 = vld [vmem:[#allocation5 + $0x818] sm:$0xf]  ;;  %v6670_v34 = vor.u32 %v7618_v26, %v6669_v23  ;;  %3943 = vmatpush.bf16.msrb.mxu2 %v6414_v30  ;;  %v7390_v23 = vld [vmem:[#allocation5 + $0x75c] sm:$0xf] }
 0x2be   :  { %v7418_v28 = vld [vmem:[#allocation5 + $0x834] sm:$0xf0]  ;;  %v5775_v26 = vld [vmem:[#allocation5 + $0x778] sm:$0xf0] }
 0x2bf   :  { %v6125_v31 = vld [vmem:[#allocation5 + $0xa18] sm:$0xf]  ;;  %v5870_v53 = vor.u32 %v7418_v28, %v5869_v27  ;;  %3956 = vmatpush.bf16.msrb.mxu3 %v6670_v34  ;;  %v5266_v27 = vor.u32 %v7262_v13, %v5263_v15  ;;  %v5522_v28 = vor.u32 %v7326_v16, %v5519_v17  ;;  %v7190_v29 = vld [vmem:[#allocation5 + $0x11c] sm:$0xf] }
 0x2c0   :  { %v7482_v3 = vld [vmem:[#allocation5 + $0xa34] sm:$0xf0]  ;;  %v4975_v30 = vld [vmem:[#allocation5 + $0x138] sm:$0xf0] }
 0x2c1   :  { %v6381_v32 = vld [vmem:[#allocation5 + $0xc18] sm:$0xf]  ;;  %v6126_v47 = vor.u32 %v7482_v3, %v6125_v31  ;;  %3918 = vmatpush.bf16.msrb.mxu0 %v5870_v53  ;;  %v7254_v31 = vld [vmem:[#allocation5 + $0x31c] sm:$0xf]  ;;  %v5778_v3 = vor.u32 %v7390_v23, %v5775_v26 }
 0x2c2   :  { %v7546_v35 = vld [vmem:[#allocation5 + $0xc34] sm:$0xf0]  ;;  %v5487_v34 = vld [vmem:[#allocation5 + $0x538] sm:$0xf0] }
 0x2c3   :  { %v6637_v36 = vld [vmem:[#allocation5 + $0xe18] sm:$0xf]  ;;  %v6382_v48 = vor.u32 %v7546_v35, %v6381_v32  ;;  %3931 = vmatpush.bf16.msrb.mxu1 %v6126_v47  ;;  %v5231_v32 = vld [vmem:[#allocation5 + $0x338] sm:$0xf0]  ;;  %v5490_v40 = vor.u32 %v7318_v33, %v5487_v34 }
 0x2c4   :  { %v7610_v37 = vld [vmem:[#allocation5 + $0xe34] sm:$0xf0]  ;;  %3919 = vmatmul.bf16.vlgmr.msrb.gmra.mxu0 %v8020_v41  ;;  %v7382_v35 = vld [vmem:[#allocation5 + $0x71c] sm:$0xf]  ;;  %v5234_v39 = vor.u32 %v7254_v31, %v5231_v32 }
 0x2c5   :  { %v6638_v54 = vor.u32 %v7610_v37, %v6637_v36  ;;  %3944 = vmatpush.bf16.msrb.mxu2 %v6382_v48  ;;  %3963 = vmatpush.bf16.msra.mxu0 %v5074_v55  ;;  %v5743_v36 = vld [vmem:[#allocation5 + $0x738] sm:$0xf0]  ;;  %v4978_v37 = vor.u32 %v7190_v29, %v4975_v30 }
 0x2c6   :  { %3932 = vmatmul.bf16.vlgmr.msrb.gmra.mxu1 %v8024_v44  ;;  %v4943_v53 = vld [vmem:[#allocation5 + $0xf8] sm:$0xf0]  ;;  %v5746_v47 = vor.u32 %v7382_v35, %v5743_v36 }
 0x2c7   :  { %3957 = vmatpush.bf16.msrb.mxu3 %v6638_v54  ;;  %3976 = vmatpush.bf16.msra.mxu1 %v5330_v57  ;;  %v7246_v43 = vld [vmem:[#allocation5 + $0x2dc] sm:$0xf]  ;;  %v3726_v57 = vadd.f32 %v3725_v46, %v3713_v45 }
 0x2c8   :  { %3945 = vmatmul.bf16.vlgmr.msrb.gmra.mxu2 %v8018_v38  ;;  %v5199_v48 = vld [vmem:[#allocation5 + $0x2f8] sm:$0xf0] }
 0x2c9   :  { %3989 = vmatpush.bf16.msra.mxu2 %v5586_v58  ;;  %3964 = vmatpush.bf16.msra.mxu0 %v5042_v8  ;;  %v7310_v60 = vld [vmem:[#allocation5 + $0x4dc] sm:$0xf]  ;;  %v4946_v58 = vor.u32 %v7182_v24, %v4943_v53  ;;  %v5202_v59 = vor.u32 %v7246_v43, %v5199_v48  ;;  %v3739_v8 = vadd.f32 %v3738_v2, %v3726_v57 }
 0x2ca   :  { %3958 = vmatmul.bf16.vlgmr.msrb.gmra.mxu3 %v8022_v42  ;;  %v5455_v50 = vld [vmem:[#allocation5 + $0x4f8] sm:$0xf0] }
 0x2cb   :  { %4002 = vmatpush.bf16.msra.mxu3 %v5842_v0  ;;  %3977 = vmatpush.bf16.msra.mxu1 %v5298_v9  ;;  %v7374_v54 = vld [vmem:[#allocation5 + $0x6dc] sm:$0xf]  ;;  %v5458_v61 = vor.u32 %v7310_v60, %v5455_v50  ;;  %v3751_v9 = vpop.f32.mrf.mxu3 }
 0x2cc   :  { %v5711_v55 = vld [vmem:[#allocation5 + $0x6f8] sm:$0xf0]  ;;  %v8112_v13 = vadd.f32 %v3751_v9, %v3739_v8 }
 0x2cd   :  { %3990 = vmatpush.bf16.msra.mxu2 %v5554_v10  ;;  %3965 = vmatpush.bf16.msra.mxu0 %v5010_v25  ;;  %v7174_v62 = vld [vmem:[#allocation5 + $0x9c] sm:$0xf]  ;;  %v5714_v6 = vor.u32 %v7374_v54, %v5711_v55  ;;  %v3727_v25 = vpop.f32.mrf.mxu1 }
 0x2ce   :  { %v4911_v0 = vld [vmem:[#allocation5 + $0xb8] sm:$0xf0] }
 0x2cf   :  { %4003 = vmatpush.bf16.msra.mxu3 %v5810_v14  ;;  %3978 = vmatpush.bf16.msra.mxu1 %v5266_v27  ;;  %v7238_v1 = vld [vmem:[#allocation5 + $0x29c] sm:$0xf]  ;;  %v4914_v12 = vor.u32 %v7174_v62, %v4911_v0  ;;  %v3714_v14 = vpop.f32.mrf.mxu0 }
 0x2d0   :  { %v5167_v4 = vld [vmem:[#allocation5 + $0x2b8] sm:$0xf0] }
 0x2d1   :  { %3991 = vmatpush.bf16.msra.mxu2 %v5522_v28  ;;  %3966 = vmatpush.bf16.msra.mxu0 %v4978_v37  ;;  %v7302_v5 = vld [vmem:[#allocation5 + $0x49c] sm:$0xf]  ;;  %v5170_v15 = vor.u32 %v7238_v1, %v5167_v4 }
 0x2d2   :  { %v5423_v7 = vld [vmem:[#allocation5 + $0x4b8] sm:$0xf0] }
 0x2d3   :  { %4004 = vmatpush.bf16.msra.mxu3 %v5778_v3  ;;  %3979 = vmatpush.bf16.msra.mxu1 %v5234_v39  ;;  %v7366_v10 = vld [vmem:[#allocation5 + $0x69c] sm:$0xf]  ;;  %v5426_v16 = vor.u32 %v7302_v5, %v5423_v7  ;;  %v3753_v46 = vpop.f32.mrf.mxu3 }
 0x2d4   :  { %v5679_v11 = vld [vmem:[#allocation5 + $0x6b8] sm:$0xf0] }
 0x2d5   :  { %3992 = vmatpush.bf16.msra.mxu2 %v5490_v40  ;;  %3967 = vmatpush.bf16.msra.mxu0 %v4946_v58  ;;  %v7166_v17 = vld [vmem:[#allocation5 + $0x5c] sm:$0xf]  ;;  %v5682_v27 = vor.u32 %v7366_v10, %v5679_v11  ;;  %v3740_v40 = vpop.f32.mrf.mxu2 }
 0x2d6   :  { %v4879_v23 = vld [vmem:[#allocation5 + $0x78] sm:$0xf0] }
 0x2d7   :  { %4005 = vmatpush.bf16.msra.mxu3 %v5746_v47  ;;  %3980 = vmatpush.bf16.msra.mxu1 %v5202_v59  ;;  %v7230_v26 = vld [vmem:[#allocation5 + $0x25c] sm:$0xf]  ;;  %v4882_v32 = vor.u32 %v7166_v17, %v4879_v23 }
 0x2d8   :  { %v5135_v28 = vld [vmem:[#allocation5 + $0x278] sm:$0xf0] }
 0x2d9   :  { %3993 = vmatpush.bf16.msra.mxu2 %v5458_v61  ;;  %v7294_v29 = vld [vmem:[#allocation5 + $0x45c] sm:$0xf]  ;;  %3968 = vmatpush.bf16.msra.mxu0 %v4914_v12  ;;  %v5138_v35 = vor.u32 %v7230_v26, %v5135_v28 }
 0x2da   :  { %v5391_v30 = vld [vmem:[#allocation5 + $0x478] sm:$0xf0] }
 0x2db   :  { %4006 = vmatpush.bf16.msra.mxu3 %v5714_v6  ;;  %v7358_v31 = vld [vmem:[#allocation5 + $0x65c] sm:$0xf]  ;;  %3981 = vmatpush.bf16.msra.mxu1 %v5170_v15  ;;  %v5394_v36 = vor.u32 %v7294_v29, %v5391_v30 }
 0x2dc   :  { %v5647_v3 = vld [vmem:[#allocation5 + $0x678] sm:$0xf0] }
 0x2dd   :  { %v7158_v33 = vld [vmem:[#allocation5 + $0x1c] sm:$0xf]  ;;  %3994 = vmatpush.bf16.msra.mxu2 %v5426_v16  ;;  %v5650_v24 = vor.u32 %v7358_v31, %v5647_v3  ;;  %3969 = vmatpush.bf16.msra.mxu0 %v4882_v32 }
 0x2de   :  { %v4847_v34 = vld [vmem:[#allocation5 + $0x38] sm:$0xf0] }
 0x2df   :  { %v7222_v37 = vld [vmem:[#allocation5 + $0x21c] sm:$0xf]  ;;  %4007 = vmatpush.bf16.msra.mxu3 %v5682_v27  ;;  %v4850_v50 = vor.u32 %v7158_v33, %v4847_v34  ;;  %3982 = vmatpush.bf16.msra.mxu1 %v5138_v35 }
 0x2e0   :  { %v5103_v51 = vld [vmem:[#allocation5 + $0x238] sm:$0xf0] }
 0x2e1   :  { %v7286_v39 = vld [vmem:[#allocation5 + $0x41c] sm:$0xf]  ;;  %3995 = vmatpush.bf16.msra.mxu2 %v5394_v36  ;;  %v5106_v58 = vor.u32 %v7222_v37, %v5103_v51  ;;  %3970 = vmatpush.bf16.msra.mxu0 %v4850_v50 }
 0x2e2   :  { %v5359_v53 = vld [vmem:[#allocation5 + $0x438] sm:$0xf0] }
 0x2e3   :  { %v7350_v43 = vld [vmem:[#allocation5 + $0x61c] sm:$0xf]  ;;  %v5362_v59 = vor.u32 %v7286_v39, %v5359_v53  ;;  %4008 = vmatpush.bf16.msra.mxu3 %v5650_v24  ;;  %3983 = vmatpush.bf16.msra.mxu1 %v5106_v58  ;;  %v8118_v53 = vpop.f32.mrf.mxu0 }
 0x2e4   :  { %v5615_v45 = vld [vmem:[#allocation5 + $0x638] sm:$0xf0]  ;;  %3971 = vmatmul.bf16.vlgmr.msra.gmra.mxu0 %v8008_v19 }
 0x2e5   :  { %v7470_v47 = vld [vmem:[#allocation5 + $0x9dc] sm:$0xf]  ;;  %v5618_v0 = vor.u32 %v7350_v43, %v5615_v45  ;;  %3996 = vmatpush.bf16.msra.mxu2 %v5362_v59 }
 0x2e6   :  { %v6095_v48 = vld [vmem:[#allocation5 + $0x9f8] sm:$0xf0]  ;;  %3984 = vmatmul.bf16.vlgmr.msra.gmra.mxu1 %v8012_v22 }
 0x2e7   :  { %v7534_v60 = vld [vmem:[#allocation5 + $0xbdc] sm:$0xf]  ;;  %v6098_v1 = vor.u32 %v7470_v47, %v6095_v48  ;;  %4009 = vmatpush.bf16.msra.mxu3 %v5618_v0  ;;  %v8120_v48 = vpop.f32.mrf.mxu1 }
 0x2e8   :  { %v6351_v54 = vld [vmem:[#allocation5 + $0xbf8] sm:$0xf0]  ;;  %3997 = vmatmul.bf16.vlgmr.msra.gmra.mxu2 %v8006_v18 }
 0x2e9   :  { %v7598_v55 = vld [vmem:[#allocation5 + $0xddc] sm:$0xf]  ;;  %v6354_v2 = vor.u32 %v7534_v60, %v6351_v54  ;;  %4015 = vmatpush.bf16.msrb.mxu0 %v6098_v1 }
 0x2ea   :  { %v6607_v57 = vld [vmem:[#allocation5 + $0xdf8] sm:$0xf0]  ;;  %4010 = vmatmul.bf16.vlgmr.msra.gmra.mxu3 %v8010_v20 }
 0x2eb   :  { %v7662_v61 = vld [vmem:[#allocation5 + $0xfdc] sm:$0xf]  ;;  %v6610_v6 = vor.u32 %v7598_v55, %v6607_v57  ;;  %4028 = vmatpush.bf16.msrb.mxu1 %v6354_v2 }
 0x2ec   :  { %v6863_v62 = vld [vmem:[#allocation5 + $0xff8] sm:$0xf0] }
 0x2ed   :  { %v7462_v4 = vld [vmem:[#allocation5 + $0x99c] sm:$0xf]  ;;  %v6866_v8 = vor.u32 %v7662_v61, %v6863_v62  ;;  %4041 = vmatpush.bf16.msrb.mxu2 %v6610_v6  ;;  %v8122_v6 = vpop.f32.mrf.mxu2 }
 0x2ee   :  { %v6063_v5 = vld [vmem:[#allocation5 + $0x9b8] sm:$0xf0] }
 0x2ef   :  { %v7526_v7 = vld [vmem:[#allocation5 + $0xb9c] sm:$0xf]  ;;  %v6066_v15 = vor.u32 %v7462_v4, %v6063_v5  ;;  %4054 = vmatpush.bf16.msrb.mxu3 %v6866_v8 }
 0x2f0   :  { %v6319_v9 = vld [vmem:[#allocation5 + $0xbb8] sm:$0xf0] }
 0x2f1   :  { %v7590_v10 = vld [vmem:[#allocation5 + $0xd9c] sm:$0xf]  ;;  %v6322_v16 = vor.u32 %v7526_v7, %v6319_v9  ;;  %4016 = vmatpush.bf16.msrb.mxu0 %v6066_v15  ;;  %v8124_v9 = vpop.f32.mrf.mxu3 }
 0x2f2   :  { %v6575_v11 = vld [vmem:[#allocation5 + $0xdb8] sm:$0xf0] }
 0x2f3   :  { %v7654_v12 = vld [vmem:[#allocation5 + $0xf9c] sm:$0xf]  ;;  %v6578_v17 = vor.u32 %v7590_v10, %v6575_v11  ;;  %4029 = vmatpush.bf16.msrb.mxu1 %v6322_v16 }
 0x2f4   :  { %v6831_v14 = vld [vmem:[#allocation5 + $0xfb8] sm:$0xf0] }
 0x2f5   :  { %v7454_v23 = vld [vmem:[#allocation5 + $0x95c] sm:$0xf]  ;;  %v6834_v27 = vor.u32 %v7654_v12, %v6831_v14  ;;  %4042 = vmatpush.bf16.msrb.mxu2 %v6578_v17  ;;  %v3766_v14 = vpop.f32.mrf.mxu0 }
 0x2f6   :  { %v6031_v26 = vld [vmem:[#allocation5 + $0x978] sm:$0xf0] }
 0x2f7   :  { %v7518_v25 = vld [vmem:[#allocation5 + $0xb5c] sm:$0xf]  ;;  %v6034_v32 = vor.u32 %v7454_v23, %v6031_v26  ;;  %4055 = vmatpush.bf16.msrb.mxu3 %v6834_v27 }
 0x2f8   :  { %v6287_v28 = vld [vmem:[#allocation5 + $0xb78] sm:$0xf0] }
 0x2f9   :  { %v7582_v29 = vld [vmem:[#allocation5 + $0xd5c] sm:$0xf]  ;;  %v6290_v33 = vor.u32 %v7518_v25, %v6287_v28  ;;  %4017 = vmatpush.bf16.msrb.mxu0 %v6034_v32  ;;  %v3779_v25 = vpop.f32.mrf.mxu1 }
 0x2fa   :  { %v6543_v30 = vld [vmem:[#allocation5 + $0xd78] sm:$0xf0] }
 0x2fb   :  { %v7646_v31 = vld [vmem:[#allocation5 + $0xf5c] sm:$0xf]  ;;  %v6546_v34 = vor.u32 %v7582_v29, %v6543_v30  ;;  %4030 = vmatpush.bf16.msrb.mxu1 %v6290_v33 }
 0x2fc   :  { %v6799_v3 = vld [vmem:[#allocation5 + $0xf78] sm:$0xf0] }
 0x2fd   :  { %v7446_v35 = vld [vmem:[#allocation5 + $0x91c] sm:$0xf]  ;;  %v6802_v37 = vor.u32 %v7646_v31, %v6799_v3  ;;  %4043 = vmatpush.bf16.msrb.mxu2 %v6546_v34 }
 0x2fe   :  { %v5999_v36 = vld [vmem:[#allocation5 + $0x938] sm:$0xf0] }
 0x2ff   :  { %v7510_v18 = vld [vmem:[#allocation5 + $0xb1c] sm:$0xf]  ;;  %v6002_v20 = vor.u32 %v7446_v35, %v5999_v36  ;;  %4056 = vmatpush.bf16.msrb.mxu3 %v6802_v37  ;;  %v3792_v37 = vpop.f32.mrf.mxu2 }
 0x300   :  { %v6255_v51 = vld [vmem:[#allocation5 + $0xb38] sm:$0xf0]  ;;  %v4069_v37 = vmax.f32 %v8082_v56, 0.0 }
 0x301   :  { %v7574_v39 = vld [vmem:[#allocation5 + $0xd1c] sm:$0xf]  ;;  %v6258_v22 = vor.u32 %v7510_v18, %v6255_v51  ;;  %4018 = vmatpush.bf16.msrb.mxu0 %v6002_v20 }
 0x302   :  { %v6511_v40 = vld [vmem:[#allocation5 + $0xd38] sm:$0xf0] }
 0x303   :  { %v7638_v24 = vld [vmem:[#allocation5 + $0xf1c] sm:$0xf]  ;;  %v6514_v43 = vor.u32 %v7574_v39, %v6511_v40  ;;  %4031 = vmatpush.bf16.msrb.mxu1 %v6258_v22 }
 0x304   :  { %v6767_v19 = vld [vmem:[#allocation5 + $0xf38] sm:$0xf0] }
 0x305   :  { %v7438_v45 = vld [vmem:[#allocation5 + $0x8dc] sm:$0xf]  ;;  %v6770_v60 = vor.u32 %v7638_v24, %v6767_v19  ;;  %4044 = vmatpush.bf16.msrb.mxu2 %v6514_v43  ;;  %v3805_v19 = vpop.f32.mrf.mxu3 }
 0x306   :  { %v5967_v46 = vld [vmem:[#allocation5 + $0x8f8] sm:$0xf0] }
 0x307   :  { %v7502_v47 = vld [vmem:[#allocation5 + $0xadc] sm:$0xf]  ;;  %v5970_v59 = vor.u32 %v7438_v45, %v5967_v46  ;;  %4057 = vmatpush.bf16.msrb.mxu3 %v6770_v60  ;;  %v7674_v60 = vld [vmem:[#allocation8 + $0x38] sm:$0xff] }
 0x308   :  { %v6223_v50 = vld [vmem:[#allocation5 + $0xaf8] sm:$0xf0] }
 0x309   :  { %v7566_v54 = vld [vmem:[#allocation5 + $0xcdc] sm:$0xf]  ;;  %v6226_v61 = vor.u32 %v7502_v47, %v6223_v50  ;;  %4019 = vmatpush.bf16.msrb.mxu0 %v5970_v59  ;;  %v7682_v50 = vld [vmem:[#allocation8 + $0x78] sm:$0xff] }
 0x30a   :  { %v6479_v55 = vld [vmem:[#allocation5 + $0xcf8] sm:$0xf0] }
 0x30b   :  { %v7630_v57 = vld [vmem:[#allocation5 + $0xedc] sm:$0xf]  ;;  %v6482_v62 = vor.u32 %v7566_v54, %v6479_v55  ;;  %4032 = vmatpush.bf16.msrb.mxu1 %v6226_v61  ;;  %v7690_v54 = vld [vmem:[#allocation8 + $0xb8] sm:$0xff] }
 0x30c   :  { %v6735_v58 = vld [vmem:[#allocation5 + $0xef8] sm:$0xf0]  ;;  %v7698_v55 = vld [vmem:[#allocation8 + $0xf8] sm:$0xff] }
 0x30d   :  { %v7430_v0 = vld [vmem:[#allocation5 + $0x89c] sm:$0xf]  ;;  %v6738_v4 = vor.u32 %v7630_v57, %v6735_v58  ;;  %4045 = vmatpush.bf16.msrb.mxu2 %v6482_v62  ;;  %v7672_v62 = vld [vmem:[#allocation8 + $0x28] sm:$0xff]  ;;  %v8136_v14 = vpop.f32.mrf.mxu3 }
 0x30e   :  { %v5935_v1 = vld [vmem:[#allocation5 + $0x8b8] sm:$0xf0] }
 0x30f   :  { %v7494_v2 = vld [vmem:[#allocation5 + $0xa9c] sm:$0xf]  ;;  %v5938_v12 = vor.u32 %v7430_v0, %v5935_v1  ;;  %4058 = vmatpush.bf16.msrb.mxu3 %v6738_v4  ;;  %v7680_v0 = vld [vmem:[#allocation8 + $0x68] sm:$0xff]  ;;  %v7671_v4 = vld [vmem:[#allocation8 + $0x20] sm:$0xff] }
 0x310   :  { %v6191_v5 = vld [vmem:[#allocation5 + $0xab8] sm:$0xf0]  ;;  %v7688_v1 = vld [vmem:[#allocation8 + $0xa8] sm:$0xff] }
 0x311   :  { %v7558_v7 = vld [vmem:[#allocation5 + $0xc9c] sm:$0xf]  ;;  %v6194_v15 = vor.u32 %v7494_v2, %v6191_v5  ;;  %4020 = vmatpush.bf16.msrb.mxu0 %v5938_v12  ;;  %v7696_v2 = vld [vmem:[#allocation8 + $0xe8] sm:$0xff]  ;;  %v8130_v5 = vpop.f32.mrf.mxu0  ;;  %v7694_v12 = vld [vmem:[#allocation8 + $0xd8] sm:$0xff] }
 0x312   :  { %v6447_v8 = vld [vmem:[#allocation5 + $0xcb8] sm:$0xf0] }
 0x313   :  { %v7622_v10 = vld [vmem:[#allocation5 + $0xe9c] sm:$0xf]  ;;  %v6450_v16 = vor.u32 %v7558_v7, %v6447_v8  ;;  %4033 = vmatpush.bf16.msrb.mxu1 %v6194_v15  ;;  %v8132_v7 = vpop.f32.mrf.mxu1  ;;  %v7678_v8 = vld [vmem:[#allocation8 + $0x58] sm:$0xff] }
 0x314   :  { %v6703_v11 = vld [vmem:[#allocation5 + $0xeb8] sm:$0xf0] }
 0x315   :  { %v7422_v17 = vld [vmem:[#allocation5 + $0x85c] sm:$0xf]  ;;  %v6706_v27 = vor.u32 %v7622_v10, %v6703_v11  ;;  %4046 = vmatpush.bf16.msrb.mxu2 %v6450_v16  ;;  %v7686_v10 = vld [vmem:[#allocation8 + $0x98] sm:$0xff]  ;;  %v8134_v11 = vpop.f32.mrf.mxu2 }
 0x316   :  { %v5903_v23 = vld [vmem:[#allocation5 + $0x878] sm:$0xf0] }
 0x317   :  { %v7486_v26 = vld [vmem:[#allocation5 + $0xa5c] sm:$0xf]  ;;  %v5906_v32 = vor.u32 %v7422_v17, %v5903_v23  ;;  %4059 = vmatpush.bf16.msrb.mxu3 %v6706_v27  ;;  %v636_v27 = vperm.slane %v8102_v21, 5  ;;  %v7683_v21 = vld [vmem:[#allocation8 + $0x80] sm:$0xff] }
 0x318   :  { %v6159_v28 = vld [vmem:[#allocation5 + $0xa78] sm:$0xf0] }
 0x319   :  { %v7550_v29 = vld [vmem:[#allocation5 + $0xc5c] sm:$0xf]  ;;  %v6162_v33 = vor.u32 %v7486_v26, %v6159_v28  ;;  %4021 = vmatpush.bf16.msrb.mxu0 %v5906_v32  ;;  %v3818_v16 = vpop.f32.mrf.mxu0  ;;  %v7668_v28 = vld [vmem:[#allocation8 + $0x8] sm:$0xff]  ;;  %v3857_v32 = vpop.f32.mrf.mxu3 }
 0x31a   :  { %v6415_v30 = vld [vmem:[#allocation5 + $0xc78] sm:$0xf0] }
 0x31b   :  { %v7614_v31 = vld [vmem:[#allocation5 + $0xe5c] sm:$0xf]  ;;  %v6418_v34 = vor.u32 %v7550_v29, %v6415_v30  ;;  %4034 = vmatpush.bf16.msrb.mxu1 %v6162_v33  ;;  %v3831_v26 = vpop.f32.mrf.mxu1  ;;  %v7676_v29 = vld [vmem:[#allocation8 + $0x48] sm:$0xff]  ;;  %v3765_v33 = vadd.f32 %v8118_v53, %v636_v27 }
 0x31c   :  { %v6671_v3 = vld [vmem:[#allocation5 + $0xe78] sm:$0xf0]  ;;  %v7684_v30 = vld [vmem:[#allocation8 + $0x88] sm:$0xff]  ;;  %v7699_v26 = vld [vmem:[#allocation8 + $0x100] sm:$0xff] }
 0x31d   :  { %v7414_v35 = vld [vmem:[#allocation5 + $0x81c] sm:$0xf]  ;;  %v6674_v51 = vor.u32 %v7614_v31, %v6671_v3  ;;  %4047 = vmatpush.bf16.msrb.mxu2 %v6418_v34  ;;  %v3844_v31 = vpop.f32.mrf.mxu2  ;;  %v7692_v3 = vld [vmem:[#allocation8 + $0xc8] sm:$0xff]  ;;  %v7667_v34 = vld [vmem:[#allocation8] sm:$0xff]  ;;  %v3778_v53 = vadd.f32 %v8120_v48, %v3765_v33 }
 0x31e   :  { %v5871_v36 = vld [vmem:[#allocation5 + $0x838] sm:$0xf0]  ;;  %v7704_v48 = vld [vmem:[#allocation8 + $0x128] sm:$0xff] }
 0x31f   :  { %v7478_v18 = vld [vmem:[#allocation5 + $0xa1c] sm:$0xf]  ;;  %v5874_v43 = vor.u32 %v7414_v35, %v5871_v36  ;;  %4060 = vmatpush.bf16.msrb.mxu3 %v6674_v51  ;;  %v4067_v35 = vmax.f32 %v8052_v52, 0.0  ;;  %v7675_v36 = vld [vmem:[#allocation8 + $0x40] sm:$0xff]  ;;  %v7722_v52 = vld [vmem:[#allocation8 + $0x1b8] sm:$0xff] }
 0x320   :  { %v6127_v39 = vld [vmem:[#allocation5 + $0xa38] sm:$0xf0]  ;;  %v7691_v51 = vld [vmem:[#allocation8 + $0xc0] sm:$0xff] }
 0x321   :  { %v7542_v40 = vld [vmem:[#allocation5 + $0xc1c] sm:$0xf]  ;;  %v6130_v45 = vor.u32 %v7478_v18, %v6127_v39  ;;  %4022 = vmatpush.bf16.msrb.mxu0 %v5874_v43  ;;  %v4068_v18 = vmax.f32 %v8066_v49, 0.0  ;;  %v7706_v39 = vld [vmem:[#allocation8 + $0x138] sm:$0xff]  ;;  %v4075_v19 = vpack.c.bf16 %v4067_v35, %v4067_v35 }
 0x322   :  { %v6383_v24 = vld [vmem:[#allocation5 + $0xc38] sm:$0xf0] }
 0x323   :  { %v7606_v20 = vld [vmem:[#allocation5 + $0xe1c] sm:$0xf]  ;;  %v6386_v46 = vor.u32 %v7542_v40, %v6383_v24  ;;  %4035 = vmatpush.bf16.msrb.mxu1 %v6130_v45  ;;  %v4070_v40 = vmax.f32 %v8096_v63, 0.0  ;;  %v7714_v24 = vld [vmem:[#allocation8 + $0x178] sm:$0xff]  ;;  %v3791_v45 = vadd.f32 %v8122_v6, %v3778_v53 }
 0x324   :  { %v6639_v22 = vld [vmem:[#allocation5 + $0xe38] sm:$0xf0]  ;;  %4023 = vmatmul.bf16.vlgmr.msrb.gmra.mxu0 %v8020_v41  ;;  %v7679_v41 = vld [vmem:[#allocation8 + $0x60] sm:$0xff] }
 0x325   :  { %v6642_v47 = vor.u32 %v7606_v20, %v6639_v22  ;;  %4048 = vmatpush.bf16.msrb.mxu2 %v6386_v46  ;;  %4599 = vmatpush.bf16.msra.mxu0 %v7674_v60  ;;  %v7673_v57 = vld [vmem:[#allocation8 + $0x30] sm:$0xff]  ;;  %v4076_v20 = vpack.c.bf16 %v4068_v18, %v4068_v18  ;;  %v4077_v22 = vpack.c.bf16 %v4069_v37, %v4069_v37  ;;  %v7712_v46 = vld [vmem:[#allocation8 + $0x168] sm:$0xff]  ;;  %v7730_v18 = vld [vmem:[#allocation8 + $0x1f8] sm:$0xff] }
 0x326   :  { %v7681_v58 = vld [vmem:[#allocation8 + $0x70] sm:$0xff]  ;;  %4036 = vmatmul.bf16.vlgmr.msrb.gmra.mxu1 %v8024_v44  ;;  %v7687_v44 = vld [vmem:[#allocation8 + $0xa0] sm:$0xff]  ;;  %v4078_v43 = vpack.c.bf16 %v4070_v40, %v4070_v40  ;;  %v7720_v60 = vld [vmem:[#allocation8 + $0x1a8] sm:$0xff] }
 0x327   :  { %4061 = vmatpush.bf16.msrb.mxu3 %v6642_v47  ;;  %4612 = vmatpush.bf16.msra.mxu1 %v7682_v50  ;;  %v7689_v59 = vld [vmem:[#allocation8 + $0xb0] sm:$0xff]  ;;  %v3804_v47 = vadd.f32 %v8124_v9, %v3791_v45  ;;  %v7703_v50 = vld [vmem:[#allocation8 + $0x120] sm:$0xff]  ;;  %v3907_v9 = vpop.f32.mrf.mxu3 }
 0x328   :  { %v7697_v61 = vld [vmem:[#allocation8 + $0xf0] sm:$0xff]  ;;  %4049 = vmatmul.bf16.vlgmr.msrb.gmra.mxu2 %v8018_v38  ;;  %v7695_v38 = vld [vmem:[#allocation8 + $0xe0] sm:$0xff] }
 0x329   :  { %4625 = vmatpush.bf16.msra.mxu2 %v7690_v54  ;;  %4600 = vmatpush.bf16.msra.mxu0 %v7673_v57  ;;  %v7669_v15 = vld [vmem:[#allocation8 + $0x10] sm:$0xff]  ;;  %v3868_v54 = vpop.f32.mrf.mxu0  ;;  %v3881_v57 = vpop.f32.mrf.mxu1  ;;  %v3817_v6 = vadd.f32 %v8130_v5, %v3804_v47 }
 0x32a   :  { %4062 = vmatmul.bf16.vlgmr.msrb.gmra.mxu3 %v8022_v42  ;;  %v7670_v42 = vld [vmem:[#allocation8 + $0x18] sm:$0xff]  ;;  %v7677_v17 = vld [vmem:[#allocation8 + $0x50] sm:$0xff] }
 0x32b   :  { %4638 = vmatpush.bf16.msra.mxu3 %v7698_v55  ;;  %4613 = vmatpush.bf16.msra.mxu1 %v7681_v58  ;;  %v7685_v23 = vld [vmem:[#allocation8 + $0x90] sm:$0xff]  ;;  %v7711_v55 = vld [vmem:[#allocation8 + $0x160] sm:$0xff] }
 0x32c   :  { %v7693_v25 = vld [vmem:[#allocation8 + $0xd0] sm:$0xff]  ;;  %v7719_v58 = vld [vmem:[#allocation8 + $0x1a0] sm:$0xff] }
 0x32d   :  { %4626 = vmatpush.bf16.msra.mxu2 %v7689_v59  ;;  %4601 = vmatpush.bf16.msra.mxu0 %v7672_v62  ;;  %v7705_v49 = vld [vmem:[#allocation8 + $0x130] sm:$0xff]  ;;  %v7702_v59 = vld [vmem:[#allocation8 + $0x118] sm:$0xff]  ;;  %v3894_v62 = vpop.f32.mrf.mxu2 }
 0x32e   :  { %v7713_v56 = vld [vmem:[#allocation8 + $0x170] sm:$0xff] }
 0x32f   :  { %4639 = vmatpush.bf16.msra.mxu3 %v7697_v61  ;;  %4614 = vmatpush.bf16.msra.mxu1 %v7680_v0  ;;  %v7721_v63 = vld [vmem:[#allocation8 + $0x1b0] sm:$0xff]  ;;  %v7710_v61 = vld [vmem:[#allocation8 + $0x158] sm:$0xff]  ;;  %v3830_v0 = vadd.f32 %v8132_v7, %v3817_v6  ;;  %v7708_v7 = vld [vmem:[#allocation8 + $0x148] sm:$0xff]  ;;  %v3909_v16 = vpop.f32.mrf.mxu3 }
 0x331   :  { %4627 = vmatpush.bf16.msra.mxu2 %v7688_v1  ;;  %4602 = vmatpush.bf16.msra.mxu0 %v7671_v4  ;;  %v7718_v1 = vld [vmem:[#allocation8 + $0x198] sm:$0xff]  ;;  %v3870_v4 = vpop.f32.mrf.mxu0  ;;  %v3843_v5 = vadd.f32 %v8134_v11, %v3830_v0  ;;  %v4071_v11 = vmax.f32 %v8112_v13, 0.0 }
 0x333   :  { %4640 = vmatpush.bf16.msra.mxu3 %v7696_v2  ;;  %4615 = vmatpush.bf16.msra.mxu1 %v7679_v41  ;;  %v7701_v2 = vld [vmem:[#allocation8 + $0x110] sm:$0xff] }
 0x334   :  { %v7709_v41 = vld [vmem:[#allocation8 + $0x150] sm:$0xff] }
 0x335   :  { %4628 = vmatpush.bf16.msra.mxu2 %v7687_v44  ;;  %4603 = vmatpush.bf16.msra.mxu0 %v7670_v42  ;;  %v3883_v44 = vpop.f32.mrf.mxu1 }
 0x337   :  { %4641 = vmatpush.bf16.msra.mxu3 %v7695_v38  ;;  %4616 = vmatpush.bf16.msra.mxu1 %v7678_v8  ;;  %v8150_v38 = vld [vmem:[#allocation7] sm:$0xff]  ;;  %v7717_v8 = vld [vmem:[#allocation8 + $0x190] sm:$0xff] }
 0x338   :  { %v637_v42 = vperm.slane %v8150_v38, 6 }
 0x339   :  { %4629 = vmatpush.bf16.msra.mxu2 %v7686_v10  ;;  %4604 = vmatpush.bf16.msra.mxu0 %v7669_v15  ;;  %v7700_v10 = vld [vmem:[#allocation8 + $0x108] sm:$0xff]  ;;  %v3856_v15 = vadd.f32 %v8136_v14, %v3843_v5 }
 0x33b   :  { %4642 = vmatpush.bf16.msra.mxu3 %v7694_v12  ;;  %4617 = vmatpush.bf16.msra.mxu1 %v7677_v17  ;;  %v3896_v12 = vpop.f32.mrf.mxu2  ;;  %v3869_v17 = vadd.f32 %v3868_v54, %v637_v42  ;;  %v4072_v27 = vmax.f32 %v3856_v15, 0.0  ;;  %v638_v54 = vperm.slane %v8150_v38, 7 }
 0x33c   :  { %v7750_v12 = vld [vmem:[#allocation10] ss:$0 sm:$0xff] }
 0x33d   :  { %4630 = vmatpush.bf16.msra.mxu2 %v7685_v23  ;;  %4605 = vmatpush.bf16.msra.mxu0 %v7668_v28  ;;  %v7716_v23 = vld [vmem:[#allocation8 + $0x188] sm:$0xff]  ;;  %v3882_v28 = vadd.f32 %v3881_v57, %v3869_v17  ;;  %v4080_v31 = vpack.c.bf16 %v4072_v27, %v4072_v27 }
 0x33f   :  { %4643 = vmatpush.bf16.msra.mxu3 %v7693_v25  ;;  %4618 = vmatpush.bf16.msra.mxu1 %v7676_v29  ;;  %v7707_v25 = vld [vmem:[#allocation8 + $0x140] sm:$0xff] }
 0x340   :  { %v7715_v29 = vld [vmem:[#allocation8 + $0x180] sm:$0xff] }
 0x341   :  { %4631 = vmatpush.bf16.msra.mxu2 %v7684_v30  ;;  %4606 = vmatpush.bf16.msra.mxu0 %v7667_v34  ;;  %v4079_v30 = vpack.c.bf16 %v4071_v11, %v4071_v11  ;;  %v3920_v32 = vpop.f32.mrf.mxu0 }
 0x343   :  { %4644 = vmatpush.bf16.msra.mxu3 %v7692_v3  ;;  %4619 = vmatpush.bf16.msra.mxu1 %v7675_v36  ;;  %v3895_v3 = vadd.f32 %v3894_v62, %v3882_v28  ;;  %v3933_v34 = vpop.f32.mrf.mxu1 }
 0x344   :  { %4607 = vmatmul.bf16.vlgmr.msra.gmra.mxu0 %v4075_v19  ;;  %v7728_v19 = vld [vmem:[#allocation8 + $0x1e8] sm:$0xff] }
 0x345   :  { %4632 = vmatpush.bf16.msra.mxu2 %v7683_v21  ;;  %4651 = vmatpush.bf16.msrb.mxu0 %v7706_v39  ;;  %v3908_v14 = vadd.f32 %v3907_v9, %v3895_v3  ;;  %v7729_v39 = vld [vmem:[#allocation8 + $0x1f0] sm:$0xff] }
 0x346   :  { %4620 = vmatmul.bf16.vlgmr.msra.gmra.mxu1 %v4076_v20 }
 0x347   :  { %4645 = vmatpush.bf16.msra.mxu3 %v7691_v51  ;;  %4664 = vmatpush.bf16.msrb.mxu1 %v7714_v24  ;;  %v3921_v33 = vadd.f32 %v3920_v32, %v3908_v14 }
 0x348   :  { %4633 = vmatmul.bf16.vlgmr.msra.gmra.mxu2 %v4077_v22  ;;  %v7727_v22 = vld [vmem:[#allocation8 + $0x1e0] sm:$0xff] }
 0x349   :  { %4677 = vmatpush.bf16.msrb.mxu2 %v7722_v52  ;;  %4652 = vmatpush.bf16.msrb.mxu0 %v7705_v49  ;;  %v3934_v35 = vadd.f32 %v3933_v34, %v3921_v33  ;;  %v3922_v51 = vpop.f32.mrf.mxu0  ;;  %v7726_v49 = vld [vmem:[#allocation8 + $0x1d8] sm:$0xff]  ;;  %v7738_v34 = vld [vmem:[%s8191_s5 + $0x38] sm:$0xff] }
 0x34a   :  { %4646 = vmatmul.bf16.vlgmr.msra.gmra.mxu3 %v4078_v43  ;;  %v7733_v51 = vld [vmem:[%s8191_s5 + $0x10] sm:$0xff] }
 0x34b   :  { %4665 = vmatpush.bf16.msrb.mxu1 %v7713_v56  ;;  %v3946_v13 = vpop.f32.mrf.mxu2  ;;  %4690 = vmatpush.bf16.msrb.mxu3 %v7730_v18  ;;  %v3935_v40 = vpop.f32.mrf.mxu1  ;;  %v7725_v56 = vld [vmem:[#allocation8 + $0x1d0] sm:$0xff]  ;;  %v7735_v18 = vld [vmem:[%s8191_s5 + $0x20] sm:$0xff] }
 0x34c   :  { %v3947_v36 = vadd.f32 %v3946_v13, %v3934_v35  ;;  %v7737_v35 = vld [vmem:[%s8191_s5 + $0x30] sm:$0xff] }
 0x34d   :  { %4678 = vmatpush.bf16.msrb.mxu2 %v7721_v63  ;;  %4653 = vmatpush.bf16.msrb.mxu0 %v7704_v48  ;;  %v3959_v21 = vpop.f32.mrf.mxu3  ;;  %v7724_v48 = vld [vmem:[#allocation8 + $0x1c8] sm:$0xff] }
 0x34e   :  { %v3960_v37 = vadd.f32 %v3959_v21, %v3947_v36  ;;  %v7736_v21 = vld [vmem:[%s8191_s5 + $0x28] sm:$0xff] }
 0x34f   :  { %4666 = vmatpush.bf16.msrb.mxu1 %v7712_v46  ;;  %4691 = vmatpush.bf16.msrb.mxu3 %v7729_v39 }
 0x350   :  { %v4073_v24 = vmax.f32 %v3960_v37, 0.0  ;;  %v7734_v37 = vld [vmem:[%s8191_s5 + $0x18] sm:$0xff] }
 0x351   :  { %4679 = vmatpush.bf16.msrb.mxu2 %v7720_v60  ;;  %4654 = vmatpush.bf16.msrb.mxu0 %v7703_v50  ;;  %v7723_v50 = vld [vmem:[#allocation8 + $0x1c0] sm:$0xff] }
 0x352   :  { %v4081_v53 = vpack.c.bf16 %v4073_v24, %v4073_v24  ;;  %v7732_v24 = vld [vmem:[%s8191_s5 + $0x8] sm:$0xff] }
 0x353   :  { %4667 = vmatpush.bf16.msrb.mxu1 %v7711_v55  ;;  %v3948_v52 = vpop.f32.mrf.mxu2  ;;  %4692 = vmatpush.bf16.msrb.mxu3 %v7728_v19 }
 0x355   :  { %4680 = vmatpush.bf16.msrb.mxu2 %v7719_v58  ;;  %4655 = vmatpush.bf16.msrb.mxu0 %v7702_v59  ;;  %v3961_v20 = vpop.f32.mrf.mxu3 }
 0x357   :  { %4668 = vmatpush.bf16.msrb.mxu1 %v7710_v61  ;;  %4693 = vmatpush.bf16.msrb.mxu3 %v7727_v22 }
 0x359   :  { %4681 = vmatpush.bf16.msrb.mxu2 %v7718_v1  ;;  %4656 = vmatpush.bf16.msrb.mxu0 %v7701_v2 }
 0x35b   :  { %4669 = vmatpush.bf16.msrb.mxu1 %v7709_v41  ;;  %4694 = vmatpush.bf16.msrb.mxu3 %v7726_v49 }
 0x35d   :  { %4682 = vmatpush.bf16.msrb.mxu2 %v7717_v8  ;;  %4657 = vmatpush.bf16.msrb.mxu0 %v7700_v10 }
 0x35f   :  { %4670 = vmatpush.bf16.msrb.mxu1 %v7708_v7  ;;  %4695 = vmatpush.bf16.msrb.mxu3 %v7725_v56  ;;  %v7751_v56 = vld [vmem:[#allocation11] ss:$0 sm:$0xff] }
 0x361   :  { %4683 = vmatpush.bf16.msrb.mxu2 %v7716_v23  ;;  %4658 = vmatpush.bf16.msrb.mxu0 %v7699_v26  ;;  %v3972_v43 = vpop.f32.mrf.mxu0 }
 0x362   :  { %v3973_v6 = vadd.f32 %v3972_v43, %v638_v54 }
 0x363   :  { %4671 = vmatpush.bf16.msrb.mxu1 %v7707_v25  ;;  %v3985_v45 = vpop.f32.mrf.mxu1  ;;  %4696 = vmatpush.bf16.msrb.mxu3 %v7724_v48 }
 0x364   :  { %4659 = vmatmul.bf16.vlgmr.msrb.gmra.mxu0 %v4079_v30  ;;  %v3986_v58 = vadd.f32 %v3985_v45, %v3973_v6 }
 0x365   :  { %4684 = vmatpush.bf16.msrb.mxu2 %v7715_v29  ;;  %4773 = vmatpush.bf16.msra.mxu0 %v7738_v34 }
 0x366   :  { %4672 = vmatmul.bf16.vlgmr.msrb.gmra.mxu1 %v4080_v31 }
 0x367   :  { %4697 = vmatpush.bf16.msrb.mxu3 %v7723_v50 }
 0x368   :  { %4685 = vmatmul.bf16.vlgmr.msrb.gmra.mxu2 %v4081_v53  ;;  %v7731_v53 = vld [vmem:[%s8191_s5] sm:$0xff]  ;;  %s7947_s5 = smov [#allocation13]  }
 0x369   :  { %v3974_v47 = vpop.f32.mrf.mxu0  ;;  %4774 = vmatpush.bf16.msra.mxu0 %v7737_v35  ;;  %s4804_s20 = sshll.u32 %s7947_s5, 4  ;;  %s4805_s20 = int_to_ptr.vmem [resolvable:$true] %s4804_s20 }
 0x36b   :  { %v3998_v63 = vpop.f32.mrf.mxu2  ;;  %v3987_v60 = vpop.f32.mrf.mxu1 }
 0x36c   :  { %v3999_v59 = vadd.f32 %v3998_v63, %v3986_v58 }
 0x36d   :  { %v4011_v46 = vpop.f32.mrf.mxu3  ;;  %4775 = vmatpush.bf16.msra.mxu0 %v7736_v21 }
 0x36e   :  { %v4012_v61 = vadd.f32 %v4011_v46, %v3999_v59 }
 0x371   :  { %4776 = vmatpush.bf16.msra.mxu0 %v7735_v18 }
 0x373   :  { %v4000_v55 = vpop.f32.mrf.mxu2 }
 0x375   :  { %v4013_v57 = vpop.f32.mrf.mxu3  ;;  %4777 = vmatpush.bf16.msra.mxu0 %v7734_v37 }
 0x379   :  { %4778 = vmatpush.bf16.msra.mxu0 %v7733_v51 }
 0x37d   :  { %4779 = vmatpush.bf16.msra.mxu0 %v7732_v24 }
 0x381   :  { %4780 = vmatpush.bf16.msra.mxu0 %v7731_v53 }
 0x3a1   :  { %v4024_v62 = vpop.f32.mrf.mxu0 }
 0x3a2   :  { %v4025_v9 = vadd.f32 %v4024_v62, %v4012_v61 }
 0x3a3   :  { %v4037_v0 = vpop.f32.mrf.mxu1 }
 0x3a4   :  { %v4038_v1 = vadd.f32 %v4037_v0, %v4025_v9 }
 0x3a9   :  { %v4026_v44 = vpop.f32.mrf.mxu0 }
 0x3ab   :  { %v4050_v2 = vpop.f32.mrf.mxu2  ;;  %v4039_v5 = vpop.f32.mrf.mxu1 }
 0x3ac   :  { %v4051_v4 = vadd.f32 %v4050_v2, %v4038_v1 }
 0x3ad   :  { %v4063_v41 = vpop.f32.mrf.mxu3 }
 0x3ae   :  { %v4064_v42 = vadd.f32 %v4063_v41, %v4051_v4 }
 0x3b0   :  { %v4074_v8 = vmax.f32 %v4064_v42, 0.0 }
 0x3b2   :  { %v4082_v10 = vpack.c.bf16 %v4074_v8, %v4074_v8 }
 0x3b3   :  { %v4052_v7 = vpop.f32.mrf.mxu2 }
 0x3b4   :  { %4698 = vmatmul.bf16.vlgmr.msrb.gmra.mxu3 %v4082_v10 }
 0x3b5   :  { %v4065_v38 = vpop.f32.mrf.mxu3 }
 0x3c1   :  { %v4608_v15 = vpop.f32.mrf.mxu0 }
 0x3c2   :  { %v4609_v16 = vadd.f32 %v7750_v12, %v4608_v15 }
 0x3c3   :  { %v4621_v17 = vpop.f32.mrf.mxu1 }
 0x3c4   :  { %v4622_v23 = vadd.f32 %v4621_v17, %v4609_v16 }
 0x3c9   :  { %v4610_v27 = vpop.f32.mrf.mxu0 }
 0x3cb   :  { %v4634_v26 = vpop.f32.mrf.mxu2  ;;  %v4623_v28 = vpop.f32.mrf.mxu1 }
 0x3cc   :  { %v4635_v11 = vadd.f32 %v4634_v26, %v4622_v23 }
 0x3cd   :  { %v4647_v25 = vpop.f32.mrf.mxu3 }
 0x3ce   :  { %v4648_v29 = vadd.f32 %v4647_v25, %v4635_v11 }
 0x3d3   :  { %v4636_v30 = vpop.f32.mrf.mxu2 }
 0x3d5   :  { %v4649_v31 = vpop.f32.mrf.mxu3 }
 0x3e1   :  { %v4660_v3 = vpop.f32.mrf.mxu0 }
 0x3e2   :  { %v4661_v14 = vadd.f32 %v4660_v3, %v4648_v29 }
 0x3e3   :  { %v4673_v32 = vpop.f32.mrf.mxu1 }
 0x3e4   :  { %v4674_v33 = vadd.f32 %v4673_v32, %v4661_v14 }
 0x3e9   :  { %v4662_v13 = vpop.f32.mrf.mxu0 }
 0x3eb   :  { %v4675_v36 = vpop.f32.mrf.mxu1  ;;  %v4686_v39 = vpop.f32.mrf.mxu2 }
 0x3ec   :  { %v4687_v19 = vadd.f32 %v4686_v39, %v4674_v33 }
 0x3f3   :  { %v4688_v40 = vpop.f32.mrf.mxu2 }
 0x437   :  { %v4699_v52 = vpop.f32.mrf.mxu3 }
 0x438   :  { %v4700_v20 = vadd.f32 %v4699_v52, %v4687_v19 }
 0x43a   :  { %v4703_v22 = vmax.f32 %v4700_v20, 0.0 }
 0x43c   :  { %v4704_v49 = vpack.c.bf16 %v4703_v22, %v4703_v22 }
 0x43e   :  { %4781 = vmatmul.bf16.vlgmr.msra.gmra.mxu0 %v4704_v49 }
 0x43f   :  { %v4701_v43 = vpop.f32.mrf.mxu3 }
 0x4bb   :  { %v4782_v45 = vpop.f32.mrf.mxu0 }
 0x4bc   :  { %v4783_v63 = vadd.f32 %v7751_v56, %v4782_v45 }
 0x4be   :  { %v4787_v48 = vsel %vm4786_vm0, %v4783_v63, -inf }
 0x4bf   :  { %4788 = vmax.xlane.f32.xlu0 %v4787_v48 }
 0x4c3   :  { %v4784_v46 = vpop.f32.mrf.mxu0 }
 0x532   :  { %v4789_v47 = vpop.xlane.xlu0 %4788 }
 0x533   :  { %v4790_v60 = vsub.f32 %v4783_v63, %v4789_v47 }
 0x535   :  { %v4791_v50 = vmul.f32 1.442695, %v4790_v60 }
 0x537   :  { %7752 = vpow2.f32 %v4791_v50 }
 0x53d   :  { %v7753_v54 = vpop.eup %7752 }
 0x53e   :  { %v4793_v55 = vsel %vm4786_vm0, %v7753_v54, 0.0 }
 0x53f   :  { %4794 = vadd.xlane.f32.xlu0 %v4793_v55 }
 0x5b2   :  { %v4795_v57 = vpop.xlane.xlu0 %4794 }
 0x5b3   :  { %7754 = vrcp.f32 %v4795_v57 }
 0x5b9   :  { %v7755_v6 = vpop.eup %7754 }
 0x5ba   :  { %v4797_v58 = vmul.f32 %v7755_v6, %v7753_v54 }
 0x5bc   :  { %4798 = vst.msk [vmem:[#allocation13] sm:$0xff] %vm4786_vm0, %v4797_v58 }
 0x5bd   :  { %4809 = dma.vmem_to_hbm [thread:$0]  %s4805_s20, 128, %s4807_s23, [#allocation4]  }
 0x5be   :  { %7935 = dma.done.wait [#allocation4], 128  }
 0x5bf   :  { %7936 = vsyncadd [#allocation4], 4294967168 }
 0x5c0   :  { %4814 = vsyncpa [#allocation3], 1 }
 0x5c1   :  { %4815 = vsyncpa [#allocation6], 1 }
 0x5c2   :  { %4816 = vsyncpa [#allocation9], 1 }
 0x5c3   :  { %4817 = vsyncpa [#allocation12], 1 }
 0x5c4   :  { %4818 = vsyncpa [#allocation4], 1 }

</bundles_post_ra>
